<compile_context>
chip_gen: v7x
topology: tpu7x:2x2x1
jax: 0.10.0
libtpu: 0.0.40
codegen_flags: <defaults>
</compile_context>

<pallas_src>
import jax
import jax.numpy as jnp
import numpy as np
from jax.experimental import pallas as pl
from jax.experimental.pallas import tpu as pltpu


# ---------------------------------------------------------------------------
# Fused kernel: GCNConv(+ReLU) for all T  ->  2-layer GRU  ->  Linear(+ReLU)
# ---------------------------------------------------------------------------
def stgcn_kernel(x_ref,                    # (BN, T*F)  node-major, time in lanes
                 a_ref,                    # (M, BN)    row tile of A_norm
                 wg_ref, bg_ref,           # (F, H), (1, H)
                 wx1_ref, wh1_ref, bx1_ref, bh1_ref,   # (H,3H),(H,3H),(1,3H),(1,3H)
                 wx2_ref, wh2_ref, bx2_ref, bh2_ref,   # GRU layer 2
                 wfc_ref, bfc_ref,         # (H, OPAD), (1, OPAD)
                 o_ref):                   # (M, OPAD)
    M = a_ref.shape[0]
    F, H = wg_ref.shape
    T = x_ref.shape[1] // F
    H3 = 3 * H

    wg = wg_ref[...]
    wx1, wh1 = wx1_ref[...], wh1_ref[...]
    wx2, wh2 = wx2_ref[...], wh2_ref[...]

    # Bias broadcasts hoisted out of the unrolled loops (no per-iter
    # broadcast_in_dim filler).
    bg = jnp.broadcast_to(bg_ref[...], (M, H))
    bx1 = jnp.broadcast_to(bx1_ref[...], (M, H3))
    bh1 = jnp.broadcast_to(bh1_ref[...], (M, H3))
    bx2 = jnp.broadcast_to(bx2_ref[...], (M, H3))
    bh2 = jnp.broadcast_to(bh2_ref[...], (M, H3))

    # --- GCN neighbor aggregation for ALL timesteps: one big MXU push --------
    ax = jnp.dot(a_ref[...], x_ref[...],
                 preferred_element_type=jnp.float32)          # (M, T*F)

    # --- GCN feature transform + hoisted layer-1 x-side gate pre-activations.
    # Everything here is OUTSIDE the serial recurrence.
    gx1 = []
    for t in range(T):
        g_t = jnp.maximum(
            jnp.dot(ax[:, t * F:(t + 1) * F], wg,
                    preferred_element_type=jnp.float32) + bg, 0.0)        # (M, H)
        gx1.append(
            jnp.dot(g_t, wx1, preferred_element_type=jnp.float32) + bx1)  # (M, 3H)

    def gru_gates(pre_x, pre_h, h):
        # PyTorch gate order r|z|n along the lane axis; biases already folded in.
        r = jax.nn.sigmoid(pre_x[:, 0:H] + pre_h[:, 0:H])
        z = jax.nn.sigmoid(pre_x[:, H:2 * H] + pre_h[:, H:2 * H])
        n = jnp.tanh(pre_x[:, 2 * H:H3] + r * pre_h[:, 2 * H:H3])
        return (1.0 - z) * n + z * h

    h1 = jnp.zeros((M, H), jnp.float32)
    h2 = jnp.zeros((M, H), jnp.float32)

    # T is small and static: full unroll keeps h1/h2 live in vregs and lets the
    # scheduler overlap MXU pushes with EUP sigmoid/tanh across steps.
    # TODO(synk): nn.GRU inter-layer dropout is training-only; eval-mode
    # (identity) semantics implemented.
    for t in range(T):
        gh1 = jnp.dot(h1, wh1, preferred_element_type=jnp.float32) + bh1
        h1 = gru_gates(gx1[t], gh1, h1)
        gx2 = jnp.dot(h1, wx2, preferred_element_type=jnp.float32) + bx2
        gh2 = jnp.dot(h2, wh2, preferred_element_type=jnp.float32) + bh2
        h2 = gru_gates(gx2, gh2, h2)

    y = jnp.dot(h2, wfc_ref[...], preferred_element_type=jnp.float32) + bfc_ref[...]
    o_ref[...] = jnp.maximum(y, 0.0)        # (M, OPAD) — lane-dense store


# ---------------------------------------------------------------------------
# Wrapper: host-side (constant) parameter re-layout + single pallas_call
# ---------------------------------------------------------------------------
def stgcn_forward(x_seq, a_norm, params, *, bn_tile=256):
    B, T, N, F = x_seq.shape
    BN = B * N
    H = params["gcn_w"].shape[0]          # torch layout (H, F)
    O = params["fc_w"].shape[0]           # torch layout (O, H)
    OPAD = ((O + 127) // 128) * 128       # lane-dense output width

    # Node-major / time-in-lanes layout: x_wide[b*N+n, t*F+f] = x_seq[b,t,n,f].
    # Cheap XLA layout plumbing in HBM; no in-kernel transpose/concat needed.
    x_wide = jnp.transpose(x_seq, (0, 2, 1, 3)).reshape(BN, T * F)

    wg = params["gcn_w"].T                       # (F, H)
    bg = params["gcn_b"].reshape(1, H)

    def prep_gru(w_ih, w_hh, b_ih, b_hh):
        # torch packs gates r|z|n along rows of (3H, H) and computes x @ W^T,
        # so transposing keeps r|z|n contiguous along the lane axis.
        return w_ih.T, w_hh.T, b_ih.reshape(1, 3 * H), b_hh.reshape(1, 3 * H)

    wx1, wh1, bx1, bh1 = prep_gru(params["w_ih_l0"], params["w_hh_l0"],
                                  params["b_ih_l0"], params["b_hh_l0"])
    wx2, wh2, bx2, bh2 = prep_gru(params["w_ih_l1"], params["w_hh_l1"],
                                  params["b_ih_l1"], params["b_hh_l1"])
    wfc = jnp.pad(params["fc_w"].T, ((0, 0), (0, OPAD - O)))          # (H, OPAD)
    bfc = jnp.pad(params["fc_b"].reshape(1, O), ((0, 0), (0, OPAD - O)))

    # BN-row grid axis: GRU rows are independent, so tiles can land on separate
    # TensorCores (v7x) and bound per-step VMEM (A row-tiles). Grid is (1,) at
    # these toy shapes.
    tile = min(bn_tile, BN)
    assert BN % tile == 0 and tile % 8 == 0
    grid = (BN // tile,)

    rep2 = lambda i: (0, 0)                 # whole-array blocks, reused per step
    in_specs = [
        pl.BlockSpec((BN, T * F), rep2),            # x_wide (needed by every tile)
        pl.BlockSpec((tile, BN), lambda i: (i, 0)),  # A row tile
        pl.BlockSpec(wg.shape, rep2), pl.BlockSpec(bg.shape, rep2),
        pl.BlockSpec(wx1.shape, rep2), pl.BlockSpec(wh1.shape, rep2),
        pl.BlockSpec(bx1.shape, rep2), pl.BlockSpec(bh1.shape, rep2),
        pl.BlockSpec(wx2.shape, rep2), pl.BlockSpec(wh2.shape, rep2),
        pl.BlockSpec(bx2.shape, rep2), pl.BlockSpec(bh2.shape, rep2),
        pl.BlockSpec(wfc.shape, rep2), pl.BlockSpec(bfc.shape, rep2),
    ]

    out = pl.pallas_call(
        stgcn_kernel,
        out_shape=jax.ShapeDtypeStruct((BN, OPAD), jnp.float32),
        grid=grid,
        in_specs=in_specs,
        out_specs=pl.BlockSpec((tile, OPAD), lambda i: (i, 0)),
        compiler_params=pltpu.CompilerParams(
            dimension_semantics=("parallel",)),
    )(x_wide, a_norm, wg, bg, wx1, wh1, bx1, bh1, wx2, wh2, bx2, bh2, wfc, bfc)

    return out[:, :O].reshape(B, N, O)


# ---------------------------------------------------------------------------
# Dense normalized adjacency (PyG GCNConv gcn_norm, add_self_loops=True)
# ---------------------------------------------------------------------------
def build_gcn_adjacency(edge_index, total_nodes):
    src, dst = edge_index
    a = jnp.zeros((total_nodes, total_nodes), jnp.float32)
    a = a.at[dst, src].add(1.0)                       # message from src (j) to dst (i)
    a = a + jnp.eye(total_nodes, dtype=jnp.float32)   # self-loops on all flattened nodes
    deg = a.sum(axis=1)
    dinv = jnp.where(deg > 0, 1.0 / jnp.sqrt(deg), 0.0)
    return a * dinv[:, None] * dinv[None, :]


# ---------------------------------------------------------------------------
# Pure-JAX reference (PyTorch-layout params) — verification only
# ---------------------------------------------------------------------------
def stgcn_reference(x_seq, a_norm, params):
    B, T, N, F = x_seq.shape
    BN = B * N
    H = params["gcn_w"].shape[0]
    x_tbn = jnp.transpose(x_seq, (1, 0, 2, 3)).reshape(T, BN, F)
    gcn = jax.nn.relu(
        jnp.einsum("ij,tjf,hf->tih", a_norm, x_tbn, params["gcn_w"])
        + params["gcn_b"][None, None, :])

    def cell(x, h, w_ih, w_hh, b_ih, b_hh):
        gi = x @ w_ih.T + b_ih
        gh = h @ w_hh.T + b_hh
        r = jax.nn.sigmoid(gi[:, :H] + gh[:, :H])
        z = jax.nn.sigmoid(gi[:, H:2 * H] + gh[:, H:2 * H])
        n = jnp.tanh(gi[:, 2 * H:] + r * gh[:, 2 * H:])
        return (1.0 - z) * n + z * h

    h1 = jnp.zeros((BN, H), jnp.float32)
    h2 = jnp.zeros((BN, H), jnp.float32)
    for t in range(T):
        h1 = cell(gcn[t], h1, params["w_ih_l0"], params["w_hh_l0"],
                  params["b_ih_l0"], params["b_hh_l0"])
        h2 = cell(h1, h2, params["w_ih_l1"], params["w_hh_l1"],
                  params["b_ih_l1"], params["b_hh_l1"])
    y = jax.nn.relu(h2 @ params["fc_w"].T + params["fc_b"])
    return y.reshape(B, N, -1)


if __name__ == "__main__":
    # Small deterministic shapes: batch=2, seq=8, nodes=16, in=4, hidden=32, out=8
    B, T, N, F, H, O = 2, 8, 16, 4, 32, 8
    BN = B * N

    key = jax.random.PRNGKey(0)
    ks = jax.random.split(key, 16)
    s = 0.1
    params = {
        # PyTorch parameter layouts
        "gcn_w": s * jax.random.normal(ks[0], (H, F), jnp.float32),
        "gcn_b": s * jax.random.normal(ks[1], (H,), jnp.float32),
        "w_ih_l0": s * jax.random.normal(ks[2], (3 * H, H), jnp.float32),
        "w_hh_l0": s * jax.random.normal(ks[3], (3 * H, H), jnp.float32),
        "b_ih_l0": s * jax.random.normal(ks[4], (3 * H,), jnp.float32),
        "b_hh_l0": s * jax.random.normal(ks[5], (3 * H,), jnp.float32),
        "w_ih_l1": s * jax.random.normal(ks[6], (3 * H, H), jnp.float32),
        "w_hh_l1": s * jax.random.normal(ks[7], (3 * H, H), jnp.float32),
        "b_ih_l1": s * jax.random.normal(ks[8], (3 * H,), jnp.float32),
        "b_hh_l1": s * jax.random.normal(ks[9], (3 * H,), jnp.float32),
        "fc_w": s * jax.random.normal(ks[10], (O, H), jnp.float32),
        "fc_b": s * jax.random.normal(ks[11], (O,), jnp.float32),
    }

    x_seq = jax.random.normal(ks[12], (B, T, N, F), jnp.float32)

    # Ring graph on the N "real" nodes (undirected), edge_weight=None (ones).
    src = np.arange(N)
    dst = (src + 1) % N
    edge_index = (jnp.asarray(np.concatenate([src, dst]), jnp.int32),
                  jnp.asarray(np.concatenate([dst, src]), jnp.int32))
    a_norm = build_gcn_adjacency(edge_index, BN)

    fwd = jax.jit(stgcn_forward)
    out = jax.block_until_ready(fwd(x_seq, a_norm, params))
    ref = jax.block_until_ready(stgcn_reference(x_seq, a_norm, params))

    assert out.shape == (B, N, O), out.shape
    np.testing.assert_allclose(np.asarray(out), np.asarray(ref), rtol=1e-5, atol=1e-5)
    print("KERNEL_OK")
</pallas_src>

<mosaic_0001>
module attributes {stable_mosaic.version = 11 : i64} {
  func.func @stgcn_kernel(%arg0: i32, %arg1: memref<32x32xf32, #tpu.memory_space<vmem>>, %arg2: memref<32x32xf32, #tpu.memory_space<vmem>>, %arg3: memref<4x32xf32, #tpu.memory_space<vmem>>, %arg4: memref<1x32xf32, #tpu.memory_space<vmem>>, %arg5: memref<32x96xf32, #tpu.memory_space<vmem>>, %arg6: memref<32x96xf32, #tpu.memory_space<vmem>>, %arg7: memref<1x96xf32, #tpu.memory_space<vmem>>, %arg8: memref<1x96xf32, #tpu.memory_space<vmem>>, %arg9: memref<32x96xf32, #tpu.memory_space<vmem>>, %arg10: memref<32x96xf32, #tpu.memory_space<vmem>>, %arg11: memref<1x96xf32, #tpu.memory_space<vmem>>, %arg12: memref<1x96xf32, #tpu.memory_space<vmem>>, %arg13: memref<32x128xf32, #tpu.memory_space<vmem>>, %arg14: memref<1x128xf32, #tpu.memory_space<vmem>>, %arg15: memref<32x128xf32, #tpu.memory_space<vmem>>) attributes {dimension_semantics = [#tpu.dimension_semantics<parallel>], iteration_bounds = array<i64: 1>, scalar_prefetch = 0 : i64, scratch_operands = 0 : i64, tpu.core_type = #tpu.core_type<tc>, window_params = [{pipeline_mode = #tpu.pipeline_mode<synchronous>, transform_indices = @transform_0, window_bounds = array<i64: 32, 32>}, {transform_indices = @transform_1, window_bounds = array<i64: 32, 32>}, {pipeline_mode = #tpu.pipeline_mode<synchronous>, transform_indices = @transform_2, window_bounds = array<i64: 4, 32>}, {pipeline_mode = #tpu.pipeline_mode<synchronous>, transform_indices = @transform_3, window_bounds = array<i64: 1, 32>}, {pipeline_mode = #tpu.pipeline_mode<synchronous>, transform_indices = @transform_4, window_bounds = array<i64: 32, 96>}, {pipeline_mode = #tpu.pipeline_mode<synchronous>, transform_indices = @transform_5, window_bounds = array<i64: 32, 96>}, {pipeline_mode = #tpu.pipeline_mode<synchronous>, transform_indices = @transform_6, window_bounds = array<i64: 1, 96>}, {pipeline_mode = #tpu.pipeline_mode<synchronous>, transform_indices = @transform_7, window_bounds = array<i64: 1, 96>}, {pipeline_mode = #tpu.pipeline_mode<synchronous>, transform_indices = @transform_8, window_bounds = array<i64: 32, 96>}, {pipeline_mode = #tpu.pipeline_mode<synchronous>, transform_indices = @transform_9, window_bounds = array<i64: 32, 96>}, {pipeline_mode = #tpu.pipeline_mode<synchronous>, transform_indices = @transform_10, window_bounds = array<i64: 1, 96>}, {pipeline_mode = #tpu.pipeline_mode<synchronous>, transform_indices = @transform_11, window_bounds = array<i64: 1, 96>}, {pipeline_mode = #tpu.pipeline_mode<synchronous>, transform_indices = @transform_12, window_bounds = array<i64: 32, 128>}, {pipeline_mode = #tpu.pipeline_mode<synchronous>, transform_indices = @transform_13, window_bounds = array<i64: 1, 128>}, {transform_indices = @transform_14, window_bounds = array<i64: 32, 128>}]} {
    %c0 = arith.constant 0 : index
    %c0_0 = arith.constant 0 : index
    %0 = vector.load %arg3[%c0, %c0_0] : memref<4x32xf32, #tpu.memory_space<vmem>>, vector<4x32xf32>
    %c0_1 = arith.constant 0 : index
    %c0_2 = arith.constant 0 : index
    %1 = vector.load %arg5[%c0_1, %c0_2] : memref<32x96xf32, #tpu.memory_space<vmem>>, vector<32x96xf32>
    %c0_3 = arith.constant 0 : index
    %c0_4 = arith.constant 0 : index
    %2 = vector.load %arg6[%c0_3, %c0_4] : memref<32x96xf32, #tpu.memory_space<vmem>>, vector<32x96xf32>
    %c0_5 = arith.constant 0 : index
    %c0_6 = arith.constant 0 : index
    %3 = vector.load %arg9[%c0_5, %c0_6] : memref<32x96xf32, #tpu.memory_space<vmem>>, vector<32x96xf32>
    %c0_7 = arith.constant 0 : index
    %c0_8 = arith.constant 0 : index
    %4 = vector.load %arg10[%c0_7, %c0_8] : memref<32x96xf32, #tpu.memory_space<vmem>>, vector<32x96xf32>
    %c0_9 = arith.constant 0 : index
    %c0_10 = arith.constant 0 : index
    %5 = vector.load %arg4[%c0_9, %c0_10] : memref<1x32xf32, #tpu.memory_space<vmem>>, vector<1x32xf32>
    %6 = vector.shape_cast %5 : vector<1x32xf32> to vector<1x32xf32>
    %7 = vector.broadcast %6 : vector<1x32xf32> to vector<32x32xf32>
    %c0_11 = arith.constant 0 : index
    %c0_12 = arith.constant 0 : index
    %8 = vector.load %arg7[%c0_11, %c0_12] : memref<1x96xf32, #tpu.memory_space<vmem>>, vector<1x96xf32>
    %9 = vector.shape_cast %8 : vector<1x96xf32> to vector<1x96xf32>
    %10 = vector.broadcast %9 : vector<1x96xf32> to vector<32x96xf32>
    %c0_13 = arith.constant 0 : index
    %c0_14 = arith.constant 0 : index
    %11 = vector.load %arg8[%c0_13, %c0_14] : memref<1x96xf32, #tpu.memory_space<vmem>>, vector<1x96xf32>
    %12 = vector.shape_cast %11 : vector<1x96xf32> to vector<1x96xf32>
    %13 = vector.broadcast %12 : vector<1x96xf32> to vector<32x96xf32>
    %c0_15 = arith.constant 0 : index
    %c0_16 = arith.constant 0 : index
    %14 = vector.load %arg11[%c0_15, %c0_16] : memref<1x96xf32, #tpu.memory_space<vmem>>, vector<1x96xf32>
    %15 = vector.shape_cast %14 : vector<1x96xf32> to vector<1x96xf32>
    %16 = vector.broadcast %15 : vector<1x96xf32> to vector<32x96xf32>
    %c0_17 = arith.constant 0 : index
    %c0_18 = arith.constant 0 : index
    %17 = vector.load %arg12[%c0_17, %c0_18] : memref<1x96xf32, #tpu.memory_space<vmem>>, vector<1x96xf32>
    %18 = vector.shape_cast %17 : vector<1x96xf32> to vector<1x96xf32>
    %19 = vector.broadcast %18 : vector<1x96xf32> to vector<32x96xf32>
    %c0_19 = arith.constant 0 : index
    %c0_20 = arith.constant 0 : index
    %20 = vector.load %arg2[%c0_19, %c0_20] : memref<32x32xf32, #tpu.memory_space<vmem>>, vector<32x32xf32>
    %c0_21 = arith.constant 0 : index
    %c0_22 = arith.constant 0 : index
    %21 = vector.load %arg1[%c0_21, %c0_22] : memref<32x32xf32, #tpu.memory_space<vmem>>, vector<32x32xf32>
    %cst = arith.constant dense<0.000000e+00> : vector<32x32xf32>
    %22 = tpu.matmul %20, %21, %cst {dimension_numbers = #tpu.dot_dimension_numbers<[1], [0], [0], [1], [0, 0, 1, 1], [], []>} : vector<32x32xf32>, vector<32x32xf32>, vector<32x32xf32> -> vector<32x32xf32>
    %23 = vector.extract_strided_slice %22 {offsets = [0, 0], sizes = [32, 4], strides = [1, 1]} : vector<32x32xf32> to vector<32x4xf32>
    %cst_23 = arith.constant dense<0.000000e+00> : vector<32x32xf32>
    %24 = tpu.matmul %23, %0, %cst_23 {dimension_numbers = #tpu.dot_dimension_numbers<[1], [0], [0], [1], [0, 0, 1, 1], [], []>} : vector<32x4xf32>, vector<4x32xf32>, vector<32x32xf32> -> vector<32x32xf32>
    %25 = arith.addf %24, %7 : vector<32x32xf32>
    %cst_24 = arith.constant 0.000000e+00 : f32
    %26 = vector.broadcast %cst_24 : f32 to vector<32x32xf32>
    %27 = arith.maximumf %25, %26 : vector<32x32xf32>
    %cst_25 = arith.constant dense<0.000000e+00> : vector<32x96xf32>
    %28 = tpu.matmul %27, %1, %cst_25 {dimension_numbers = #tpu.dot_dimension_numbers<[1], [0], [0], [1], [0, 0, 1, 1], [], []>} : vector<32x32xf32>, vector<32x96xf32>, vector<32x96xf32> -> vector<32x96xf32>
    %29 = arith.addf %28, %10 : vector<32x96xf32>
    %30 = vector.extract_strided_slice %22 {offsets = [0, 4], sizes = [32, 4], strides = [1, 1]} : vector<32x32xf32> to vector<32x4xf32>
    %cst_26 = arith.constant dense<0.000000e+00> : vector<32x32xf32>
    %31 = tpu.matmul %30, %0, %cst_26 {dimension_numbers = #tpu.dot_dimension_numbers<[1], [0], [0], [1], [0, 0, 1, 1], [], []>} : vector<32x4xf32>, vector<4x32xf32>, vector<32x32xf32> -> vector<32x32xf32>
    %32 = arith.addf %31, %7 : vector<32x32xf32>
    %cst_27 = arith.constant 0.000000e+00 : f32
    %33 = vector.broadcast %cst_27 : f32 to vector<32x32xf32>
    %34 = arith.maximumf %32, %33 : vector<32x32xf32>
    %cst_28 = arith.constant dense<0.000000e+00> : vector<32x96xf32>
    %35 = tpu.matmul %34, %1, %cst_28 {dimension_numbers = #tpu.dot_dimension_numbers<[1], [0], [0], [1], [0, 0, 1, 1], [], []>} : vector<32x32xf32>, vector<32x96xf32>, vector<32x96xf32> -> vector<32x96xf32>
    %36 = arith.addf %35, %10 : vector<32x96xf32>
    %37 = vector.extract_strided_slice %22 {offsets = [0, 8], sizes = [32, 4], strides = [1, 1]} : vector<32x32xf32> to vector<32x4xf32>
    %cst_29 = arith.constant dense<0.000000e+00> : vector<32x32xf32>
    %38 = tpu.matmul %37, %0, %cst_29 {dimension_numbers = #tpu.dot_dimension_numbers<[1], [0], [0], [1], [0, 0, 1, 1], [], []>} : vector<32x4xf32>, vector<4x32xf32>, vector<32x32xf32> -> vector<32x32xf32>
    %39 = arith.addf %38, %7 : vector<32x32xf32>
    %cst_30 = arith.constant 0.000000e+00 : f32
    %40 = vector.broadcast %cst_30 : f32 to vector<32x32xf32>
    %41 = arith.maximumf %39, %40 : vector<32x32xf32>
    %cst_31 = arith.constant dense<0.000000e+00> : vector<32x96xf32>
    %42 = tpu.matmul %41, %1, %cst_31 {dimension_numbers = #tpu.dot_dimension_numbers<[1], [0], [0], [1], [0, 0, 1, 1], [], []>} : vector<32x32xf32>, vector<32x96xf32>, vector<32x96xf32> -> vector<32x96xf32>
    %43 = arith.addf %42, %10 : vector<32x96xf32>
    %44 = vector.extract_strided_slice %22 {offsets = [0, 12], sizes = [32, 4], strides = [1, 1]} : vector<32x32xf32> to vector<32x4xf32>
    %cst_32 = arith.constant dense<0.000000e+00> : vector<32x32xf32>
    %45 = tpu.matmul %44, %0, %cst_32 {dimension_numbers = #tpu.dot_dimension_numbers<[1], [0], [0], [1], [0, 0, 1, 1], [], []>} : vector<32x4xf32>, vector<4x32xf32>, vector<32x32xf32> -> vector<32x32xf32>
    %46 = arith.addf %45, %7 : vector<32x32xf32>
    %cst_33 = arith.constant 0.000000e+00 : f32
    %47 = vector.broadcast %cst_33 : f32 to vector<32x32xf32>
    %48 = arith.maximumf %46, %47 : vector<32x32xf32>
    %cst_34 = arith.constant dense<0.000000e+00> : vector<32x96xf32>
    %49 = tpu.matmul %48, %1, %cst_34 {dimension_numbers = #tpu.dot_dimension_numbers<[1], [0], [0], [1], [0, 0, 1, 1], [], []>} : vector<32x32xf32>, vector<32x96xf32>, vector<32x96xf32> -> vector<32x96xf32>
    %50 = arith.addf %49, %10 : vector<32x96xf32>
    %51 = vector.extract_strided_slice %22 {offsets = [0, 16], sizes = [32, 4], strides = [1, 1]} : vector<32x32xf32> to vector<32x4xf32>
    %cst_35 = arith.constant dense<0.000000e+00> : vector<32x32xf32>
    %52 = tpu.matmul %51, %0, %cst_35 {dimension_numbers = #tpu.dot_dimension_numbers<[1], [0], [0], [1], [0, 0, 1, 1], [], []>} : vector<32x4xf32>, vector<4x32xf32>, vector<32x32xf32> -> vector<32x32xf32>
    %53 = arith.addf %52, %7 : vector<32x32xf32>
    %cst_36 = arith.constant 0.000000e+00 : f32
    %54 = vector.broadcast %cst_36 : f32 to vector<32x32xf32>
    %55 = arith.maximumf %53, %54 : vector<32x32xf32>
    %cst_37 = arith.constant dense<0.000000e+00> : vector<32x96xf32>
    %56 = tpu.matmul %55, %1, %cst_37 {dimension_numbers = #tpu.dot_dimension_numbers<[1], [0], [0], [1], [0, 0, 1, 1], [], []>} : vector<32x32xf32>, vector<32x96xf32>, vector<32x96xf32> -> vector<32x96xf32>
    %57 = arith.addf %56, %10 : vector<32x96xf32>
    %58 = vector.extract_strided_slice %22 {offsets = [0, 20], sizes = [32, 4], strides = [1, 1]} : vector<32x32xf32> to vector<32x4xf32>
    %cst_38 = arith.constant dense<0.000000e+00> : vector<32x32xf32>
    %59 = tpu.matmul %58, %0, %cst_38 {dimension_numbers = #tpu.dot_dimension_numbers<[1], [0], [0], [1], [0, 0, 1, 1], [], []>} : vector<32x4xf32>, vector<4x32xf32>, vector<32x32xf32> -> vector<32x32xf32>
    %60 = arith.addf %59, %7 : vector<32x32xf32>
    %cst_39 = arith.constant 0.000000e+00 : f32
    %61 = vector.broadcast %cst_39 : f32 to vector<32x32xf32>
    %62 = arith.maximumf %60, %61 : vector<32x32xf32>
    %cst_40 = arith.constant dense<0.000000e+00> : vector<32x96xf32>
    %63 = tpu.matmul %62, %1, %cst_40 {dimension_numbers = #tpu.dot_dimension_numbers<[1], [0], [0], [1], [0, 0, 1, 1], [], []>} : vector<32x32xf32>, vector<32x96xf32>, vector<32x96xf32> -> vector<32x96xf32>
    %64 = arith.addf %63, %10 : vector<32x96xf32>
    %65 = vector.extract_strided_slice %22 {offsets = [0, 24], sizes = [32, 4], strides = [1, 1]} : vector<32x32xf32> to vector<32x4xf32>
    %cst_41 = arith.constant dense<0.000000e+00> : vector<32x32xf32>
    %66 = tpu.matmul %65, %0, %cst_41 {dimension_numbers = #tpu.dot_dimension_numbers<[1], [0], [0], [1], [0, 0, 1, 1], [], []>} : vector<32x4xf32>, vector<4x32xf32>, vector<32x32xf32> -> vector<32x32xf32>
    %67 = arith.addf %66, %7 : vector<32x32xf32>
    %cst_42 = arith.constant 0.000000e+00 : f32
    %68 = vector.broadcast %cst_42 : f32 to vector<32x32xf32>
    %69 = arith.maximumf %67, %68 : vector<32x32xf32>
    %cst_43 = arith.constant dense<0.000000e+00> : vector<32x96xf32>
    %70 = tpu.matmul %69, %1, %cst_43 {dimension_numbers = #tpu.dot_dimension_numbers<[1], [0], [0], [1], [0, 0, 1, 1], [], []>} : vector<32x32xf32>, vector<32x96xf32>, vector<32x96xf32> -> vector<32x96xf32>
    %71 = arith.addf %70, %10 : vector<32x96xf32>
    %72 = vector.extract_strided_slice %22 {offsets = [0, 28], sizes = [32, 4], strides = [1, 1]} : vector<32x32xf32> to vector<32x4xf32>
    %cst_44 = arith.constant dense<0.000000e+00> : vector<32x32xf32>
    %73 = tpu.matmul %72, %0, %cst_44 {dimension_numbers = #tpu.dot_dimension_numbers<[1], [0], [0], [1], [0, 0, 1, 1], [], []>} : vector<32x4xf32>, vector<4x32xf32>, vector<32x32xf32> -> vector<32x32xf32>
    %74 = arith.addf %73, %7 : vector<32x32xf32>
    %cst_45 = arith.constant 0.000000e+00 : f32
    %75 = vector.broadcast %cst_45 : f32 to vector<32x32xf32>
    %76 = arith.maximumf %74, %75 : vector<32x32xf32>
    %cst_46 = arith.constant dense<0.000000e+00> : vector<32x96xf32>
    %77 = tpu.matmul %76, %1, %cst_46 {dimension_numbers = #tpu.dot_dimension_numbers<[1], [0], [0], [1], [0, 0, 1, 1], [], []>} : vector<32x32xf32>, vector<32x96xf32>, vector<32x96xf32> -> vector<32x96xf32>
    %78 = arith.addf %77, %10 : vector<32x96xf32>
    %cst_47 = arith.constant 0.000000e+00 : f32
    %79 = vector.broadcast %cst_47 : f32 to vector<32x32xf32>
    %cst_48 = arith.constant 0.000000e+00 : f32
    %80 = vector.broadcast %cst_48 : f32 to vector<32x32xf32>
    %cst_49 = arith.constant dense<0.000000e+00> : vector<32x96xf32>
    %81 = tpu.matmul %79, %2, %cst_49 {dimension_numbers = #tpu.dot_dimension_numbers<[1], [0], [0], [1], [0, 0, 1, 1], [], []>} : vector<32x32xf32>, vector<32x96xf32>, vector<32x96xf32> -> vector<32x96xf32>
    %82 = arith.addf %81, %13 : vector<32x96xf32>
    %83 = vector.extract_strided_slice %29 {offsets = [0, 0], sizes = [32, 32], strides = [1, 1]} : vector<32x96xf32> to vector<32x32xf32>
    %84 = vector.extract_strided_slice %82 {offsets = [0, 0], sizes = [32, 32], strides = [1, 1]} : vector<32x96xf32> to vector<32x32xf32>
    %85 = arith.addf %83, %84 : vector<32x32xf32>
    %86 = arith.negf %85 : vector<32x32xf32>
    %87 = math.exp %86 : vector<32x32xf32>
    %cst_50 = arith.constant 1.000000e+00 : f32
    %88 = vector.broadcast %cst_50 : f32 to vector<32x32xf32>
    %89 = arith.addf %88, %87 : vector<32x32xf32>
    %90 = arith.divf %88, %89 : vector<32x32xf32>
    %91 = vector.extract_strided_slice %29 {offsets = [0, 32], sizes = [32, 32], strides = [1, 1]} : vector<32x96xf32> to vector<32x32xf32>
    %92 = vector.extract_strided_slice %82 {offsets = [0, 32], sizes = [32, 32], strides = [1, 1]} : vector<32x96xf32> to vector<32x32xf32>
    %93 = arith.addf %91, %92 : vector<32x32xf32>
    %94 = arith.negf %93 : vector<32x32xf32>
    %95 = math.exp %94 : vector<32x32xf32>
    %cst_51 = arith.constant 1.000000e+00 : f32
    %96 = vector.broadcast %cst_51 : f32 to vector<32x32xf32>
    %97 = arith.addf %96, %95 : vector<32x32xf32>
    %98 = arith.divf %96, %97 : vector<32x32xf32>
    %99 = vector.extract_strided_slice %29 {offsets = [0, 64], sizes = [32, 32], strides = [1, 1]} : vector<32x96xf32> to vector<32x32xf32>
    %100 = vector.extract_strided_slice %82 {offsets = [0, 64], sizes = [32, 32], strides = [1, 1]} : vector<32x96xf32> to vector<32x32xf32>
    %101 = arith.mulf %90, %100 : vector<32x32xf32>
    %102 = arith.addf %99, %101 : vector<32x32xf32>
    %103 = math.tanh %102 : vector<32x32xf32>
    %cst_52 = arith.constant 1.000000e+00 : f32
    %104 = vector.broadcast %cst_52 : f32 to vector<32x32xf32>
    %105 = arith.subf %104, %98 : vector<32x32xf32>
    %106 = arith.mulf %105, %103 : vector<32x32xf32>
    %107 = arith.mulf %98, %79 : vector<32x32xf32>
    %108 = arith.addf %106, %107 : vector<32x32xf32>
    %cst_53 = arith.constant dense<0.000000e+00> : vector<32x96xf32>
    %109 = tpu.matmul %108, %3, %cst_53 {dimension_numbers = #tpu.dot_dimension_numbers<[1], [0], [0], [1], [0, 0, 1, 1], [], []>} : vector<32x32xf32>, vector<32x96xf32>, vector<32x96xf32> -> vector<32x96xf32>
    %110 = arith.addf %109, %16 : vector<32x96xf32>
    %cst_54 = arith.constant dense<0.000000e+00> : vector<32x96xf32>
    %111 = tpu.matmul %80, %4, %cst_54 {dimension_numbers = #tpu.dot_dimension_numbers<[1], [0], [0], [1], [0, 0, 1, 1], [], []>} : vector<32x32xf32>, vector<32x96xf32>, vector<32x96xf32> -> vector<32x96xf32>
    %112 = arith.addf %111, %19 : vector<32x96xf32>
    %113 = vector.extract_strided_slice %110 {offsets = [0, 0], sizes = [32, 32], strides = [1, 1]} : vector<32x96xf32> to vector<32x32xf32>
    %114 = vector.extract_strided_slice %112 {offsets = [0, 0], sizes = [32, 32], strides = [1, 1]} : vector<32x96xf32> to vector<32x32xf32>
    %115 = arith.addf %113, %114 : vector<32x32xf32>
    %116 = arith.negf %115 : vector<32x32xf32>
    %117 = math.exp %116 : vector<32x32xf32>
    %cst_55 = arith.constant 1.000000e+00 : f32
    %118 = vector.broadcast %cst_55 : f32 to vector<32x32xf32>
    %119 = arith.addf %118, %117 : vector<32x32xf32>
    %120 = arith.divf %118, %119 : vector<32x32xf32>
    %121 = vector.extract_strided_slice %110 {offsets = [0, 32], sizes = [32, 32], strides = [1, 1]} : vector<32x96xf32> to vector<32x32xf32>
    %122 = vector.extract_strided_slice %112 {offsets = [0, 32], sizes = [32, 32], strides = [1, 1]} : vector<32x96xf32> to vector<32x32xf32>
    %123 = arith.addf %121, %122 : vector<32x32xf32>
    %124 = arith.negf %123 : vector<32x32xf32>
    %125 = math.exp %124 : vector<32x32xf32>
    %cst_56 = arith.constant 1.000000e+00 : f32
    %126 = vector.broadcast %cst_56 : f32 to vector<32x32xf32>
    %127 = arith.addf %126, %125 : vector<32x32xf32>
    %128 = arith.divf %126, %127 : vector<32x32xf32>
    %129 = vector.extract_strided_slice %110 {offsets = [0, 64], sizes = [32, 32], strides = [1, 1]} : vector<32x96xf32> to vector<32x32xf32>
    %130 = vector.extract_strided_slice %112 {offsets = [0, 64], sizes = [32, 32], strides = [1, 1]} : vector<32x96xf32> to vector<32x32xf32>
    %131 = arith.mulf %120, %130 : vector<32x32xf32>
    %132 = arith.addf %129, %131 : vector<32x32xf32>
    %133 = math.tanh %132 : vector<32x32xf32>
    %cst_57 = arith.constant 1.000000e+00 : f32
    %134 = vector.broadcast %cst_57 : f32 to vector<32x32xf32>
    %135 = arith.subf %134, %128 : vector<32x32xf32>
    %136 = arith.mulf %135, %133 : vector<32x32xf32>
    %137 = arith.mulf %128, %80 : vector<32x32xf32>
    %138 = arith.addf %136, %137 : vector<32x32xf32>
    %cst_58 = arith.constant dense<0.000000e+00> : vector<32x96xf32>
    %139 = tpu.matmul %108, %2, %cst_58 {dimension_numbers = #tpu.dot_dimension_numbers<[1], [0], [0], [1], [0, 0, 1, 1], [], []>} : vector<32x32xf32>, vector<32x96xf32>, vector<32x96xf32> -> vector<32x96xf32>
    %140 = arith.addf %139, %13 : vector<32x96xf32>
    %141 = vector.extract_strided_slice %36 {offsets = [0, 0], sizes = [32, 32], strides = [1, 1]} : vector<32x96xf32> to vector<32x32xf32>
    %142 = vector.extract_strided_slice %140 {offsets = [0, 0], sizes = [32, 32], strides = [1, 1]} : vector<32x96xf32> to vector<32x32xf32>
    %143 = arith.addf %141, %142 : vector<32x32xf32>
    %144 = arith.negf %143 : vector<32x32xf32>
    %145 = math.exp %144 : vector<32x32xf32>
    %cst_59 = arith.constant 1.000000e+00 : f32
    %146 = vector.broadcast %cst_59 : f32 to vector<32x32xf32>
    %147 = arith.addf %146, %145 : vector<32x32xf32>
    %148 = arith.divf %146, %147 : vector<32x32xf32>
    %149 = vector.extract_strided_slice %36 {offsets = [0, 32], sizes = [32, 32], strides = [1, 1]} : vector<32x96xf32> to vector<32x32xf32>
    %150 = vector.extract_strided_slice %140 {offsets = [0, 32], sizes = [32, 32], strides = [1, 1]} : vector<32x96xf32> to vector<32x32xf32>
    %151 = arith.addf %149, %150 : vector<32x32xf32>
    %152 = arith.negf %151 : vector<32x32xf32>
    %153 = math.exp %152 : vector<32x32xf32>
    %cst_60 = arith.constant 1.000000e+00 : f32
    %154 = vector.broadcast %cst_60 : f32 to vector<32x32xf32>
    %155 = arith.addf %154, %153 : vector<32x32xf32>
    %156 = arith.divf %154, %155 : vector<32x32xf32>
    %157 = vector.extract_strided_slice %36 {offsets = [0, 64], sizes = [32, 32], strides = [1, 1]} : vector<32x96xf32> to vector<32x32xf32>
    %158 = vector.extract_strided_slice %140 {offsets = [0, 64], sizes = [32, 32], strides = [1, 1]} : vector<32x96xf32> to vector<32x32xf32>
    %159 = arith.mulf %148, %158 : vector<32x32xf32>
    %160 = arith.addf %157, %159 : vector<32x32xf32>
    %161 = math.tanh %160 : vector<32x32xf32>
    %cst_61 = arith.constant 1.000000e+00 : f32
    %162 = vector.broadcast %cst_61 : f32 to vector<32x32xf32>
    %163 = arith.subf %162, %156 : vector<32x32xf32>
    %164 = arith.mulf %163, %161 : vector<32x32xf32>
    %165 = arith.mulf %156, %108 : vector<32x32xf32>
    %166 = arith.addf %164, %165 : vector<32x32xf32>
    %cst_62 = arith.constant dense<0.000000e+00> : vector<32x96xf32>
    %167 = tpu.matmul %166, %3, %cst_62 {dimension_numbers = #tpu.dot_dimension_numbers<[1], [0], [0], [1], [0, 0, 1, 1], [], []>} : vector<32x32xf32>, vector<32x96xf32>, vector<32x96xf32> -> vector<32x96xf32>
    %168 = arith.addf %167, %16 : vector<32x96xf32>
    %cst_63 = arith.constant dense<0.000000e+00> : vector<32x96xf32>
    %169 = tpu.matmul %138, %4, %cst_63 {dimension_numbers = #tpu.dot_dimension_numbers<[1], [0], [0], [1], [0, 0, 1, 1], [], []>} : vector<32x32xf32>, vector<32x96xf32>, vector<32x96xf32> -> vector<32x96xf32>
    %170 = arith.addf %169, %19 : vector<32x96xf32>
    %171 = vector.extract_strided_slice %168 {offsets = [0, 0], sizes = [32, 32], strides = [1, 1]} : vector<32x96xf32> to vector<32x32xf32>
    %172 = vector.extract_strided_slice %170 {offsets = [0, 0], sizes = [32, 32], strides = [1, 1]} : vector<32x96xf32> to vector<32x32xf32>
    %173 = arith.addf %171, %172 : vector<32x32xf32>
    %174 = arith.negf %173 : vector<32x32xf32>
    %175 = math.exp %174 : vector<32x32xf32>
    %cst_64 = arith.constant 1.000000e+00 : f32
    %176 = vector.broadcast %cst_64 : f32 to vector<32x32xf32>
    %177 = arith.addf %176, %175 : vector<32x32xf32>
    %178 = arith.divf %176, %177 : vector<32x32xf32>
    %179 = vector.extract_strided_slice %168 {offsets = [0, 32], sizes = [32, 32], strides = [1, 1]} : vector<32x96xf32> to vector<32x32xf32>
    %180 = vector.extract_strided_slice %170 {offsets = [0, 32], sizes = [32, 32], strides = [1, 1]} : vector<32x96xf32> to vector<32x32xf32>
    %181 = arith.addf %179, %180 : vector<32x32xf32>
    %182 = arith.negf %181 : vector<32x32xf32>
    %183 = math.exp %182 : vector<32x32xf32>
    %cst_65 = arith.constant 1.000000e+00 : f32
    %184 = vector.broadcast %cst_65 : f32 to vector<32x32xf32>
    %185 = arith.addf %184, %183 : vector<32x32xf32>
    %186 = arith.divf %184, %185 : vector<32x32xf32>
    %187 = vector.extract_strided_slice %168 {offsets = [0, 64], sizes = [32, 32], strides = [1, 1]} : vector<32x96xf32> to vector<32x32xf32>
    %188 = vector.extract_strided_slice %170 {offsets = [0, 64], sizes = [32, 32], strides = [1, 1]} : vector<32x96xf32> to vector<32x32xf32>
    %189 = arith.mulf %178, %188 : vector<32x32xf32>
    %190 = arith.addf %187, %189 : vector<32x32xf32>
    %191 = math.tanh %190 : vector<32x32xf32>
    %cst_66 = arith.constant 1.000000e+00 : f32
    %192 = vector.broadcast %cst_66 : f32 to vector<32x32xf32>
    %193 = arith.subf %192, %186 : vector<32x32xf32>
    %194 = arith.mulf %193, %191 : vector<32x32xf32>
    %195 = arith.mulf %186, %138 : vector<32x32xf32>
    %196 = arith.addf %194, %195 : vector<32x32xf32>
    %cst_67 = arith.constant dense<0.000000e+00> : vector<32x96xf32>
    %197 = tpu.matmul %166, %2, %cst_67 {dimension_numbers = #tpu.dot_dimension_numbers<[1], [0], [0], [1], [0, 0, 1, 1], [], []>} : vector<32x32xf32>, vector<32x96xf32>, vector<32x96xf32> -> vector<32x96xf32>
    %198 = arith.addf %197, %13 : vector<32x96xf32>
    %199 = vector.extract_strided_slice %43 {offsets = [0, 0], sizes = [32, 32], strides = [1, 1]} : vector<32x96xf32> to vector<32x32xf32>
    %200 = vector.extract_strided_slice %198 {offsets = [0, 0], sizes = [32, 32], strides = [1, 1]} : vector<32x96xf32> to vector<32x32xf32>
    %201 = arith.addf %199, %200 : vector<32x32xf32>
    %202 = arith.negf %201 : vector<32x32xf32>
    %203 = math.exp %202 : vector<32x32xf32>
    %cst_68 = arith.constant 1.000000e+00 : f32
    %204 = vector.broadcast %cst_68 : f32 to vector<32x32xf32>
    %205 = arith.addf %204, %203 : vector<32x32xf32>
    %206 = arith.divf %204, %205 : vector<32x32xf32>
    %207 = vector.extract_strided_slice %43 {offsets = [0, 32], sizes = [32, 32], strides = [1, 1]} : vector<32x96xf32> to vector<32x32xf32>
    %208 = vector.extract_strided_slice %198 {offsets = [0, 32], sizes = [32, 32], strides = [1, 1]} : vector<32x96xf32> to vector<32x32xf32>
    %209 = arith.addf %207, %208 : vector<32x32xf32>
    %210 = arith.negf %209 : vector<32x32xf32>
    %211 = math.exp %210 : vector<32x32xf32>
    %cst_69 = arith.constant 1.000000e+00 : f32
    %212 = vector.broadcast %cst_69 : f32 to vector<32x32xf32>
    %213 = arith.addf %212, %211 : vector<32x32xf32>
    %214 = arith.divf %212, %213 : vector<32x32xf32>
    %215 = vector.extract_strided_slice %43 {offsets = [0, 64], sizes = [32, 32], strides = [1, 1]} : vector<32x96xf32> to vector<32x32xf32>
    %216 = vector.extract_strided_slice %198 {offsets = [0, 64], sizes = [32, 32], strides = [1, 1]} : vector<32x96xf32> to vector<32x32xf32>
    %217 = arith.mulf %206, %216 : vector<32x32xf32>
    %218 = arith.addf %215, %217 : vector<32x32xf32>
    %219 = math.tanh %218 : vector<32x32xf32>
    %cst_70 = arith.constant 1.000000e+00 : f32
    %220 = vector.broadcast %cst_70 : f32 to vector<32x32xf32>
    %221 = arith.subf %220, %214 : vector<32x32xf32>
    %222 = arith.mulf %221, %219 : vector<32x32xf32>
    %223 = arith.mulf %214, %166 : vector<32x32xf32>
    %224 = arith.addf %222, %223 : vector<32x32xf32>
    %cst_71 = arith.constant dense<0.000000e+00> : vector<32x96xf32>
    %225 = tpu.matmul %224, %3, %cst_71 {dimension_numbers = #tpu.dot_dimension_numbers<[1], [0], [0], [1], [0, 0, 1, 1], [], []>} : vector<32x32xf32>, vector<32x96xf32>, vector<32x96xf32> -> vector<32x96xf32>
    %226 = arith.addf %225, %16 : vector<32x96xf32>
    %cst_72 = arith.constant dense<0.000000e+00> : vector<32x96xf32>
    %227 = tpu.matmul %196, %4, %cst_72 {dimension_numbers = #tpu.dot_dimension_numbers<[1], [0], [0], [1], [0, 0, 1, 1], [], []>} : vector<32x32xf32>, vector<32x96xf32>, vector<32x96xf32> -> vector<32x96xf32>
    %228 = arith.addf %227, %19 : vector<32x96xf32>
    %229 = vector.extract_strided_slice %226 {offsets = [0, 0], sizes = [32, 32], strides = [1, 1]} : vector<32x96xf32> to vector<32x32xf32>
    %230 = vector.extract_strided_slice %228 {offsets = [0, 0], sizes = [32, 32], strides = [1, 1]} : vector<32x96xf32> to vector<32x32xf32>
    %231 = arith.addf %229, %230 : vector<32x32xf32>
    %232 = arith.negf %231 : vector<32x32xf32>
    %233 = math.exp %232 : vector<32x32xf32>
    %cst_73 = arith.constant 1.000000e+00 : f32
    %234 = vector.broadcast %cst_73 : f32 to vector<32x32xf32>
    %235 = arith.addf %234, %233 : vector<32x32xf32>
    %236 = arith.divf %234, %235 : vector<32x32xf32>
    %237 = vector.extract_strided_slice %226 {offsets = [0, 32], sizes = [32, 32], strides = [1, 1]} : vector<32x96xf32> to vector<32x32xf32>
    %238 = vector.extract_strided_slice %228 {offsets = [0, 32], sizes = [32, 32], strides = [1, 1]} : vector<32x96xf32> to vector<32x32xf32>
    %239 = arith.addf %237, %238 : vector<32x32xf32>
    %240 = arith.negf %239 : vector<32x32xf32>
    %241 = math.exp %240 : vector<32x32xf32>
    %cst_74 = arith.constant 1.000000e+00 : f32
    %242 = vector.broadcast %cst_74 : f32 to vector<32x32xf32>
    %243 = arith.addf %242, %241 : vector<32x32xf32>
    %244 = arith.divf %242, %243 : vector<32x32xf32>
    %245 = vector.extract_strided_slice %226 {offsets = [0, 64], sizes = [32, 32], strides = [1, 1]} : vector<32x96xf32> to vector<32x32xf32>
    %246 = vector.extract_strided_slice %228 {offsets = [0, 64], sizes = [32, 32], strides = [1, 1]} : vector<32x96xf32> to vector<32x32xf32>
    %247 = arith.mulf %236, %246 : vector<32x32xf32>
    %248 = arith.addf %245, %247 : vector<32x32xf32>
    %249 = math.tanh %248 : vector<32x32xf32>
    %cst_75 = arith.constant 1.000000e+00 : f32
    %250 = vector.broadcast %cst_75 : f32 to vector<32x32xf32>
    %251 = arith.subf %250, %244 : vector<32x32xf32>
    %252 = arith.mulf %251, %249 : vector<32x32xf32>
    %253 = arith.mulf %244, %196 : vector<32x32xf32>
    %254 = arith.addf %252, %253 : vector<32x32xf32>
    %cst_76 = arith.constant dense<0.000000e+00> : vector<32x96xf32>
    %255 = tpu.matmul %224, %2, %cst_76 {dimension_numbers = #tpu.dot_dimension_numbers<[1], [0], [0], [1], [0, 0, 1, 1], [], []>} : vector<32x32xf32>, vector<32x96xf32>, vector<32x96xf32> -> vector<32x96xf32>
    %256 = arith.addf %255, %13 : vector<32x96xf32>
    %257 = vector.extract_strided_slice %50 {offsets = [0, 0], sizes = [32, 32], strides = [1, 1]} : vector<32x96xf32> to vector<32x32xf32>
    %258 = vector.extract_strided_slice %256 {offsets = [0, 0], sizes = [32, 32], strides = [1, 1]} : vector<32x96xf32> to vector<32x32xf32>
    %259 = arith.addf %257, %258 : vector<32x32xf32>
    %260 = arith.negf %259 : vector<32x32xf32>
    %261 = math.exp %260 : vector<32x32xf32>
    %cst_77 = arith.constant 1.000000e+00 : f32
    %262 = vector.broadcast %cst_77 : f32 to vector<32x32xf32>
    %263 = arith.addf %262, %261 : vector<32x32xf32>
    %264 = arith.divf %262, %263 : vector<32x32xf32>
    %265 = vector.extract_strided_slice %50 {offsets = [0, 32], sizes = [32, 32], strides = [1, 1]} : vector<32x96xf32> to vector<32x32xf32>
    %266 = vector.extract_strided_slice %256 {offsets = [0, 32], sizes = [32, 32], strides = [1, 1]} : vector<32x96xf32> to vector<32x32xf32>
    %267 = arith.addf %265, %266 : vector<32x32xf32>
    %268 = arith.negf %267 : vector<32x32xf32>
    %269 = math.exp %268 : vector<32x32xf32>
    %cst_78 = arith.constant 1.000000e+00 : f32
    %270 = vector.broadcast %cst_78 : f32 to vector<32x32xf32>
    %271 = arith.addf %270, %269 : vector<32x32xf32>
    %272 = arith.divf %270, %271 : vector<32x32xf32>
    %273 = vector.extract_strided_slice %50 {offsets = [0, 64], sizes = [32, 32], strides = [1, 1]} : vector<32x96xf32> to vector<32x32xf32>
    %274 = vector.extract_strided_slice %256 {offsets = [0, 64], sizes = [32, 32], strides = [1, 1]} : vector<32x96xf32> to vector<32x32xf32>
    %275 = arith.mulf %264, %274 : vector<32x32xf32>
    %276 = arith.addf %273, %275 : vector<32x32xf32>
    %277 = math.tanh %276 : vector<32x32xf32>
    %cst_79 = arith.constant 1.000000e+00 : f32
    %278 = vector.broadcast %cst_79 : f32 to vector<32x32xf32>
    %279 = arith.subf %278, %272 : vector<32x32xf32>
    %280 = arith.mulf %279, %277 : vector<32x32xf32>
    %281 = arith.mulf %272, %224 : vector<32x32xf32>
    %282 = arith.addf %280, %281 : vector<32x32xf32>
    %cst_80 = arith.constant dense<0.000000e+00> : vector<32x96xf32>
    %283 = tpu.matmul %282, %3, %cst_80 {dimension_numbers = #tpu.dot_dimension_numbers<[1], [0], [0], [1], [0, 0, 1, 1], [], []>} : vector<32x32xf32>, vector<32x96xf32>, vector<32x96xf32> -> vector<32x96xf32>
    %284 = arith.addf %283, %16 : vector<32x96xf32>
    %cst_81 = arith.constant dense<0.000000e+00> : vector<32x96xf32>
    %285 = tpu.matmul %254, %4, %cst_81 {dimension_numbers = #tpu.dot_dimension_numbers<[1], [0], [0], [1], [0, 0, 1, 1], [], []>} : vector<32x32xf32>, vector<32x96xf32>, vector<32x96xf32> -> vector<32x96xf32>
    %286 = arith.addf %285, %19 : vector<32x96xf32>
    %287 = vector.extract_strided_slice %284 {offsets = [0, 0], sizes = [32, 32], strides = [1, 1]} : vector<32x96xf32> to vector<32x32xf32>
    %288 = vector.extract_strided_slice %286 {offsets = [0, 0], sizes = [32, 32], strides = [1, 1]} : vector<32x96xf32> to vector<32x32xf32>
    %289 = arith.addf %287, %288 : vector<32x32xf32>
    %290 = arith.negf %289 : vector<32x32xf32>
    %291 = math.exp %290 : vector<32x32xf32>
    %cst_82 = arith.constant 1.000000e+00 : f32
    %292 = vector.broadcast %cst_82 : f32 to vector<32x32xf32>
    %293 = arith.addf %292, %291 : vector<32x32xf32>
    %294 = arith.divf %292, %293 : vector<32x32xf32>
    %295 = vector.extract_strided_slice %284 {offsets = [0, 32], sizes = [32, 32], strides = [1, 1]} : vector<32x96xf32> to vector<32x32xf32>
    %296 = vector.extract_strided_slice %286 {offsets = [0, 32], sizes = [32, 32], strides = [1, 1]} : vector<32x96xf32> to vector<32x32xf32>
    %297 = arith.addf %295, %296 : vector<32x32xf32>
    %298 = arith.negf %297 : vector<32x32xf32>
    %299 = math.exp %298 : vector<32x32xf32>
    %cst_83 = arith.constant 1.000000e+00 : f32
    %300 = vector.broadcast %cst_83 : f32 to vector<32x32xf32>
    %301 = arith.addf %300, %299 : vector<32x32xf32>
    %302 = arith.divf %300, %301 : vector<32x32xf32>
    %303 = vector.extract_strided_slice %284 {offsets = [0, 64], sizes = [32, 32], strides = [1, 1]} : vector<32x96xf32> to vector<32x32xf32>
    %304 = vector.extract_strided_slice %286 {offsets = [0, 64], sizes = [32, 32], strides = [1, 1]} : vector<32x96xf32> to vector<32x32xf32>
    %305 = arith.mulf %294, %304 : vector<32x32xf32>
    %306 = arith.addf %303, %305 : vector<32x32xf32>
    %307 = math.tanh %306 : vector<32x32xf32>
    %cst_84 = arith.constant 1.000000e+00 : f32
    %308 = vector.broadcast %cst_84 : f32 to vector<32x32xf32>
    %309 = arith.subf %308, %302 : vector<32x32xf32>
    %310 = arith.mulf %309, %307 : vector<32x32xf32>
    %311 = arith.mulf %302, %254 : vector<32x32xf32>
    %312 = arith.addf %310, %311 : vector<32x32xf32>
    %cst_85 = arith.constant dense<0.000000e+00> : vector<32x96xf32>
    %313 = tpu.matmul %282, %2, %cst_85 {dimension_numbers = #tpu.dot_dimension_numbers<[1], [0], [0], [1], [0, 0, 1, 1], [], []>} : vector<32x32xf32>, vector<32x96xf32>, vector<32x96xf32> -> vector<32x96xf32>
    %314 = arith.addf %313, %13 : vector<32x96xf32>
    %315 = vector.extract_strided_slice %57 {offsets = [0, 0], sizes = [32, 32], strides = [1, 1]} : vector<32x96xf32> to vector<32x32xf32>
    %316 = vector.extract_strided_slice %314 {offsets = [0, 0], sizes = [32, 32], strides = [1, 1]} : vector<32x96xf32> to vector<32x32xf32>
    %317 = arith.addf %315, %316 : vector<32x32xf32>
    %318 = arith.negf %317 : vector<32x32xf32>
    %319 = math.exp %318 : vector<32x32xf32>
    %cst_86 = arith.constant 1.000000e+00 : f32
    %320 = vector.broadcast %cst_86 : f32 to vector<32x32xf32>
    %321 = arith.addf %320, %319 : vector<32x32xf32>
    %322 = arith.divf %320, %321 : vector<32x32xf32>
    %323 = vector.extract_strided_slice %57 {offsets = [0, 32], sizes = [32, 32], strides = [1, 1]} : vector<32x96xf32> to vector<32x32xf32>
    %324 = vector.extract_strided_slice %314 {offsets = [0, 32], sizes = [32, 32], strides = [1, 1]} : vector<32x96xf32> to vector<32x32xf32>
    %325 = arith.addf %323, %324 : vector<32x32xf32>
    %326 = arith.negf %325 : vector<32x32xf32>
    %327 = math.exp %326 : vector<32x32xf32>
    %cst_87 = arith.constant 1.000000e+00 : f32
    %328 = vector.broadcast %cst_87 : f32 to vector<32x32xf32>
    %329 = arith.addf %328, %327 : vector<32x32xf32>
    %330 = arith.divf %328, %329 : vector<32x32xf32>
    %331 = vector.extract_strided_slice %57 {offsets = [0, 64], sizes = [32, 32], strides = [1, 1]} : vector<32x96xf32> to vector<32x32xf32>
    %332 = vector.extract_strided_slice %314 {offsets = [0, 64], sizes = [32, 32], strides = [1, 1]} : vector<32x96xf32> to vector<32x32xf32>
    %333 = arith.mulf %322, %332 : vector<32x32xf32>
    %334 = arith.addf %331, %333 : vector<32x32xf32>
    %335 = math.tanh %334 : vector<32x32xf32>
    %cst_88 = arith.constant 1.000000e+00 : f32
    %336 = vector.broadcast %cst_88 : f32 to vector<32x32xf32>
    %337 = arith.subf %336, %330 : vector<32x32xf32>
    %338 = arith.mulf %337, %335 : vector<32x32xf32>
    %339 = arith.mulf %330, %282 : vector<32x32xf32>
    %340 = arith.addf %338, %339 : vector<32x32xf32>
    %cst_89 = arith.constant dense<0.000000e+00> : vector<32x96xf32>
    %341 = tpu.matmul %340, %3, %cst_89 {dimension_numbers = #tpu.dot_dimension_numbers<[1], [0], [0], [1], [0, 0, 1, 1], [], []>} : vector<32x32xf32>, vector<32x96xf32>, vector<32x96xf32> -> vector<32x96xf32>
    %342 = arith.addf %341, %16 : vector<32x96xf32>
    %cst_90 = arith.constant dense<0.000000e+00> : vector<32x96xf32>
    %343 = tpu.matmul %312, %4, %cst_90 {dimension_numbers = #tpu.dot_dimension_numbers<[1], [0], [0], [1], [0, 0, 1, 1], [], []>} : vector<32x32xf32>, vector<32x96xf32>, vector<32x96xf32> -> vector<32x96xf32>
    %344 = arith.addf %343, %19 : vector<32x96xf32>
    %345 = vector.extract_strided_slice %342 {offsets = [0, 0], sizes = [32, 32], strides = [1, 1]} : vector<32x96xf32> to vector<32x32xf32>
    %346 = vector.extract_strided_slice %344 {offsets = [0, 0], sizes = [32, 32], strides = [1, 1]} : vector<32x96xf32> to vector<32x32xf32>
    %347 = arith.addf %345, %346 : vector<32x32xf32>
    %348 = arith.negf %347 : vector<32x32xf32>
    %349 = math.exp %348 : vector<32x32xf32>
    %cst_91 = arith.constant 1.000000e+00 : f32
    %350 = vector.broadcast %cst_91 : f32 to vector<32x32xf32>
    %351 = arith.addf %350, %349 : vector<32x32xf32>
    %352 = arith.divf %350, %351 : vector<32x32xf32>
    %353 = vector.extract_strided_slice %342 {offsets = [0, 32], sizes = [32, 32], strides = [1, 1]} : vector<32x96xf32> to vector<32x32xf32>
    %354 = vector.extract_strided_slice %344 {offsets = [0, 32], sizes = [32, 32], strides = [1, 1]} : vector<32x96xf32> to vector<32x32xf32>
    %355 = arith.addf %353, %354 : vector<32x32xf32>
    %356 = arith.negf %355 : vector<32x32xf32>
    %357 = math.exp %356 : vector<32x32xf32>
    %cst_92 = arith.constant 1.000000e+00 : f32
    %358 = vector.broadcast %cst_92 : f32 to vector<32x32xf32>
    %359 = arith.addf %358, %357 : vector<32x32xf32>
    %360 = arith.divf %358, %359 : vector<32x32xf32>
    %361 = vector.extract_strided_slice %342 {offsets = [0, 64], sizes = [32, 32], strides = [1, 1]} : vector<32x96xf32> to vector<32x32xf32>
    %362 = vector.extract_strided_slice %344 {offsets = [0, 64], sizes = [32, 32], strides = [1, 1]} : vector<32x96xf32> to vector<32x32xf32>
    %363 = arith.mulf %352, %362 : vector<32x32xf32>
    %364 = arith.addf %361, %363 : vector<32x32xf32>
    %365 = math.tanh %364 : vector<32x32xf32>
    %cst_93 = arith.constant 1.000000e+00 : f32
    %366 = vector.broadcast %cst_93 : f32 to vector<32x32xf32>
    %367 = arith.subf %366, %360 : vector<32x32xf32>
    %368 = arith.mulf %367, %365 : vector<32x32xf32>
    %369 = arith.mulf %360, %312 : vector<32x32xf32>
    %370 = arith.addf %368, %369 : vector<32x32xf32>
    %cst_94 = arith.constant dense<0.000000e+00> : vector<32x96xf32>
    %371 = tpu.matmul %340, %2, %cst_94 {dimension_numbers = #tpu.dot_dimension_numbers<[1], [0], [0], [1], [0, 0, 1, 1], [], []>} : vector<32x32xf32>, vector<32x96xf32>, vector<32x96xf32> -> vector<32x96xf32>
    %372 = arith.addf %371, %13 : vector<32x96xf32>
    %373 = vector.extract_strided_slice %64 {offsets = [0, 0], sizes = [32, 32], strides = [1, 1]} : vector<32x96xf32> to vector<32x32xf32>
    %374 = vector.extract_strided_slice %372 {offsets = [0, 0], sizes = [32, 32], strides = [1, 1]} : vector<32x96xf32> to vector<32x32xf32>
    %375 = arith.addf %373, %374 : vector<32x32xf32>
    %376 = arith.negf %375 : vector<32x32xf32>
    %377 = math.exp %376 : vector<32x32xf32>
    %cst_95 = arith.constant 1.000000e+00 : f32
    %378 = vector.broadcast %cst_95 : f32 to vector<32x32xf32>
    %379 = arith.addf %378, %377 : vector<32x32xf32>
    %380 = arith.divf %378, %379 : vector<32x32xf32>
    %381 = vector.extract_strided_slice %64 {offsets = [0, 32], sizes = [32, 32], strides = [1, 1]} : vector<32x96xf32> to vector<32x32xf32>
    %382 = vector.extract_strided_slice %372 {offsets = [0, 32], sizes = [32, 32], strides = [1, 1]} : vector<32x96xf32> to vector<32x32xf32>
    %383 = arith.addf %381, %382 : vector<32x32xf32>
    %384 = arith.negf %383 : vector<32x32xf32>
    %385 = math.exp %384 : vector<32x32xf32>
    %cst_96 = arith.constant 1.000000e+00 : f32
    %386 = vector.broadcast %cst_96 : f32 to vector<32x32xf32>
    %387 = arith.addf %386, %385 : vector<32x32xf32>
    %388 = arith.divf %386, %387 : vector<32x32xf32>
    %389 = vector.extract_strided_slice %64 {offsets = [0, 64], sizes = [32, 32], strides = [1, 1]} : vector<32x96xf32> to vector<32x32xf32>
    %390 = vector.extract_strided_slice %372 {offsets = [0, 64], sizes = [32, 32], strides = [1, 1]} : vector<32x96xf32> to vector<32x32xf32>
    %391 = arith.mulf %380, %390 : vector<32x32xf32>
    %392 = arith.addf %389, %391 : vector<32x32xf32>
    %393 = math.tanh %392 : vector<32x32xf32>
    %cst_97 = arith.constant 1.000000e+00 : f32
    %394 = vector.broadcast %cst_97 : f32 to vector<32x32xf32>
    %395 = arith.subf %394, %388 : vector<32x32xf32>
    %396 = arith.mulf %395, %393 : vector<32x32xf32>
    %397 = arith.mulf %388, %340 : vector<32x32xf32>
    %398 = arith.addf %396, %397 : vector<32x32xf32>
    %cst_98 = arith.constant dense<0.000000e+00> : vector<32x96xf32>
    %399 = tpu.matmul %398, %3, %cst_98 {dimension_numbers = #tpu.dot_dimension_numbers<[1], [0], [0], [1], [0, 0, 1, 1], [], []>} : vector<32x32xf32>, vector<32x96xf32>, vector<32x96xf32> -> vector<32x96xf32>
    %400 = arith.addf %399, %16 : vector<32x96xf32>
    %cst_99 = arith.constant dense<0.000000e+00> : vector<32x96xf32>
    %401 = tpu.matmul %370, %4, %cst_99 {dimension_numbers = #tpu.dot_dimension_numbers<[1], [0], [0], [1], [0, 0, 1, 1], [], []>} : vector<32x32xf32>, vector<32x96xf32>, vector<32x96xf32> -> vector<32x96xf32>
    %402 = arith.addf %401, %19 : vector<32x96xf32>
    %403 = vector.extract_strided_slice %400 {offsets = [0, 0], sizes = [32, 32], strides = [1, 1]} : vector<32x96xf32> to vector<32x32xf32>
    %404 = vector.extract_strided_slice %402 {offsets = [0, 0], sizes = [32, 32], strides = [1, 1]} : vector<32x96xf32> to vector<32x32xf32>
    %405 = arith.addf %403, %404 : vector<32x32xf32>
    %406 = arith.negf %405 : vector<32x32xf32>
    %407 = math.exp %406 : vector<32x32xf32>
    %cst_100 = arith.constant 1.000000e+00 : f32
    %408 = vector.broadcast %cst_100 : f32 to vector<32x32xf32>
    %409 = arith.addf %408, %407 : vector<32x32xf32>
    %410 = arith.divf %408, %409 : vector<32x32xf32>
    %411 = vector.extract_strided_slice %400 {offsets = [0, 32], sizes = [32, 32], strides = [1, 1]} : vector<32x96xf32> to vector<32x32xf32>
    %412 = vector.extract_strided_slice %402 {offsets = [0, 32], sizes = [32, 32], strides = [1, 1]} : vector<32x96xf32> to vector<32x32xf32>
    %413 = arith.addf %411, %412 : vector<32x32xf32>
    %414 = arith.negf %413 : vector<32x32xf32>
    %415 = math.exp %414 : vector<32x32xf32>
    %cst_101 = arith.constant 1.000000e+00 : f32
    %416 = vector.broadcast %cst_101 : f32 to vector<32x32xf32>
    %417 = arith.addf %416, %415 : vector<32x32xf32>
    %418 = arith.divf %416, %417 : vector<32x32xf32>
    %419 = vector.extract_strided_slice %400 {offsets = [0, 64], sizes = [32, 32], strides = [1, 1]} : vector<32x96xf32> to vector<32x32xf32>
    %420 = vector.extract_strided_slice %402 {offsets = [0, 64], sizes = [32, 32], strides = [1, 1]} : vector<32x96xf32> to vector<32x32xf32>
    %421 = arith.mulf %410, %420 : vector<32x32xf32>
    %422 = arith.addf %419, %421 : vector<32x32xf32>
    %423 = math.tanh %422 : vector<32x32xf32>
    %cst_102 = arith.constant 1.000000e+00 : f32
    %424 = vector.broadcast %cst_102 : f32 to vector<32x32xf32>
    %425 = arith.subf %424, %418 : vector<32x32xf32>
    %426 = arith.mulf %425, %423 : vector<32x32xf32>
    %427 = arith.mulf %418, %370 : vector<32x32xf32>
    %428 = arith.addf %426, %427 : vector<32x32xf32>
    %cst_103 = arith.constant dense<0.000000e+00> : vector<32x96xf32>
    %429 = tpu.matmul %398, %2, %cst_103 {dimension_numbers = #tpu.dot_dimension_numbers<[1], [0], [0], [1], [0, 0, 1, 1], [], []>} : vector<32x32xf32>, vector<32x96xf32>, vector<32x96xf32> -> vector<32x96xf32>
    %430 = arith.addf %429, %13 : vector<32x96xf32>
    %431 = vector.extract_strided_slice %71 {offsets = [0, 0], sizes = [32, 32], strides = [1, 1]} : vector<32x96xf32> to vector<32x32xf32>
    %432 = vector.extract_strided_slice %430 {offsets = [0, 0], sizes = [32, 32], strides = [1, 1]} : vector<32x96xf32> to vector<32x32xf32>
    %433 = arith.addf %431, %432 : vector<32x32xf32>
    %434 = arith.negf %433 : vector<32x32xf32>
    %435 = math.exp %434 : vector<32x32xf32>
    %cst_104 = arith.constant 1.000000e+00 : f32
    %436 = vector.broadcast %cst_104 : f32 to vector<32x32xf32>
    %437 = arith.addf %436, %435 : vector<32x32xf32>
    %438 = arith.divf %436, %437 : vector<32x32xf32>
    %439 = vector.extract_strided_slice %71 {offsets = [0, 32], sizes = [32, 32], strides = [1, 1]} : vector<32x96xf32> to vector<32x32xf32>
    %440 = vector.extract_strided_slice %430 {offsets = [0, 32], sizes = [32, 32], strides = [1, 1]} : vector<32x96xf32> to vector<32x32xf32>
    %441 = arith.addf %439, %440 : vector<32x32xf32>
    %442 = arith.negf %441 : vector<32x32xf32>
    %443 = math.exp %442 : vector<32x32xf32>
    %cst_105 = arith.constant 1.000000e+00 : f32
    %444 = vector.broadcast %cst_105 : f32 to vector<32x32xf32>
    %445 = arith.addf %444, %443 : vector<32x32xf32>
    %446 = arith.divf %444, %445 : vector<32x32xf32>
    %447 = vector.extract_strided_slice %71 {offsets = [0, 64], sizes = [32, 32], strides = [1, 1]} : vector<32x96xf32> to vector<32x32xf32>
    %448 = vector.extract_strided_slice %430 {offsets = [0, 64], sizes = [32, 32], strides = [1, 1]} : vector<32x96xf32> to vector<32x32xf32>
    %449 = arith.mulf %438, %448 : vector<32x32xf32>
    %450 = arith.addf %447, %449 : vector<32x32xf32>
    %451 = math.tanh %450 : vector<32x32xf32>
    %cst_106 = arith.constant 1.000000e+00 : f32
    %452 = vector.broadcast %cst_106 : f32 to vector<32x32xf32>
    %453 = arith.subf %452, %446 : vector<32x32xf32>
    %454 = arith.mulf %453, %451 : vector<32x32xf32>
    %455 = arith.mulf %446, %398 : vector<32x32xf32>
    %456 = arith.addf %454, %455 : vector<32x32xf32>
    %cst_107 = arith.constant dense<0.000000e+00> : vector<32x96xf32>
    %457 = tpu.matmul %456, %3, %cst_107 {dimension_numbers = #tpu.dot_dimension_numbers<[1], [0], [0], [1], [0, 0, 1, 1], [], []>} : vector<32x32xf32>, vector<32x96xf32>, vector<32x96xf32> -> vector<32x96xf32>
    %458 = arith.addf %457, %16 : vector<32x96xf32>
    %cst_108 = arith.constant dense<0.000000e+00> : vector<32x96xf32>
    %459 = tpu.matmul %428, %4, %cst_108 {dimension_numbers = #tpu.dot_dimension_numbers<[1], [0], [0], [1], [0, 0, 1, 1], [], []>} : vector<32x32xf32>, vector<32x96xf32>, vector<32x96xf32> -> vector<32x96xf32>
    %460 = arith.addf %459, %19 : vector<32x96xf32>
    %461 = vector.extract_strided_slice %458 {offsets = [0, 0], sizes = [32, 32], strides = [1, 1]} : vector<32x96xf32> to vector<32x32xf32>
    %462 = vector.extract_strided_slice %460 {offsets = [0, 0], sizes = [32, 32], strides = [1, 1]} : vector<32x96xf32> to vector<32x32xf32>
    %463 = arith.addf %461, %462 : vector<32x32xf32>
    %464 = arith.negf %463 : vector<32x32xf32>
    %465 = math.exp %464 : vector<32x32xf32>
    %cst_109 = arith.constant 1.000000e+00 : f32
    %466 = vector.broadcast %cst_109 : f32 to vector<32x32xf32>
    %467 = arith.addf %466, %465 : vector<32x32xf32>
    %468 = arith.divf %466, %467 : vector<32x32xf32>
    %469 = vector.extract_strided_slice %458 {offsets = [0, 32], sizes = [32, 32], strides = [1, 1]} : vector<32x96xf32> to vector<32x32xf32>
    %470 = vector.extract_strided_slice %460 {offsets = [0, 32], sizes = [32, 32], strides = [1, 1]} : vector<32x96xf32> to vector<32x32xf32>
    %471 = arith.addf %469, %470 : vector<32x32xf32>
    %472 = arith.negf %471 : vector<32x32xf32>
    %473 = math.exp %472 : vector<32x32xf32>
    %cst_110 = arith.constant 1.000000e+00 : f32
    %474 = vector.broadcast %cst_110 : f32 to vector<32x32xf32>
    %475 = arith.addf %474, %473 : vector<32x32xf32>
    %476 = arith.divf %474, %475 : vector<32x32xf32>
    %477 = vector.extract_strided_slice %458 {offsets = [0, 64], sizes = [32, 32], strides = [1, 1]} : vector<32x96xf32> to vector<32x32xf32>
    %478 = vector.extract_strided_slice %460 {offsets = [0, 64], sizes = [32, 32], strides = [1, 1]} : vector<32x96xf32> to vector<32x32xf32>
    %479 = arith.mulf %468, %478 : vector<32x32xf32>
    %480 = arith.addf %477, %479 : vector<32x32xf32>
    %481 = math.tanh %480 : vector<32x32xf32>
    %cst_111 = arith.constant 1.000000e+00 : f32
    %482 = vector.broadcast %cst_111 : f32 to vector<32x32xf32>
    %483 = arith.subf %482, %476 : vector<32x32xf32>
    %484 = arith.mulf %483, %481 : vector<32x32xf32>
    %485 = arith.mulf %476, %428 : vector<32x32xf32>
    %486 = arith.addf %484, %485 : vector<32x32xf32>
    %cst_112 = arith.constant dense<0.000000e+00> : vector<32x96xf32>
    %487 = tpu.matmul %456, %2, %cst_112 {dimension_numbers = #tpu.dot_dimension_numbers<[1], [0], [0], [1], [0, 0, 1, 1], [], []>} : vector<32x32xf32>, vector<32x96xf32>, vector<32x96xf32> -> vector<32x96xf32>
    %488 = arith.addf %487, %13 : vector<32x96xf32>
    %489 = vector.extract_strided_slice %78 {offsets = [0, 0], sizes = [32, 32], strides = [1, 1]} : vector<32x96xf32> to vector<32x32xf32>
    %490 = vector.extract_strided_slice %488 {offsets = [0, 0], sizes = [32, 32], strides = [1, 1]} : vector<32x96xf32> to vector<32x32xf32>
    %491 = arith.addf %489, %490 : vector<32x32xf32>
    %492 = arith.negf %491 : vector<32x32xf32>
    %493 = math.exp %492 : vector<32x32xf32>
    %cst_113 = arith.constant 1.000000e+00 : f32
    %494 = vector.broadcast %cst_113 : f32 to vector<32x32xf32>
    %495 = arith.addf %494, %493 : vector<32x32xf32>
    %496 = arith.divf %494, %495 : vector<32x32xf32>
    %497 = vector.extract_strided_slice %78 {offsets = [0, 32], sizes = [32, 32], strides = [1, 1]} : vector<32x96xf32> to vector<32x32xf32>
    %498 = vector.extract_strided_slice %488 {offsets = [0, 32], sizes = [32, 32], strides = [1, 1]} : vector<32x96xf32> to vector<32x32xf32>
    %499 = arith.addf %497, %498 : vector<32x32xf32>
    %500 = arith.negf %499 : vector<32x32xf32>
    %501 = math.exp %500 : vector<32x32xf32>
    %cst_114 = arith.constant 1.000000e+00 : f32
    %502 = vector.broadcast %cst_114 : f32 to vector<32x32xf32>
    %503 = arith.addf %502, %501 : vector<32x32xf32>
    %504 = arith.divf %502, %503 : vector<32x32xf32>
    %505 = vector.extract_strided_slice %78 {offsets = [0, 64], sizes = [32, 32], strides = [1, 1]} : vector<32x96xf32> to vector<32x32xf32>
    %506 = vector.extract_strided_slice %488 {offsets = [0, 64], sizes = [32, 32], strides = [1, 1]} : vector<32x96xf32> to vector<32x32xf32>
    %507 = arith.mulf %496, %506 : vector<32x32xf32>
    %508 = arith.addf %505, %507 : vector<32x32xf32>
    %509 = math.tanh %508 : vector<32x32xf32>
    %cst_115 = arith.constant 1.000000e+00 : f32
    %510 = vector.broadcast %cst_115 : f32 to vector<32x32xf32>
    %511 = arith.subf %510, %504 : vector<32x32xf32>
    %512 = arith.mulf %511, %509 : vector<32x32xf32>
    %513 = arith.mulf %504, %456 : vector<32x32xf32>
    %514 = arith.addf %512, %513 : vector<32x32xf32>
    %cst_116 = arith.constant dense<0.000000e+00> : vector<32x96xf32>
    %515 = tpu.matmul %514, %3, %cst_116 {dimension_numbers = #tpu.dot_dimension_numbers<[1], [0], [0], [1], [0, 0, 1, 1], [], []>} : vector<32x32xf32>, vector<32x96xf32>, vector<32x96xf32> -> vector<32x96xf32>
    %516 = arith.addf %515, %16 : vector<32x96xf32>
    %cst_117 = arith.constant dense<0.000000e+00> : vector<32x96xf32>
    %517 = tpu.matmul %486, %4, %cst_117 {dimension_numbers = #tpu.dot_dimension_numbers<[1], [0], [0], [1], [0, 0, 1, 1], [], []>} : vector<32x32xf32>, vector<32x96xf32>, vector<32x96xf32> -> vector<32x96xf32>
    %518 = arith.addf %517, %19 : vector<32x96xf32>
    %519 = vector.extract_strided_slice %516 {offsets = [0, 0], sizes = [32, 32], strides = [1, 1]} : vector<32x96xf32> to vector<32x32xf32>
    %520 = vector.extract_strided_slice %518 {offsets = [0, 0], sizes = [32, 32], strides = [1, 1]} : vector<32x96xf32> to vector<32x32xf32>
    %521 = arith.addf %519, %520 : vector<32x32xf32>
    %522 = arith.negf %521 : vector<32x32xf32>
    %523 = math.exp %522 : vector<32x32xf32>
    %cst_118 = arith.constant 1.000000e+00 : f32
    %524 = vector.broadcast %cst_118 : f32 to vector<32x32xf32>
    %525 = arith.addf %524, %523 : vector<32x32xf32>
    %526 = arith.divf %524, %525 : vector<32x32xf32>
    %527 = vector.extract_strided_slice %516 {offsets = [0, 32], sizes = [32, 32], strides = [1, 1]} : vector<32x96xf32> to vector<32x32xf32>
    %528 = vector.extract_strided_slice %518 {offsets = [0, 32], sizes = [32, 32], strides = [1, 1]} : vector<32x96xf32> to vector<32x32xf32>
    %529 = arith.addf %527, %528 : vector<32x32xf32>
    %530 = arith.negf %529 : vector<32x32xf32>
    %531 = math.exp %530 : vector<32x32xf32>
    %cst_119 = arith.constant 1.000000e+00 : f32
    %532 = vector.broadcast %cst_119 : f32 to vector<32x32xf32>
    %533 = arith.addf %532, %531 : vector<32x32xf32>
    %534 = arith.divf %532, %533 : vector<32x32xf32>
    %535 = vector.extract_strided_slice %516 {offsets = [0, 64], sizes = [32, 32], strides = [1, 1]} : vector<32x96xf32> to vector<32x32xf32>
    %536 = vector.extract_strided_slice %518 {offsets = [0, 64], sizes = [32, 32], strides = [1, 1]} : vector<32x96xf32> to vector<32x32xf32>
    %537 = arith.mulf %526, %536 : vector<32x32xf32>
    %538 = arith.addf %535, %537 : vector<32x32xf32>
    %539 = math.tanh %538 : vector<32x32xf32>
    %cst_120 = arith.constant 1.000000e+00 : f32
    %540 = vector.broadcast %cst_120 : f32 to vector<32x32xf32>
    %541 = arith.subf %540, %534 : vector<32x32xf32>
    %542 = arith.mulf %541, %539 : vector<32x32xf32>
    %543 = arith.mulf %534, %486 : vector<32x32xf32>
    %544 = arith.addf %542, %543 : vector<32x32xf32>
    %c0_121 = arith.constant 0 : index
    %c0_122 = arith.constant 0 : index
    %545 = vector.load %arg13[%c0_121, %c0_122] : memref<32x128xf32, #tpu.memory_space<vmem>>, vector<32x128xf32>
    %cst_123 = arith.constant dense<0.000000e+00> : vector<32x128xf32>
    %546 = tpu.matmul %544, %545, %cst_123 {dimension_numbers = #tpu.dot_dimension_numbers<[1], [0], [0], [1], [0, 0, 1, 1], [], []>} : vector<32x32xf32>, vector<32x128xf32>, vector<32x128xf32> -> vector<32x128xf32>
    %c0_124 = arith.constant 0 : index
    %c0_125 = arith.constant 0 : index
    %547 = vector.load %arg14[%c0_124, %c0_125] : memref<1x128xf32, #tpu.memory_space<vmem>>, vector<1x128xf32>
    %548 = vector.broadcast %547 : vector<1x128xf32> to vector<32x128xf32>
    %549 = arith.addf %546, %548 : vector<32x128xf32>
    %cst_126 = arith.constant 0.000000e+00 : f32
    %550 = vector.broadcast %cst_126 : f32 to vector<32x128xf32>
    %551 = arith.maximumf %549, %550 : vector<32x128xf32>
    %c0_127 = arith.constant 0 : index
    %c0_128 = arith.constant 0 : index
    %552 = vector.load %arg15[%c0_127, %c0_128] : memref<32x128xf32, #tpu.memory_space<vmem>>, vector<32x128xf32>
    tpu.vector_store %arg15[%c0_127, %c0_128], %551 {strides = array<i32>} : memref<32x128xf32, #tpu.memory_space<vmem>>, vector<32x128xf32>,
    return
  }
  func.func @transform_0(%arg0: i32) -> (i32, i32) {
    %c0_i32 = arith.constant 0 : i32
    %c0_i32_0 = arith.constant 0 : i32
    %c0_i32_1 = arith.constant 0 : i32
    return %c0_i32, %c0_i32_0 : i32, i32
  }
  func.func @transform_1(%arg0: i32) -> (i32, i32) {
    %c0_i32 = arith.constant 0 : i32
    %c0_i32_0 = arith.constant 0 : i32
    return %arg0, %c0_i32 : i32, i32
  }
  func.func @transform_2(%arg0: i32) -> (i32, i32) {
    %c0_i32 = arith.constant 0 : i32
    %c0_i32_0 = arith.constant 0 : i32
    %c0_i32_1 = arith.constant 0 : i32
    return %c0_i32, %c0_i32_0 : i32, i32
  }
  func.func @transform_3(%arg0: i32) -> (i32, i32) {
    %c0_i32 = arith.constant 0 : i32
    %c0_i32_0 = arith.constant 0 : i32
    %c0_i32_1 = arith.constant 0 : i32
    return %c0_i32, %c0_i32_0 : i32, i32
  }
  func.func @transform_4(%arg0: i32) -> (i32, i32) {
    %c0_i32 = arith.constant 0 : i32
    %c0_i32_0 = arith.constant 0 : i32
    %c0_i32_1 = arith.constant 0 : i32
    return %c0_i32, %c0_i32_0 : i32, i32
  }
  func.func @transform_5(%arg0: i32) -> (i32, i32) {
    %c0_i32 = arith.constant 0 : i32
    %c0_i32_0 = arith.constant 0 : i32
    %c0_i32_1 = arith.constant 0 : i32
    return %c0_i32, %c0_i32_0 : i32, i32
  }
  func.func @transform_6(%arg0: i32) -> (i32, i32) {
    %c0_i32 = arith.constant 0 : i32
    %c0_i32_0 = arith.constant 0 : i32
    %c0_i32_1 = arith.constant 0 : i32
    return %c0_i32, %c0_i32_0 : i32, i32
  }
  func.func @transform_7(%arg0: i32) -> (i32, i32) {
    %c0_i32 = arith.constant 0 : i32
    %c0_i32_0 = arith.constant 0 : i32
    %c0_i32_1 = arith.constant 0 : i32
    return %c0_i32, %c0_i32_0 : i32, i32
  }
  func.func @transform_8(%arg0: i32) -> (i32, i32) {
    %c0_i32 = arith.constant 0 : i32
    %c0_i32_0 = arith.constant 0 : i32
    %c0_i32_1 = arith.constant 0 : i32
    return %c0_i32, %c0_i32_0 : i32, i32
  }
  func.func @transform_9(%arg0: i32) -> (i32, i32) {
    %c0_i32 = arith.constant 0 : i32
    %c0_i32_0 = arith.constant 0 : i32
    %c0_i32_1 = arith.constant 0 : i32
    return %c0_i32, %c0_i32_0 : i32, i32
  }
  func.func @transform_10(%arg0: i32) -> (i32, i32) {
    %c0_i32 = arith.constant 0 : i32
    %c0_i32_0 = arith.constant 0 : i32
    %c0_i32_1 = arith.constant 0 : i32
    return %c0_i32, %c0_i32_0 : i32, i32
  }
  func.func @transform_11(%arg0: i32) -> (i32, i32) {
    %c0_i32 = arith.constant 0 : i32
    %c0_i32_0 = arith.constant 0 : i32
    %c0_i32_1 = arith.constant 0 : i32
    return %c0_i32, %c0_i32_0 : i32, i32
  }
  func.func @transform_12(%arg0: i32) -> (i32, i32) {
    %c0_i32 = arith.constant 0 : i32
    %c0_i32_0 = arith.constant 0 : i32
    %c0_i32_1 = arith.constant 0 : i32
    return %c0_i32, %c0_i32_0 : i32, i32
  }
  func.func @transform_13(%arg0: i32) -> (i32, i32) {
    %c0_i32 = arith.constant 0 : i32
    %c0_i32_0 = arith.constant 0 : i32
    %c0_i32_1 = arith.constant 0 : i32
    return %c0_i32, %c0_i32_0 : i32, i32
  }
  func.func @transform_14(%arg0: i32) -> (i32, i32) {
    %c0_i32 = arith.constant 0 : i32
    %c0_i32_0 = arith.constant 0 : i32
    return %arg0, %c0_i32 : i32, i32
  }
}

</mosaic_0001>

<bundles_post_ra>
// kernel: stgcn_forward.1
= control target key start
LH: loop header
LB: loop body
LE: loop exit
PB: predicated region body
PF: predicated region fallthrough
CT: control target
= control target key end

     0   :  { %vm107_vm0 = vcmask 261120   ;;  %vm218_vm1 = vcmask 1043456   ;;  %vm205_vm2 = vcmask 31744   ;;  %s7727_s30 = smov 116   ;;  %s7728_s15 = smov 112   ;;  %v7732_v55 = vmov 0.0   ;;  %s9587_s0 = inlined_call_operand.vmem [shape: f32[32,32], index: 0, kind: input, shape index: {}]   ;;  %s9588_s1 = inlined_call_operand.vmem [shape: f32[32,32], index: 1, kind: input, shape index: {}]   ;;  %s9589_s2 = inlined_call_operand.vmem [shape: f32[4,32], index: 2, kind: input, shape index: {}]   ;;  %s9590_s4 = inlined_call_operand.vmem [shape: f32[32,96], index: 4, kind: input, shape index: {}]   ;;  %s9591_s5 = inlined_call_operand.vmem [shape: f32[32,96], index: 5, kind: input, shape index: {}]   ;;  %s9592_s3 = inlined_call_operand.vmem [shape: f32[1,32], index: 3, kind: input, shape index: {}]   ;;  %s9593_s7 = inlined_call_operand.vmem [shape: f32[1,96], index: 7, kind: input, shape index: {}]   ;;  %s9594_s6 = inlined_call_operand.vmem [shape: f32[1,96], index: 6, kind: input, shape index: {}]   ;;  %s9595_s8 = inlined_call_operand.vmem [shape: f32[32,96], index: 8, kind: input, shape index: {}]   ;;  %s9596_s9 = inlined_call_operand.vmem [shape: f32[32,96], index: 9, kind: input, shape index: {}]   ;;  %s9597_s11 = inlined_call_operand.vmem [shape: f32[1,96], index: 11, kind: input, shape index: {}]   ;;  %s9598_s10 = inlined_call_operand.vmem [shape: f32[1,96], index: 10, kind: input, shape index: {}]   ;;  %s9599_s12 = inlined_call_operand.vmem [shape: f32[32,128], index: 12, kind: input, shape index: {}]   ;;  %s9600_s13 = inlined_call_operand.vmem [shape: f32[1,128], index: 13, kind: input, shape index: {}]   ;;  %s9601_s14 = inlined_call_operand.vmem [shape: f32[32,128], index: 14, kind: output, shape index: {}]  }
   0x1   :  { %v103_v0 = vld [vmem:[%s9587_s0] sm:$0xff]  ;;  %v104_v1 = vld [vmem:[%s9587_s0 + $0x8] sm:$0xff]  ;;  %v105_v2 = vld [vmem:[%s9587_s0 + $0x10] sm:$0xff]  ;;  %s7729_s16 = smov 108   ;;  %s7730_s17 = smov 104  }
   0x2   :  { %v7047_v3 = vpack.c.bf16 %v104_v1, %v103_v0  ;;  %v106_v4 = vld [vmem:[%s9587_s0 + $0x18] sm:$0xff]  ;;  %v99_v5 = vld [vmem:[%s9588_s1] sm:$0xff]  ;;  %v100_v7 = vld [vmem:[%s9588_s1 + $0x8] sm:$0xff]  ;;  %s7731_s18 = smov 100  }
   0x3   :  { %v7051_v6 = vpack.c.bf16 %v106_v4, %v105_v2  ;;  %6515 = vmatprep.mubr.msk.f32.mxu0 %vm107_vm0, %v99_v5  ;;  %v101_v8 = vld [vmem:[%s9588_s1 + $0x10] sm:$0xff]  ;;  %v102_v9 = vld [vmem:[%s9588_s1 + $0x18] sm:$0xff]  ;;  %v7841_v10 = vld [vmem:[%s9589_s2] sm:$0xf]  ;;  %s7725_s1 = smov 124   ;;  %s7726_s2 = smov 120  }
   0x4   :  { %7048 = vmatprep.subr.bf16.mxu0 %v7047_v3  ;;  %6521 = vmatprep.subr.msk.mxu1 %vm218_vm1, %v7841_v10  ;;  %v48_v15 = vld [vmem:[%s9590_s4] sm:$0xff]  ;;  %v49_v16 = vld [vmem:[%s9590_s4 + $0x8] sm:$0xff]  ;;  %v50_v18 = vld [vmem:[%s9590_s4 + $0x10] sm:$0xff] }
   0x5   :  { %7050 = vmatpush3.bf16.msra.mxu0 %v7047_v3  ;;  %6522 = vmatpush3.msk.msra.mxu1 %vm218_vm1, %v7841_v10  ;;  %v7863_v17 = vpack.c.bf16 %v49_v16, %v48_v15  ;;  %v51_v19 = vld [vmem:[%s9590_s4 + $0x18] sm:$0xff]  ;;  %v52_v42 = vld [vmem:[%s9591_s5] sm:$0xff]  ;;  %v53_v43 = vld [vmem:[%s9591_s5 + $0x8] sm:$0xff] }
   0x6   :  { %7052 = vmatprep.subr.bf16.mxu0 %v7051_v6  ;;  %v7873_v20 = vpack.c.bf16 %v51_v19, %v50_v18  ;;  %v7925_v44 = vpack.c.bf16 %v53_v43, %v52_v42  ;;  %v54_v49 = vld [vmem:[%s9591_s5 + $0x10] sm:$0xff]  ;;  %v55_v50 = vld [vmem:[%s9591_s5 + $0x18] sm:$0xff]  ;;  %v7956_v56 = vld [vmem:[%s9592_s3] ss:$0 sm:$0xff] }
   0x7   :  { %7056 = vmatprep.subr.bf16.mxu1 %v7863_v17  ;;  %v7940_v51 = vpack.c.bf16 %v55_v50, %v54_v49 }
   0x9   :  { %7054 = vmatpush3.bf16.msra.mxu0 %v7051_v6 }
   0xa   :  { %6543 = vmatprep.subr.msk.mxu0 %vm218_vm1, %v7841_v10 }
   0xc   :  { %6516 = vmatmul.mubr.msk.f32.vlgmr.msra.gmra.mrb[0].mxu0 %vm107_vm0, %v100_v7 }
   0xd   :  { %6518 = vmatprep.mubr.msk.f32.mxu0 %vm107_vm0, %v101_v8  ;;  %6544 = vmatpush3.msk.msra.mxu0 %vm218_vm1, %v7841_v10 }
   0xe   :  { %6565 = vmatprep.subr.msk.mxu0 %vm218_vm1, %v7841_v10 }
  0x10   :  { %6519 = vmatmul.mubr.msk.f32.gmra.mrb[2].mxu0 %vm107_vm0, %v102_v9 }
  0xdf   :  { %v6517_v11 = vpop.f32.mrb[0].mxu0 }
  0xe0   :  { %v186_v12 = vpop.f32.mrb[1].mxu0 }
  0xe1   :  { %408 = vrot.lane.b32.xlu0 %v186_v12, %s7725_s1  ;;  %6523 = vmatprep.mubr.msk.f32.mxu1 %vm205_vm2, %v186_v12 }
  0xe2   :  { %6524 = vmatmul.mubr.msk.f32.vlgmr.msra.gmra.mrb[0].mxu1 %vm205_vm2, %v6517_v11 }
  0xe3   :  { %v6520_v13 = vpop.f32.mrb[2].mxu0  ;;  %7058 = vmatpush3.bf16.msra.mxu1 %v7863_v17 }
  0xe4   :  { %v196_v14 = vpop.f32.mrb[3].mxu0  ;;  %7060 = vmatprep.subr.bf16.mxu1 %v7873_v20 }
  0xe5   :  { %410 = vrot.lane.b32.xlu0 %v6517_v11, %s7725_s1  ;;  %412 = vrot.lane.b32.xlu1 %v196_v14, %s7725_s1 }
  0xe6   :  { %6526 = vmatprep.mubr.msk.f32.mxu1 %vm205_vm2, %v196_v14 }
  0xe7   :  { %6527 = vmatmul.mubr.msk.f32.gmra.mrb[2].mxu1 %vm205_vm2, %v6520_v13 }
  0xe8   :  { %7062 = vmatpush3.bf16.msra.mxu1 %v7873_v20 }
  0xe9   :  { %610 = vrot.lane.b32.xlu0 %v186_v12, %s7726_s2  ;;  %414 = vrot.lane.b32.xlu1 %v6520_v13, %s7725_s1 }
  0xea   :  { %7064 = vmatprep.subr.bf16.mxu1 %v7863_v17 }
  0xed   :  { %614 = vrot.lane.b32.xlu0 %v196_v14, %s7726_s2  ;;  %612 = vrot.lane.b32.xlu1 %v6517_v11, %s7726_s2 }
  0xf1   :  { %812 = vrot.lane.b32.xlu0 %v186_v12, %s7727_s30  ;;  %616 = vrot.lane.b32.xlu1 %v6520_v13, %s7726_s2 }
  0xf5   :  { %816 = vrot.lane.b32.xlu0 %v196_v14, %s7727_s30  ;;  %814 = vrot.lane.b32.xlu1 %v6517_v11, %s7727_s30 }
  0xf9   :  { %1014 = vrot.lane.b32.xlu0 %v186_v12, %s7728_s15  ;;  %818 = vrot.lane.b32.xlu1 %v6520_v13, %s7727_s30 }
  0xfd   :  { %1018 = vrot.lane.b32.xlu0 %v196_v14, %s7728_s15  ;;  %1016 = vrot.lane.b32.xlu1 %v6517_v11, %s7728_s15 }
 0x101   :  { %1216 = vrot.lane.b32.xlu0 %v186_v12, %s7729_s16  ;;  %1020 = vrot.lane.b32.xlu1 %v6520_v13, %s7728_s15  ;;  %s7734_s15 = smov 96  }
 0x105   :  { %1220 = vrot.lane.b32.xlu0 %v196_v14, %s7729_s16  ;;  %1218 = vrot.lane.b32.xlu1 %v6517_v11, %s7729_s16 }
 0x109   :  { %1418 = vrot.lane.b32.xlu0 %v186_v12, %s7730_s17  ;;  %1222 = vrot.lane.b32.xlu1 %v6520_v13, %s7729_s16 }
 0x10d   :  { %1422 = vrot.lane.b32.xlu0 %v196_v14, %s7730_s17  ;;  %1420 = vrot.lane.b32.xlu1 %v6517_v11, %s7730_s17 }
 0x111   :  { %1620 = vrot.lane.b32.xlu0 %v186_v12, %s7731_s18  ;;  %1424 = vrot.lane.b32.xlu1 %v6520_v13, %s7730_s17  ;;  %s7733_s17 = smov 64  }
 0x115   :  { %1624 = vrot.lane.b32.xlu0 %v196_v14, %s7731_s18  ;;  %1622 = vrot.lane.b32.xlu1 %v6517_v11, %s7731_s18 }
 0x119   :  { %1626 = vrot.lane.b32.xlu1 %v6520_v13, %s7731_s18 }
 0x153   :  { %v409_v21 = vpop.permute.xlu0 %408 }
 0x154   :  { %6545 = vmatprep.mubr.msk.f32.mxu0 %vm205_vm2, %v409_v21 }
 0x157   :  { %v411_v22 = vpop.permute.xlu0 %410  ;;  %v413_v23 = vpop.permute.xlu1 %412 }
 0x158   :  { %6546 = vmatmul.mubr.msk.f32.vlgmr.msra.gmra.mrb[4].mxu0 %vm205_vm2, %v411_v22 }
 0x159   :  { %6566 = vmatpush3.msk.msra.mxu0 %vm218_vm1, %v7841_v10  ;;  %6548 = vmatprep.mubr.msk.f32.mxu0 %vm205_vm2, %v413_v23 }
 0x15a   :  { %6587 = vmatprep.subr.msk.mxu0 %vm218_vm1, %v7841_v10 }
 0x15b   :  { %v611_v24 = vpop.permute.xlu0 %610  ;;  %v415_v25 = vpop.permute.xlu1 %414 }
 0x15c   :  { %6549 = vmatmul.mubr.msk.f32.gmra.mrb[6].mxu0 %vm205_vm2, %v415_v25 }
 0x15d   :  { %6567 = vmatprep.mubr.msk.f32.mxu0 %vm205_vm2, %v611_v24 }
 0x15f   :  { %v615_v26 = vpop.permute.xlu0 %614  ;;  %v613_v27 = vpop.permute.xlu1 %612 }
 0x160   :  { %6568 = vmatmul.mubr.msk.f32.vlgmr.msra.gmra.mrb[8].mxu0 %vm205_vm2, %v613_v27 }
 0x161   :  { %6588 = vmatpush3.msk.msra.mxu0 %vm218_vm1, %v7841_v10  ;;  %6570 = vmatprep.mubr.msk.f32.mxu0 %vm205_vm2, %v615_v26 }
 0x162   :  { %6609 = vmatprep.subr.msk.mxu0 %vm218_vm1, %v7841_v10 }
 0x163   :  { %v813_v28 = vpop.permute.xlu0 %812  ;;  %v617_v29 = vpop.permute.xlu1 %616 }
 0x164   :  { %6571 = vmatmul.mubr.msk.f32.gmra.mrb[10].mxu0 %vm205_vm2, %v617_v29 }
 0x165   :  { %6589 = vmatprep.mubr.msk.f32.mxu0 %vm205_vm2, %v813_v28 }
 0x167   :  { %v817_v30 = vpop.permute.xlu0 %816  ;;  %v815_v31 = vpop.permute.xlu1 %814 }
 0x168   :  { %6590 = vmatmul.mubr.msk.f32.vlgmr.msra.gmra.mrb[12].mxu0 %vm205_vm2, %v815_v31 }
 0x169   :  { %6610 = vmatpush3.msk.msra.mxu0 %vm218_vm1, %v7841_v10  ;;  %6592 = vmatprep.mubr.msk.f32.mxu0 %vm205_vm2, %v817_v30 }
 0x16a   :  { %6631 = vmatprep.subr.msk.mxu0 %vm218_vm1, %v7841_v10 }
 0x16b   :  { %v1015_v32 = vpop.permute.xlu0 %1014  ;;  %v819_v33 = vpop.permute.xlu1 %818 }
 0x16c   :  { %6593 = vmatmul.mubr.msk.f32.gmra.mrb[14].mxu0 %vm205_vm2, %v819_v33 }
 0x16d   :  { %6611 = vmatprep.mubr.msk.f32.mxu0 %vm205_vm2, %v1015_v32 }
 0x16f   :  { %v1019_v34 = vpop.permute.xlu0 %1018  ;;  %v1017_v35 = vpop.permute.xlu1 %1016 }
 0x170   :  { %6612 = vmatmul.mubr.msk.f32.vlgmr.msra.gmra.mrb[16].mxu0 %vm205_vm2, %v1017_v35 }
 0x171   :  { %6632 = vmatpush3.msk.msra.mxu0 %vm218_vm1, %v7841_v10  ;;  %6614 = vmatprep.mubr.msk.f32.mxu0 %vm205_vm2, %v1019_v34 }
 0x172   :  { %6653 = vmatprep.subr.msk.mxu0 %vm218_vm1, %v7841_v10 }
 0x173   :  { %v1217_v36 = vpop.permute.xlu0 %1216  ;;  %v1021_v37 = vpop.permute.xlu1 %1020 }
 0x174   :  { %6615 = vmatmul.mubr.msk.f32.gmra.mrb[18].mxu0 %vm205_vm2, %v1021_v37 }
 0x175   :  { %6633 = vmatprep.mubr.msk.f32.mxu0 %vm205_vm2, %v1217_v36 }
 0x177   :  { %v1221_v38 = vpop.permute.xlu0 %1220  ;;  %v1219_v39 = vpop.permute.xlu1 %1218 }
 0x178   :  { %6634 = vmatmul.mubr.msk.f32.vlgmr.msra.gmra.mrb[20].mxu0 %vm205_vm2, %v1219_v39 }
 0x179   :  { %6654 = vmatpush3.msk.msra.mxu0 %vm218_vm1, %v7841_v10  ;;  %6636 = vmatprep.mubr.msk.f32.mxu0 %vm205_vm2, %v1221_v38 }
 0x17a   :  { %6675 = vmatprep.subr.msk.mxu0 %vm218_vm1, %v7841_v10 }
 0x17b   :  { %v1419_v40 = vpop.permute.xlu0 %1418  ;;  %v1223_v41 = vpop.permute.xlu1 %1222 }
 0x17c   :  { %6637 = vmatmul.mubr.msk.f32.gmra.mrb[22].mxu0 %vm205_vm2, %v1223_v41 }
 0x17d   :  { %6655 = vmatprep.mubr.msk.f32.mxu0 %vm205_vm2, %v1419_v40 }
 0x17f   :  { %v1423_v45 = vpop.permute.xlu0 %1422  ;;  %v1421_v46 = vpop.permute.xlu1 %1420 }
 0x180   :  { %6656 = vmatmul.mubr.msk.f32.vlgmr.msra.gmra.mrb[24].mxu0 %vm205_vm2, %v1421_v46 }
 0x181   :  { %6676 = vmatpush3.msk.msra.mxu0 %vm218_vm1, %v7841_v10  ;;  %6658 = vmatprep.mubr.msk.f32.mxu0 %vm205_vm2, %v1423_v45 }
 0x182   :  { %7120 = vmatprep.subr.bf16.mxu0 %v7925_v44 }
 0x183   :  { %v1621_v47 = vpop.permute.xlu0 %1620  ;;  %v1425_v48 = vpop.permute.xlu1 %1424 }
 0x184   :  { %6659 = vmatmul.mubr.msk.f32.gmra.mrb[26].mxu0 %vm205_vm2, %v1425_v48 }
 0x185   :  { %6677 = vmatprep.mubr.msk.f32.mxu0 %vm205_vm2, %v1621_v47 }
 0x187   :  { %v1625_v52 = vpop.permute.xlu0 %1624  ;;  %v1623_v53 = vpop.permute.xlu1 %1622 }
 0x188   :  { %6678 = vmatmul.mubr.msk.f32.vlgmr.msra.gmra.mrb[28].mxu0 %vm205_vm2, %v1623_v53 }
 0x189   :  { %7122 = vmatpush3.bf16.msra.mxu0 %v7925_v44  ;;  %6680 = vmatprep.mubr.msk.f32.mxu0 %vm205_vm2, %v1625_v52 }
 0x18a   :  { %7124 = vmatprep.subr.bf16.mxu0 %v7940_v51 }
 0x18b   :  { %v1627_v54 = vpop.permute.xlu1 %1626 }
 0x18c   :  { %6681 = vmatmul.mubr.msk.f32.gmra.mrb[30].mxu0 %vm205_vm2, %v1627_v54 }
 0x18d   :  { %7126 = vmatpush3.bf16.msra.mxu0 %v7940_v51  ;;  %6705 = vmatprep.mubr.f32.mxu0 %v7732_v55 }
 0x190   :  { %6706 = vmatmul.mubr.f32.vlgmr.msra.gmra.mrb[32].mxu0 %v7732_v55 }
 0x191   :  { %6708 = vmatprep.mubr.f32.mxu0 %v7732_v55 }
 0x194   :  { %6709 = vmatmul.mubr.f32.gmra.mrb[34].mxu0 %v7732_v55 }
 0x195   :  { %6733 = vmatprep.mubr.f32.mxu0 %v7732_v55 }
 0x1b5   :  { %v6525_v57 = vpop.f32.mrb[0].mxu1 }
 0x1b6   :  { %v294_v58 = vadd.f32 %v6525_v57, %v7956_v56  ;;  %v288_v59 = vpop.f32.mrb[1].mxu1 }
 0x1b7   :  { %v289_v60 = vadd.f32 %v7956_v56, %v288_v59 }
 0x1b8   :  { %v308_v62 = vmax.f32 %v294_v58, 0.0 }
 0x1b9   :  { %v307_v61 = vmax.f32 %v289_v60, 0.0 }
 0x1ba   :  { %v6528_v63 = vpop.f32.mrb[2].mxu1 }
 0x1bb   :  { %v304_v0 = vadd.f32 %v6528_v63, %v7956_v56  ;;  %v298_v1 = vpop.f32.mrb[3].mxu1  ;;  %6537 = vmatprep.mubr.msk.f32.mxu1 %vm107_vm0, %v307_v61 }
 0x1bc   :  { %v299_v2 = vadd.f32 %v7956_v56, %v298_v1  ;;  %6538 = vmatmul.mubr.msk.f32.vlgmr.msra.gmra.mrb[4].mxu1 %vm107_vm0, %v308_v62 }
 0x1bd   :  { %7066 = vmatpush3.bf16.msra.mxu1 %v7863_v17  ;;  %v310_v4 = vmax.f32 %v304_v0, 0.0 }
 0x1be   :  { %v309_v3 = vmax.f32 %v299_v2, 0.0  ;;  %7068 = vmatprep.subr.bf16.mxu1 %v7873_v20 }
 0x1c0   :  { %6540 = vmatprep.mubr.msk.f32.mxu1 %vm107_vm0, %v309_v3 }
 0x1c1   :  { %6541 = vmatmul.mubr.msk.f32.gmra.mrb[6].mxu1 %vm107_vm0, %v310_v4 }
 0x1c2   :  { %7070 = vmatpush3.bf16.msra.mxu1 %v7873_v20 }
 0x1c3   :  { %7072 = vmatprep.subr.bf16.mxu1 %v7863_v17 }
 0x22b   :  { %v6547_v5 = vpop.f32.mrb[4].mxu0 }
 0x22c   :  { %v496_v6 = vadd.f32 %v6547_v5, %v7956_v56  ;;  %v490_v7 = vpop.f32.mrb[5].mxu0 }
 0x22d   :  { %v491_v8 = vadd.f32 %v7956_v56, %v490_v7 }
 0x22e   :  { %v510_v11 = vmax.f32 %v496_v6, 0.0 }
 0x22f   :  { %v509_v9 = vmax.f32 %v491_v8, 0.0  ;;  %v6550_v10 = vpop.f32.mrb[6].mxu0 }
 0x230   :  { %v506_v12 = vadd.f32 %v6550_v10, %v7956_v56  ;;  %v500_v13 = vpop.f32.mrb[7].mxu0 }
 0x231   :  { %v501_v14 = vadd.f32 %v7956_v56, %v500_v13  ;;  %6559 = vmatprep.mubr.msk.f32.mxu1 %vm107_vm0, %v509_v9 }
 0x232   :  { %6560 = vmatmul.mubr.msk.f32.vlgmr.msra.gmra.mrb[8].mxu1 %vm107_vm0, %v510_v11  ;;  %v512_v18 = vmax.f32 %v506_v12, 0.0 }
 0x233   :  { %v511_v15 = vmax.f32 %v501_v14, 0.0  ;;  %v6569_v16 = vpop.f32.mrb[8].mxu0  ;;  %7074 = vmatpush3.bf16.msra.mxu1 %v7863_v17 }
 0x234   :  { %v698_v19 = vadd.f32 %v6569_v16, %v7956_v56  ;;  %v692_v21 = vpop.f32.mrb[9].mxu0  ;;  %7076 = vmatprep.subr.bf16.mxu1 %v7873_v20 }
 0x235   :  { %v693_v22 = vadd.f32 %v7956_v56, %v692_v21  ;;  %6562 = vmatprep.mubr.msk.f32.mxu1 %vm107_vm0, %v511_v15 }
 0x236   :  { %6563 = vmatmul.mubr.msk.f32.gmra.mrb[10].mxu1 %vm107_vm0, %v512_v18  ;;  %v712_v25 = vmax.f32 %v698_v19, 0.0 }
 0x237   :  { %v711_v23 = vmax.f32 %v693_v22, 0.0  ;;  %v6572_v24 = vpop.f32.mrb[10].mxu0  ;;  %7078 = vmatpush3.bf16.msra.mxu1 %v7873_v20 }
 0x238   :  { %v708_v26 = vadd.f32 %v6572_v24, %v7956_v56  ;;  %v702_v27 = vpop.f32.mrb[11].mxu0  ;;  %7080 = vmatprep.subr.bf16.mxu1 %v7863_v17 }
 0x239   :  { %v703_v28 = vadd.f32 %v7956_v56, %v702_v27  ;;  %6581 = vmatprep.mubr.msk.f32.mxu1 %vm107_vm0, %v711_v23 }
 0x23a   :  { %6582 = vmatmul.mubr.msk.f32.vlgmr.msra.gmra.mrb[12].mxu1 %vm107_vm0, %v712_v25  ;;  %v714_v31 = vmax.f32 %v708_v26, 0.0 }
 0x23b   :  { %v713_v29 = vmax.f32 %v703_v28, 0.0  ;;  %v6591_v30 = vpop.f32.mrb[12].mxu0  ;;  %7082 = vmatpush3.bf16.msra.mxu1 %v7863_v17 }
 0x23c   :  { %v900_v32 = vadd.f32 %v6591_v30, %v7956_v56  ;;  %v894_v33 = vpop.f32.mrb[13].mxu0  ;;  %7084 = vmatprep.subr.bf16.mxu1 %v7873_v20  ;;  %v8049_v30 = vld [vmem:[%s9593_s7] ss:$0 sm:$0xff] }
 0x23d   :  { %v895_v34 = vadd.f32 %v7956_v56, %v894_v33  ;;  %6584 = vmatprep.mubr.msk.f32.mxu1 %vm107_vm0, %v713_v29 }
 0x23e   :  { %6585 = vmatmul.mubr.msk.f32.gmra.mrb[14].mxu1 %vm107_vm0, %v714_v31  ;;  %v914_v37 = vmax.f32 %v900_v32, 0.0 }
 0x23f   :  { %v913_v35 = vmax.f32 %v895_v34, 0.0  ;;  %v6594_v36 = vpop.f32.mrb[14].mxu0  ;;  %7086 = vmatpush3.bf16.msra.mxu1 %v7873_v20 }
 0x240   :  { %v910_v38 = vadd.f32 %v6594_v36, %v7956_v56  ;;  %v904_v39 = vpop.f32.mrb[15].mxu0  ;;  %7088 = vmatprep.subr.bf16.mxu1 %v7863_v17 }
 0x241   :  { %v905_v40 = vadd.f32 %v7956_v56, %v904_v39  ;;  %6603 = vmatprep.mubr.msk.f32.mxu1 %vm107_vm0, %v913_v35 }
 0x242   :  { %6604 = vmatmul.mubr.msk.f32.vlgmr.msra.gmra.mrb[16].mxu1 %vm107_vm0, %v914_v37  ;;  %v916_v43 = vmax.f32 %v910_v38, 0.0 }
 0x243   :  { %v915_v41 = vmax.f32 %v905_v40, 0.0  ;;  %v6613_v42 = vpop.f32.mrb[16].mxu0  ;;  %7090 = vmatpush3.bf16.msra.mxu1 %v7863_v17 }
 0x244   :  { %v1102_v45 = vadd.f32 %v6613_v42, %v7956_v56  ;;  %v1096_v46 = vpop.f32.mrb[17].mxu0  ;;  %7092 = vmatprep.subr.bf16.mxu1 %v7873_v20 }
 0x245   :  { %v1097_v47 = vadd.f32 %v7956_v56, %v1096_v46  ;;  %6606 = vmatprep.mubr.msk.f32.mxu1 %vm107_vm0, %v915_v41 }
 0x246   :  { %6607 = vmatmul.mubr.msk.f32.gmra.mrb[18].mxu1 %vm107_vm0, %v916_v43  ;;  %v1116_v50 = vmax.f32 %v1102_v45, 0.0  ;;  %v8065_v43 = vld [vmem:[%s9594_s6] ss:$0 sm:$0xff] }
 0x247   :  { %v1115_v48 = vmax.f32 %v1097_v47, 0.0  ;;  %v6616_v49 = vpop.f32.mrb[18].mxu0  ;;  %7094 = vmatpush3.bf16.msra.mxu1 %v7873_v20 }
 0x248   :  { %v1112_v52 = vadd.f32 %v6616_v49, %v7956_v56  ;;  %v1106_v53 = vpop.f32.mrb[19].mxu0  ;;  %7096 = vmatprep.subr.bf16.mxu1 %v7863_v17 }
 0x249   :  { %v1107_v54 = vadd.f32 %v7956_v56, %v1106_v53  ;;  %6625 = vmatprep.mubr.msk.f32.mxu1 %vm107_vm0, %v1115_v48 }
 0x24a   :  { %6626 = vmatmul.mubr.msk.f32.vlgmr.msra.gmra.mrb[20].mxu1 %vm107_vm0, %v1116_v50  ;;  %v1118_v59 = vmax.f32 %v1112_v52, 0.0 }
 0x24b   :  { %v1117_v57 = vmax.f32 %v1107_v54, 0.0  ;;  %v6635_v58 = vpop.f32.mrb[20].mxu0  ;;  %7098 = vmatpush3.bf16.msra.mxu1 %v7863_v17 }
 0x24c   :  { %v1304_v60 = vadd.f32 %v6635_v58, %v7956_v56  ;;  %v1298_v61 = vpop.f32.mrb[21].mxu0  ;;  %7100 = vmatprep.subr.bf16.mxu1 %v7873_v20 }
 0x24d   :  { %v1299_v62 = vadd.f32 %v7956_v56, %v1298_v61  ;;  %6628 = vmatprep.mubr.msk.f32.mxu1 %vm107_vm0, %v1117_v57 }
 0x24e   :  { %6629 = vmatmul.mubr.msk.f32.gmra.mrb[22].mxu1 %vm107_vm0, %v1118_v59  ;;  %v1318_v1 = vmax.f32 %v1304_v60, 0.0 }
 0x24f   :  { %v1317_v63 = vmax.f32 %v1299_v62, 0.0  ;;  %v6638_v0 = vpop.f32.mrb[22].mxu0  ;;  %7102 = vmatpush3.bf16.msra.mxu1 %v7873_v20 }
 0x250   :  { %v1314_v2 = vadd.f32 %v6638_v0, %v7956_v56  ;;  %v1308_v3 = vpop.f32.mrb[23].mxu0  ;;  %7104 = vmatprep.subr.bf16.mxu1 %v7863_v17 }
 0x251   :  { %v1309_v4 = vadd.f32 %v7956_v56, %v1308_v3  ;;  %6647 = vmatprep.mubr.msk.f32.mxu1 %vm107_vm0, %v1317_v63 }
 0x252   :  { %6648 = vmatmul.mubr.msk.f32.vlgmr.msra.gmra.mrb[24].mxu1 %vm107_vm0, %v1318_v1  ;;  %v1320_v7 = vmax.f32 %v1314_v2, 0.0 }
 0x253   :  { %v1319_v5 = vmax.f32 %v1309_v4, 0.0  ;;  %v6657_v6 = vpop.f32.mrb[24].mxu0  ;;  %7106 = vmatpush3.bf16.msra.mxu1 %v7863_v17 }
 0x254   :  { %v1506_v8 = vadd.f32 %v6657_v6, %v7956_v56  ;;  %v1500_v9 = vpop.f32.mrb[25].mxu0  ;;  %7108 = vmatprep.subr.bf16.mxu1 %v7873_v20 }
 0x255   :  { %v1501_v10 = vadd.f32 %v7956_v56, %v1500_v9  ;;  %6650 = vmatprep.mubr.msk.f32.mxu1 %vm107_vm0, %v1319_v5 }
 0x256   :  { %6651 = vmatmul.mubr.msk.f32.gmra.mrb[26].mxu1 %vm107_vm0, %v1320_v7  ;;  %v1520_v13 = vmax.f32 %v1506_v8, 0.0 }
 0x257   :  { %v1519_v11 = vmax.f32 %v1501_v10, 0.0  ;;  %v6660_v12 = vpop.f32.mrb[26].mxu0  ;;  %7110 = vmatpush3.bf16.msra.mxu1 %v7873_v20 }
 0x258   :  { %v1516_v14 = vadd.f32 %v6660_v12, %v7956_v56  ;;  %v1510_v15 = vpop.f32.mrb[27].mxu0  ;;  %7112 = vmatprep.subr.bf16.mxu1 %v7863_v17 }
 0x259   :  { %v1511_v16 = vadd.f32 %v7956_v56, %v1510_v15  ;;  %6669 = vmatprep.mubr.msk.f32.mxu1 %vm107_vm0, %v1519_v11 }
 0x25a   :  { %6670 = vmatmul.mubr.msk.f32.vlgmr.msra.gmra.mrb[28].mxu1 %vm107_vm0, %v1520_v13  ;;  %v1522_v21 = vmax.f32 %v1516_v14, 0.0 }
 0x25b   :  { %v1521_v18 = vmax.f32 %v1511_v16, 0.0  ;;  %v6679_v19 = vpop.f32.mrb[28].mxu0  ;;  %7114 = vmatpush3.bf16.msra.mxu1 %v7863_v17 }
 0x25c   :  { %v1708_v22 = vadd.f32 %v6679_v19, %v7956_v56  ;;  %v1702_v23 = vpop.f32.mrb[29].mxu0  ;;  %7116 = vmatprep.subr.bf16.mxu1 %v7873_v20 }
 0x25d   :  { %v1703_v24 = vadd.f32 %v7956_v56, %v1702_v23  ;;  %6672 = vmatprep.mubr.msk.f32.mxu1 %vm107_vm0, %v1521_v18 }
 0x25e   :  { %6673 = vmatmul.mubr.msk.f32.gmra.mrb[30].mxu1 %vm107_vm0, %v1522_v21  ;;  %v1722_v27 = vmax.f32 %v1708_v22, 0.0 }
 0x25f   :  { %v1721_v25 = vmax.f32 %v1703_v24, 0.0  ;;  %v6682_v26 = vpop.f32.mrb[30].mxu0  ;;  %7118 = vmatpush3.bf16.msra.mxu1 %v7873_v20 }
 0x260   :  { %v1718_v28 = vadd.f32 %v6682_v26, %v7956_v56  ;;  %v1712_v17 = vpop.f32.mrb[31].mxu0 }
 0x261   :  { %v1713_v29 = vadd.f32 %v7956_v56, %v1712_v17  ;;  %6691 = vmatprep.mubr.msk.f32.mxu1 %vm107_vm0, %v1721_v25 }
 0x262   :  { %6692 = vmatmul.mubr.msk.f32.vlgmr.msra.gmra.mrb[32].mxu1 %vm107_vm0, %v1722_v27  ;;  %v1724_v33 = vmax.f32 %v1718_v28, 0.0 }
 0x263   :  { %v1723_v31 = vmax.f32 %v1713_v29, 0.0  ;;  %v6707_v32 = vpop.f32.mrb[32].mxu0 }
 0x264   :  { %v1897_v20 = vadd.f32 %v6707_v32, %v8049_v30  ;;  %v1891_v34 = vpop.f32.mrb[33].mxu0 }
 0x265   :  { %v1892_v35 = vadd.f32 %v8049_v30, %v1891_v34  ;;  %6694 = vmatprep.mubr.msk.f32.mxu1 %vm107_vm0, %v1723_v31 }
 0x266   :  { %1944 = vrot.lane.b32.xlu1 %v1897_v20, %s7733_s17  ;;  %6695 = vmatmul.mubr.msk.f32.gmra.mrb[34].mxu1 %vm107_vm0, %v1724_v33 }
 0x267   :  { %v6710_v56 = vpop.f32.mrb[34].mxu0  ;;  %1942 = vrot.lane.b32.xlu0 %v1892_v35, %s7733_s17 }
 0x268   :  { %v1907_v36 = vadd.f32 %v6710_v56, %v8049_v30  ;;  %v1901_v37 = vpop.f32.mrb[35].mxu0 }
 0x269   :  { %v1902_v38 = vadd.f32 %v8049_v30, %v1901_v37 }
 0x26a   :  { %1948 = vrot.lane.b32.xlu1 %v1907_v36, %s7733_s17 }
 0x26b   :  { %1946 = vrot.lane.b32.xlu0 %v1902_v38, %s7733_s17 }
 0x28f   :  { %v6539_v39 = vpop.f32.mrb[4].mxu1 }
 0x290   :  { %v389_v40 = vpop.f32.mrb[5].mxu1  ;;  %v8068_v45 = vadd.f32 %v6539_v39, %v8065_v43 }
 0x291   :  { %v8071_v46 = vadd.f32 %v8065_v43, %v389_v40 }
 0x292   :  { %v1911_v47 = vadd.f32 %v1897_v20, %v8068_v45 }
 0x293   :  { %v1910_v49 = vadd.f32 %v1892_v35, %v8071_v46 }
 0x294   :  { %v6542_v41 = vpop.f32.mrb[6].mxu1  ;;  %v6039_v52 = vmul.f32 -1.442695, %v1911_v47 }
 0x295   :  { %v399_v42 = vpop.f32.mrb[7].mxu1  ;;  %v8075_v48 = vadd.f32 %v6542_v41, %v8065_v43  ;;  %v6038_v54 = vmul.f32 -1.442695, %v1910_v49 }
 0x296   :  { %v8079_v50 = vadd.f32 %v8065_v43, %v399_v42  ;;  %7333 = vpow2.f32 %v6039_v52 }
 0x297   :  { %v1913_v53 = vadd.f32 %v1907_v36, %v8075_v48  ;;  %7335 = vpow2.f32 %v6038_v54 }
 0x298   :  { %v1912_v57 = vadd.f32 %v1902_v38, %v8079_v50 }
 0x299   :  { %v6041_v58 = vmul.f32 -1.442695, %v1913_v53 }
 0x29a   :  { %v6040_v59 = vmul.f32 -1.442695, %v1912_v57 }
 0x29b   :  { %7337 = vpow2.f32 %v6041_v58 }
 0x29c   :  { %7339 = vpow2.f32 %v6040_v59 }
 0x2a0   :  { %v7334_v60 = vpop.eup %7333 }
 0x2a1   :  { %v7336_v61 = vpop.eup %7335  ;;  %v1927_v62 = vadd.f32 1.0, %v7334_v60 }
 0x2a2   :  { %v1926_v0 = vadd.f32 1.0, %v7336_v61  ;;  %v56_v61 = vld [vmem:[%s9595_s8] sm:$0xff] }
 0x2a3   :  { %7341 = vrcp.f32 %v1927_v62 }
 0x2a4   :  { %7343 = vrcp.f32 %v1926_v0 }
 0x2a5   :  { %v7338_v63 = vpop.eup %7337 }
 0x2a6   :  { %v7340_v1 = vpop.eup %7339  ;;  %v1929_v2 = vadd.f32 1.0, %v7338_v63  ;;  %v59_v63 = vld [vmem:[%s9595_s8 + $0x18] sm:$0xff] }
 0x2a7   :  { %v1928_v3 = vadd.f32 1.0, %v7340_v1 }
 0x2a8   :  { %7345 = vrcp.f32 %v1929_v2 }
 0x2a9   :  { %7347 = vrcp.f32 %v1928_v3  ;;  %v62_v3 = vld [vmem:[%s9596_s9 + $0x10] sm:$0xff] }
 0x2ad   :  { %v8083_v4 = vpop.eup %7341 }
 0x2ae   :  { %v8085_v6 = vpop.eup %7343 }
 0x2b2   :  { %v8090_v10 = vpop.eup %7345 }
 0x2b3   :  { %v8093_v12 = vpop.eup %7347 }
 0x2d8   :  { %v1945_v5 = vpop.permute.xlu1 %1944 }
 0x2d9   :  { %v1955_v7 = vmul.f32 %v8083_v4, %v1945_v5  ;;  %v1943_v8 = vpop.permute.xlu0 %1942  ;;  %v63_v5 = vld [vmem:[%s9596_s9 + $0x18] sm:$0xff] }
 0x2da   :  { %v1954_v9 = vmul.f32 %v8085_v6, %v1943_v8  ;;  %v8191_v8 = vpack.c.bf16 %v63_v5, %v62_v3 }
 0x2db   :  { %1964 = vrot.lane.b32.xlu1 %v1955_v7, %s7733_s17 }
 0x2dc   :  { %v1949_v11 = vpop.permute.xlu1 %1948  ;;  %1962 = vrot.lane.b32.xlu0 %v1954_v9, %s7733_s17 }
 0x2dd   :  { %v1957_v13 = vmul.f32 %v8090_v10, %v1949_v11  ;;  %v1947_v14 = vpop.permute.xlu0 %1946 }
 0x2de   :  { %v1956_v15 = vmul.f32 %v8093_v12, %v1947_v14 }
 0x2df   :  { %1968 = vrot.lane.b32.xlu1 %v1957_v13, %s7733_s17  ;;  %v1983_v13 = vsub.f32 1.0, %v8083_v4 }
 0x2e0   :  { %1966 = vrot.lane.b32.xlu0 %v1956_v15, %s7733_s17  ;;  %v1982_v15 = vsub.f32 1.0, %v8085_v6 }
 0x305   :  { %v8099_v16 = vpop.f32.mrb[8].mxu1 }
 0x306   :  { %v8101_v18 = vpop.f32.mrb[9].mxu1 }
 0x309   :  { %v8103_v19 = vpop.f32.mrb[10].mxu1 }
 0x30a   :  { %v8105_v21 = vpop.f32.mrb[11].mxu1 }
 0x30d   :  { %v8107_v22 = vpop.f32.mrb[12].mxu1 }
 0x30e   :  { %v8109_v23 = vpop.f32.mrb[13].mxu1 }
 0x311   :  { %v8111_v24 = vpop.f32.mrb[14].mxu1 }
 0x312   :  { %v8113_v25 = vpop.f32.mrb[15].mxu1 }
 0x315   :  { %v8115_v26 = vpop.f32.mrb[16].mxu1 }
 0x316   :  { %v8117_v27 = vpop.f32.mrb[17].mxu1 }
 0x319   :  { %v8119_v28 = vpop.f32.mrb[18].mxu1 }
 0x31a   :  { %v8121_v17 = vpop.f32.mrb[19].mxu1 }
 0x31d   :  { %v8123_v29 = vpop.f32.mrb[20].mxu1 }
 0x31e   :  { %v8125_v31 = vpop.f32.mrb[21].mxu1 }
 0x321   :  { %v8127_v32 = vpop.f32.mrb[22].mxu1 }
 0x322   :  { %v8129_v33 = vpop.f32.mrb[23].mxu1 }
 0x325   :  { %v8131_v20 = vpop.f32.mrb[24].mxu1 }
 0x326   :  { %v8133_v34 = vpop.f32.mrb[25].mxu1 }
 0x329   :  { %v8135_v35 = vpop.f32.mrb[26].mxu1 }
 0x32a   :  { %v8137_v56 = vpop.f32.mrb[27].mxu1 }
 0x32d   :  { %v8139_v36 = vpop.f32.mrb[28].mxu1 }
 0x32e   :  { %v8141_v37 = vpop.f32.mrb[29].mxu1 }
 0x331   :  { %v8143_v38 = vpop.f32.mrb[30].mxu1 }
 0x332   :  { %v8145_v39 = vpop.f32.mrb[31].mxu1 }
 0x335   :  { %v8147_v40 = vpop.f32.mrb[32].mxu1 }
 0x336   :  { %v8149_v41 = vpop.f32.mrb[33].mxu1 }
 0x339   :  { %v8151_v42 = vpop.f32.mrb[34].mxu1 }
 0x33a   :  { %9602 = vst [vmem:[#allocation2_spill] sm:$0xff] %v8151_v42  ;;  %v8153_v47 = vpop.f32.mrb[35].mxu1 }
 0x33b   :  { %9603 = vst [vmem:[#allocation3_spill] sm:$0xff] %v8153_v47 }
 0x34d   :  { %v1965_v49 = vpop.permute.xlu1 %1964 }
 0x34e   :  { %v1975_v52 = vadd.f32 %v1965_v49, %v8068_v45  ;;  %v1963_v53 = vpop.permute.xlu0 %1962  ;;  %v57_v45 = vld [vmem:[%s9595_s8 + $0x8] sm:$0xff]  ;;  %v2007_v49 = vmul.f32 0.0, %v8083_v4 }
 0x34f   :  { %v1974_v54 = vadd.f32 %v1963_v53, %v8071_v46  ;;  %v60_v46 = vld [vmem:[%s9596_s9] sm:$0xff]  ;;  %v8168_v62 = vpack.c.bf16 %v57_v45, %v56_v61  ;;  %v1984_v61 = vsub.f32 1.0, %v8093_v12  ;;  %v2009_v45 = vmul.f32 0.0, %v8090_v10 }
 0x350   :  { %7349 = vtanh.f32 %v1975_v52 }
 0x351   :  { %7351 = vtanh.f32 %v1974_v54  ;;  %v1969_v57 = vpop.permute.xlu1 %1968  ;;  %7128 = vmatprep.subr.bf16.mxu1 %v8168_v62  ;;  %v2006_v54 = vmul.f32 0.0, %v8085_v6 }
 0x352   :  { %v1977_v58 = vadd.f32 %v1969_v57, %v8075_v48  ;;  %v1967_v59 = vpop.permute.xlu0 %1966  ;;  %v61_v48 = vld [vmem:[%s9596_s9 + $0x8] sm:$0xff]  ;;  %7130 = vmatpush3.bf16.msra.mxu1 %v8168_v62 }
 0x353   :  { %v1976_v60 = vadd.f32 %v1967_v59, %v8079_v50  ;;  %v58_v50 = vld [vmem:[%s9595_s8 + $0x10] sm:$0xff]  ;;  %v8179_v1 = vpack.c.bf16 %v61_v48, %v60_v46  ;;  %v2008_v48 = vmul.f32 0.0, %v8093_v12 }
 0x354   :  { %7353 = vtanh.f32 %v1977_v58  ;;  %v8181_v2 = vpack.c.bf16 %v59_v63, %v58_v50 }
 0x355   :  { %7355 = vtanh.f32 %v1976_v60  ;;  %7136 = vmatprep.subr.bf16.mxu0 %v8179_v1 }
 0x356   :  { %7132 = vmatprep.subr.bf16.mxu1 %v8181_v2  ;;  %7138 = vmatpush3.bf16.msra.mxu0 %v8179_v1 }
 0x357   :  { %7140 = vmatprep.subr.bf16.mxu0 %v8191_v8  ;;  %7134 = vmatpush3.bf16.msra.mxu1 %v8181_v2 }
 0x358   :  { %7144 = vmatprep.subr.bf16.mxu1 %v7925_v44 }
 0x35a   :  { %v7350_v0 = vpop.eup %7349  ;;  %7142 = vmatpush3.bf16.msra.mxu0 %v8191_v8 }
 0x35b   :  { %v7352_v7 = vpop.eup %7351  ;;  %1992 = vrot.lane.b32.xlu1 %v7350_v0, %s7734_s15  ;;  %7152 = vmatprep.subr.bf16.mxu0 %v8168_v62 }
 0x35c   :  { %1990 = vrot.lane.b32.xlu0 %v7352_v7, %s7734_s15 }
 0x35d   :  { %6734 = vmatmul.mubr.f32.vlgmr.msra.gmra.mrb[36].mxu0 %v7732_v55 }
 0x35e   :  { %v7354_v9 = vpop.eup %7353  ;;  %6736 = vmatprep.mubr.f32.mxu0 %v7732_v55  ;;  %7154 = vmatpush3.bf16.msra.mxu0 %v8168_v62 }
 0x35f   :  { %v7356_v11 = vpop.eup %7355  ;;  %1996 = vrot.lane.b32.xlu1 %v7354_v9, %s7734_s15  ;;  %7156 = vmatprep.subr.bf16.mxu0 %v8181_v2 }
 0x360   :  { %1994 = vrot.lane.b32.xlu0 %v7356_v11, %s7734_s15 }
 0x361   :  { %6737 = vmatmul.mubr.f32.gmra.mrb[38].mxu0 %v7732_v55  ;;  %v1985_v55 = vsub.f32 1.0, %v8090_v10 }
 0x362   :  { %7158 = vmatpush3.bf16.msra.mxu0 %v8181_v2 }
 0x363   :  { %7168 = vmatprep.subr.bf16.mxu0 %v7925_v44 }
 0x3cd   :  { %v1993_v14 = vpop.permute.xlu1 %1992 }
 0x3ce   :  { %v2003_v52 = vmul.f32 %v1993_v14, %v1983_v13  ;;  %v1991_v53 = vpop.permute.xlu0 %1990 }
 0x3cf   :  { %v2002_v57 = vmul.f32 %v1991_v53, %v1982_v15 }
 0x3d0   :  { %v8216_v58 = vadd.f32 %v2007_v49, %v2003_v52 }
 0x3d1   :  { %v8219_v59 = vadd.f32 %v2006_v54, %v2002_v57  ;;  %v1997_v60 = vpop.permute.xlu1 %1996 }
 0x3d2   :  { %v2005_v46 = vmul.f32 %v1997_v60, %v1985_v55  ;;  %2020 = vrot.lane.b32.xlu1 %v8216_v58, %s7734_s15  ;;  %v1995_v4 = vpop.permute.xlu0 %1994 }
 0x3d3   :  { %v2004_v6 = vmul.f32 %v1995_v4, %v1984_v61  ;;  %2018 = vrot.lane.b32.xlu0 %v8219_v59, %s7734_s15 }
 0x3d4   :  { %v8228_v50 = vadd.f32 %v2009_v45, %v2005_v46  ;;  %v8260_v45 = vld [vmem:[%s9597_s11] ss:$0 sm:$0xff] }
 0x3d5   :  { %v8230_v63 = vadd.f32 %v2008_v48, %v2004_v6 }
 0x3d6   :  { %2024 = vrot.lane.b32.xlu1 %v8228_v50, %s7734_s15 }
 0x3d7   :  { %2022 = vrot.lane.b32.xlu0 %v8230_v63, %s7734_s15 }
 0x430   :  { %v6735_v5 = vpop.f32.mrb[36].mxu0 }
 0x431   :  { %v2185_v7 = vpop.f32.mrb[37].mxu0  ;;  %v2191_v4 = vadd.f32 %v6735_v5, %v8260_v45  ;;  %v8285_v5 = vld [vmem:[%s9598_s10] ss:$0 sm:$0xff] }
 0x432   :  { %v2186_v48 = vadd.f32 %v8260_v45, %v2185_v7 }
 0x434   :  { %v6738_v9 = vpop.f32.mrb[38].mxu0 }
 0x435   :  { %v2195_v11 = vpop.f32.mrb[39].mxu0  ;;  %v2201_v6 = vadd.f32 %v6738_v9, %v8260_v45  ;;  %v8290_v9 = vadd.f32 %v8103_v19, %v8065_v43 }
 0x444   :  { %v2021_v10 = vpop.permute.xlu1 %2020 }
 0x445   :  { %v2019_v0 = vpop.permute.xlu0 %2018 }
 0x446   :  { %6719 = vmatprep.mubr.msk.f32.mxu1 %vm107_vm0, %v2019_v0 }
 0x447   :  { %6720 = vmatmul.mubr.msk.f32.vlgmr.msra.gmra.mrb[36].mxu1 %vm107_vm0, %v2021_v10 }
 0x448   :  { %7146 = vmatpush3.bf16.msra.mxu1 %v7925_v44  ;;  %v2025_v3 = vpop.permute.xlu1 %2024 }
 0x449   :  { %v2023_v12 = vpop.permute.xlu0 %2022  ;;  %7148 = vmatprep.subr.bf16.mxu1 %v7940_v51 }
 0x44a   :  { %6722 = vmatprep.mubr.msk.f32.mxu1 %vm107_vm0, %v2023_v12 }
 0x44b   :  { %6723 = vmatmul.mubr.msk.f32.gmra.mrb[38].mxu1 %vm107_vm0, %v2025_v3 }
 0x44c   :  { %7150 = vmatpush3.bf16.msra.mxu1 %v7940_v51  ;;  %6747 = vmatprep.mubr.msk.f32.mxu1 %vm107_vm0, %v2019_v0  ;;  %v8275_v0 = vadd.f32 %v8099_v16, %v8065_v43  ;;  %v8294_v16 = vadd.f32 %v8065_v43, %v8105_v21 }
 0x44d   :  { %7160 = vmatprep.subr.bf16.mxu1 %v8179_v1 }
 0x44f   :  { %6748 = vmatmul.mubr.msk.f32.vlgmr.msra.gmra.mrb[40].mxu1 %vm107_vm0, %v2021_v10  ;;  %v2196_v10 = vadd.f32 %v8260_v45, %v2195_v11 }
 0x450   :  { %6750 = vmatprep.mubr.msk.f32.mxu1 %vm107_vm0, %v2023_v12  ;;  %7162 = vmatpush3.bf16.msra.mxu1 %v8179_v1  ;;  %v8279_v12 = vadd.f32 %v8065_v43, %v8101_v18 }
 0x451   :  { %7164 = vmatprep.subr.bf16.mxu1 %v8191_v8 }
 0x453   :  { %6751 = vmatmul.mubr.msk.f32.gmra.mrb[42].mxu1 %vm107_vm0, %v2025_v3 }
 0x454   :  { %7166 = vmatpush3.bf16.msra.mxu1 %v8191_v8 }
 0x455   :  { %7176 = vmatprep.subr.bf16.mxu1 %v8168_v62 }
 0x51a   :  { %v6721_v13 = vpop.f32.mrb[36].mxu1 }
 0x51b   :  { %v2100_v14 = vpop.f32.mrb[37].mxu1  ;;  %v8297_v18 = vadd.f32 %v6721_v13, %v8285_v5 }
 0x51e   :  { %v6724_v15 = vpop.f32.mrb[38].mxu1 }
 0x51f   :  { %v2110_v49 = vpop.f32.mrb[39].mxu1  ;;  %v8306_v19 = vadd.f32 %v6724_v15, %v8285_v5 }
 0x520   :  { %v8310_v13 = vadd.f32 %v8285_v5, %v2110_v49 }
 0x522   :  { %v6749_v52 = vpop.f32.mrb[40].mxu1 }
 0x523   :  { %v2380_v53 = vadd.f32 %v6749_v52, %v8049_v30  ;;  %v2374_v54 = vpop.f32.mrb[41].mxu1 }
 0x524   :  { %v2375_v57 = vadd.f32 %v8049_v30, %v2374_v54 }
 0x525   :  { %2427 = vrot.lane.b32.xlu1 %v2380_v53, %s7733_s17  ;;  %v2394_v3 = vadd.f32 %v2380_v53, %v8275_v0  ;;  %v8301_v53 = vadd.f32 %v8285_v5, %v2100_v14  ;;  %v2207_v14 = vadd.f32 %v2201_v6, %v8306_v19 }
 0x526   :  { %v6752_v55 = vpop.f32.mrb[42].mxu1  ;;  %2425 = vrot.lane.b32.xlu0 %v2375_v57, %s7733_s17  ;;  %v2393_v7 = vadd.f32 %v2375_v57, %v8279_v12 }
 0x527   :  { %v2390_v60 = vadd.f32 %v6752_v55, %v8049_v30  ;;  %v2384_v61 = vpop.f32.mrb[43].mxu1  ;;  %v6055_v11 = vmul.f32 -1.442695, %v2394_v3  ;;  %v2205_v55 = vadd.f32 %v2191_v4, %v8297_v18  ;;  %v6049_v15 = vmul.f32 -1.442695, %v2207_v14 }
 0x528   :  { %v2385_v46 = vadd.f32 %v8049_v30, %v2384_v61  ;;  %v6054_v54 = vmul.f32 -1.442695, %v2393_v7  ;;  %v2204_v61 = vadd.f32 %v2186_v48, %v8301_v53 }
 0x529   :  { %2431 = vrot.lane.b32.xlu1 %v2390_v60, %s7733_s17  ;;  %v2396_v52 = vadd.f32 %v2390_v60, %v8290_v9  ;;  %7357 = vpow2.f32 %v6055_v11  ;;  %v6047_v3 = vmul.f32 -1.442695, %v2205_v55 }
 0x52a   :  { %2429 = vrot.lane.b32.xlu0 %v2385_v46, %s7733_s17  ;;  %v2395_v57 = vadd.f32 %v2385_v46, %v8294_v16  ;;  %7359 = vpow2.f32 %v6054_v54  ;;  %v6046_v7 = vmul.f32 -1.442695, %v2204_v61  ;;  %v2206_v46 = vadd.f32 %v2196_v10, %v8310_v13 }
 0x52b   :  { %v6057_v21 = vmul.f32 -1.442695, %v2396_v52 }
 0x52c   :  { %v6056_v60 = vmul.f32 -1.442695, %v2395_v57 }
 0x52d   :  { %2238 = vrot.lane.b32.xlu1 %v2191_v4, %s7733_s17  ;;  %7361 = vpow2.f32 %v6057_v21  ;;  %v6048_v4 = vmul.f32 -1.442695, %v2206_v46 }
 0x52e   :  { %2236 = vrot.lane.b32.xlu0 %v2186_v48, %s7733_s17  ;;  %7363 = vpow2.f32 %v6056_v60 }
 0x52f   :  { %7365 = vpow2.f32 %v6047_v3 }
 0x530   :  { %7367 = vpow2.f32 %v6046_v7 }
 0x531   :  { %2242 = vrot.lane.b32.xlu1 %v2201_v6, %s7733_s17  ;;  %7369 = vpow2.f32 %v6049_v15 }
 0x532   :  { %2240 = vrot.lane.b32.xlu0 %v2196_v10, %s7733_s17  ;;  %7371 = vpow2.f32 %v6048_v4 }
 0x533   :  { %v7358_v11 = vpop.eup %7357 }
 0x534   :  { %v7360_v52 = vpop.eup %7359  ;;  %v2410_v49 = vadd.f32 1.0, %v7358_v11 }
 0x535   :  { %v2409_v54 = vadd.f32 1.0, %v7360_v52 }
 0x536   :  { %7373 = vrcp.f32 %v2410_v49 }
 0x537   :  { %v7362_v48 = vpop.eup %7361  ;;  %7375 = vrcp.f32 %v2409_v54 }
 0x538   :  { %v7364_v57 = vpop.eup %7363  ;;  %v2412_v55 = vadd.f32 1.0, %v7362_v48 }
 0x539   :  { %v7366_v6 = vpop.eup %7365  ;;  %v2411_v21 = vadd.f32 1.0, %v7364_v57 }
 0x53a   :  { %v7368_v61 = vpop.eup %7367  ;;  %v2221_v10 = vadd.f32 1.0, %v7366_v6  ;;  %7377 = vrcp.f32 %v2412_v55 }
 0x53b   :  { %v7370_v60 = vpop.eup %7369  ;;  %v2220_v3 = vadd.f32 1.0, %v7368_v61  ;;  %7379 = vrcp.f32 %v2411_v21 }
 0x53c   :  { %v7372_v14 = vpop.eup %7371  ;;  %7381 = vrcp.f32 %v2221_v10  ;;  %v2223_v7 = vadd.f32 1.0, %v7370_v60 }
 0x53d   :  { %7383 = vrcp.f32 %v2220_v3  ;;  %v2222_v46 = vadd.f32 1.0, %v7372_v14 }
 0x53e   :  { %7385 = vrcp.f32 %v2223_v7 }
 0x53f   :  { %7387 = vrcp.f32 %v2222_v46 }
 0x540   :  { %v8314_v15 = vpop.eup %7373 }
 0x541   :  { %v8316_v11 = vpop.eup %7375 }
 0x544   :  { %v8321_v54 = vpop.eup %7377 }
 0x545   :  { %v8324_v55 = vpop.eup %7379 }
 0x546   :  { %v8329_v10 = vpop.eup %7381 }
 0x547   :  { %v8332_v3 = vpop.eup %7383 }
 0x597   :  { %v2428_v4 = vpop.permute.xlu1 %2427 }
 0x598   :  { %v2438_v52 = vmul.f32 %v8314_v15, %v2428_v4  ;;  %v2426_v49 = vpop.permute.xlu0 %2425  ;;  %v8337_v4 = vpop.eup %7385 }
 0x599   :  { %v2437_v48 = vmul.f32 %v8316_v11, %v2426_v49  ;;  %v8340_v49 = vpop.eup %7387 }
 0x59a   :  { %2447 = vrot.lane.b32.xlu1 %v2438_v52, %s7733_s17 }
 0x59b   :  { %v2432_v57 = vpop.permute.xlu1 %2431  ;;  %2445 = vrot.lane.b32.xlu0 %v2437_v48, %s7733_s17 }
 0x59c   :  { %v2440_v6 = vmul.f32 %v8321_v54, %v2432_v57  ;;  %v2430_v21 = vpop.permute.xlu0 %2429 }
 0x59d   :  { %v2439_v61 = vmul.f32 %v8324_v55, %v2430_v21 }
 0x59e   :  { %2451 = vrot.lane.b32.xlu1 %v2440_v6, %s7733_s17 }
 0x59f   :  { %v2239_v60 = vpop.permute.xlu1 %2238  ;;  %2449 = vrot.lane.b32.xlu0 %v2439_v61, %s7733_s17 }
 0x5a0   :  { %v2249_v14 = vmul.f32 %v8329_v10, %v2239_v60  ;;  %v2237_v7 = vpop.permute.xlu0 %2236 }
 0x5a1   :  { %v2248_v46 = vmul.f32 %v8332_v3, %v2237_v7 }
 0x5a2   :  { %2258 = vrot.lane.b32.xlu1 %v2249_v14, %s7733_s17 }
 0x5a3   :  { %v2243_v52 = vpop.permute.xlu1 %2242  ;;  %2256 = vrot.lane.b32.xlu0 %v2248_v46, %s7733_s17 }
 0x5a4   :  { %v2251_v48 = vmul.f32 %v8337_v4, %v2243_v52  ;;  %v2241_v57 = vpop.permute.xlu0 %2240 }
 0x5a5   :  { %v2250_v6 = vmul.f32 %v8340_v49, %v2241_v57 }
 0x5a6   :  { %2262 = vrot.lane.b32.xlu1 %v2251_v48, %s7733_s17 }
 0x5a7   :  { %2260 = vrot.lane.b32.xlu0 %v2250_v6, %s7733_s17 }
 0x60c   :  { %v2448_v21 = vpop.permute.xlu1 %2447 }
 0x60d   :  { %v2458_v61 = vadd.f32 %v2448_v21, %v8275_v0  ;;  %v2446_v60 = vpop.permute.xlu0 %2445 }
 0x60e   :  { %v2457_v14 = vadd.f32 %v2446_v60, %v8279_v12 }
 0x60f   :  { %7389 = vtanh.f32 %v2458_v61 }
 0x610   :  { %7391 = vtanh.f32 %v2457_v14  ;;  %v2452_v7 = vpop.permute.xlu1 %2451 }
 0x611   :  { %v2460_v46 = vadd.f32 %v2452_v7, %v8290_v9  ;;  %v2450_v47 = vpop.permute.xlu0 %2449  ;;  %v2465_v7 = vsub.f32 1.0, %v8316_v11 }
 0x612   :  { %v2459_v52 = vadd.f32 %v2450_v47, %v8294_v16 }
 0x613   :  { %7393 = vtanh.f32 %v2460_v46  ;;  %v2490_v46 = vmul.f32 %v8314_v15, %v8216_v58 }
 0x614   :  { %7395 = vtanh.f32 %v2459_v52  ;;  %v2259_v57 = vpop.permute.xlu1 %2258 }
 0x615   :  { %v2269_v48 = vadd.f32 %v2259_v57, %v8297_v18  ;;  %v2257_v6 = vpop.permute.xlu0 %2256 }
 0x616   :  { %v2268_v42 = vadd.f32 %v2257_v6, %v8301_v53 }
 0x617   :  { %7397 = vtanh.f32 %v2269_v48  ;;  %v2489_v48 = vmul.f32 %v8316_v11, %v8219_v59  ;;  %v2491_v59 = vmul.f32 %v8324_v55, %v8230_v63 }
 0x618   :  { %7399 = vtanh.f32 %v2268_v42  ;;  %v2263_v0 = vpop.permute.xlu1 %2262 }
 0x619   :  { %v7390_v12 = vpop.eup %7389  ;;  %v2271_v21 = vadd.f32 %v2263_v0, %v8306_v19  ;;  %v2261_v61 = vpop.permute.xlu0 %2260 }
 0x61a   :  { %v7392_v60 = vpop.eup %7391  ;;  %v2270_v9 = vadd.f32 %v2261_v61, %v8310_v13  ;;  %2475 = vrot.lane.b32.xlu1 %v7390_v12, %s7734_s15  ;;  %v2466_v13 = vsub.f32 1.0, %v8314_v15  ;;  %v2468_v12 = vsub.f32 1.0, %v8321_v54 }
 0x61b   :  { %7401 = vtanh.f32 %v2271_v21  ;;  %2473 = vrot.lane.b32.xlu0 %v7392_v60, %s7734_s15  ;;  %v2467_v60 = vsub.f32 1.0, %v8324_v55  ;;  %v2300_v55 = vmul.f32 0.0, %v8332_v3 }
 0x61c   :  { %7403 = vtanh.f32 %v2270_v9  ;;  %v2492_v9 = vmul.f32 %v8321_v54, %v8228_v50  ;;  %v2276_v50 = vsub.f32 1.0, %v8332_v3  ;;  %v2301_v54 = vmul.f32 0.0, %v8329_v10 }
 0x61d   :  { %v7394_v47 = vpop.eup %7393 }
 0x61e   :  { %v7396_v16 = vpop.eup %7395  ;;  %2479 = vrot.lane.b32.xlu1 %v7394_v47, %s7734_s15 }
 0x61f   :  { %2477 = vrot.lane.b32.xlu0 %v7396_v16, %s7734_s15  ;;  %v2277_v16 = vsub.f32 1.0, %v8329_v10  ;;  %v2278_v10 = vsub.f32 1.0, %v8340_v49 }
 0x621   :  { %v7398_v42 = vpop.eup %7397 }
 0x622   :  { %v7400_v18 = vpop.eup %7399  ;;  %2286 = vrot.lane.b32.xlu1 %v7398_v42, %s7734_s15 }
 0x623   :  { %2284 = vrot.lane.b32.xlu0 %v7400_v18, %s7734_s15 }
 0x625   :  { %v7402_v53 = vpop.eup %7401 }
 0x626   :  { %v7404_v19 = vpop.eup %7403  ;;  %2290 = vrot.lane.b32.xlu1 %v7402_v53, %s7734_s15 }
 0x627   :  { %2288 = vrot.lane.b32.xlu0 %v7404_v19, %s7734_s15 }
 0x68c   :  { %v2476_v14 = vpop.permute.xlu1 %2475 }
 0x68d   :  { %v2486_v52 = vmul.f32 %v2476_v14, %v2466_v13  ;;  %v2474_v57 = vpop.permute.xlu0 %2473  ;;  %v2279_v14 = vsub.f32 1.0, %v8337_v4 }
 0x68e   :  { %v2485_v6 = vmul.f32 %v2474_v57, %v2465_v7 }
 0x68f   :  { %v8368_v0 = vadd.f32 %v2490_v46, %v2486_v52  ;;  %v2303_v52 = vmul.f32 0.0, %v8337_v4 }
 0x690   :  { %v8371_v21 = vadd.f32 %v2489_v48, %v2485_v6  ;;  %v2480_v61 = vpop.permute.xlu1 %2479  ;;  %v2302_v48 = vmul.f32 0.0, %v8340_v49 }
 0x691   :  { %v2488_v47 = vmul.f32 %v2480_v61, %v2468_v12  ;;  %2503 = vrot.lane.b32.xlu1 %v8368_v0, %s7734_s15  ;;  %v2478_v58 = vpop.permute.xlu0 %2477 }
 0x692   :  { %v2487_v15 = vmul.f32 %v2478_v58, %v2467_v60  ;;  %2501 = vrot.lane.b32.xlu0 %v8371_v21, %s7734_s15 }
 0x693   :  { %v8382_v11 = vadd.f32 %v2492_v9, %v2488_v47 }
 0x694   :  { %v8385_v42 = vadd.f32 %v2491_v59, %v2487_v15  ;;  %v2287_v18 = vpop.permute.xlu1 %2286 }
 0x695   :  { %v2297_v53 = vmul.f32 %v2287_v18, %v2277_v16  ;;  %2507 = vrot.lane.b32.xlu1 %v8382_v11, %s7734_s15  ;;  %v2285_v63 = vpop.permute.xlu0 %2284 }
 0x696   :  { %v2296_v19 = vmul.f32 %v2285_v63, %v2276_v50  ;;  %2505 = vrot.lane.b32.xlu0 %v8385_v42, %s7734_s15 }
 0x697   :  { %v8394_v13 = vadd.f32 %v2301_v54, %v2297_v53 }
 0x698   :  { %v8397_v7 = vadd.f32 %v2300_v55, %v2296_v19  ;;  %v2291_v46 = vpop.permute.xlu1 %2290 }
 0x699   :  { %v2299_v57 = vmul.f32 %v2291_v46, %v2279_v14  ;;  %2608 = vrot.lane.b32.xlu1 %v8394_v13, %s7734_s15  ;;  %v2289_v3 = vpop.permute.xlu0 %2288 }
 0x69a   :  { %v2298_v6 = vmul.f32 %v2289_v3, %v2278_v10  ;;  %2606 = vrot.lane.b32.xlu0 %v8397_v7, %s7734_s15 }
 0x69b   :  { %v8406_v12 = vadd.f32 %v2303_v52, %v2299_v57 }
 0x69c   :  { %v8408_v61 = vadd.f32 %v2302_v48, %v2298_v6 }
 0x69d   :  { %2612 = vrot.lane.b32.xlu1 %v8406_v12, %s7734_s15 }
 0x69e   :  { %2610 = vrot.lane.b32.xlu0 %v8408_v61, %s7734_s15 }
 0x703   :  { %v2504_v4 = vpop.permute.xlu1 %2503 }
 0x704   :  { %v2502_v60 = vpop.permute.xlu0 %2501 }
 0x705   :  { %6761 = vmatprep.mubr.msk.f32.mxu0 %vm107_vm0, %v2502_v60 }
 0x706   :  { %6762 = vmatmul.mubr.msk.f32.vlgmr.msra.gmra.mrb[40].mxu0 %vm107_vm0, %v2504_v4 }
 0x707   :  { %7170 = vmatpush3.bf16.msra.mxu0 %v7925_v44  ;;  %v2508_v49 = vpop.permute.xlu1 %2507 }
 0x708   :  { %v2506_v9 = vpop.permute.xlu0 %2505  ;;  %7172 = vmatprep.subr.bf16.mxu0 %v7940_v51 }
 0x709   :  { %6764 = vmatprep.mubr.msk.f32.mxu0 %vm107_vm0, %v2506_v9 }
 0x70a   :  { %6765 = vmatmul.mubr.msk.f32.gmra.mrb[42].mxu0 %vm107_vm0, %v2508_v49 }
 0x70b   :  { %7174 = vmatpush3.bf16.msra.mxu0 %v7940_v51  ;;  %v2609_v47 = vpop.permute.xlu1 %2608  ;;  %6789 = vmatprep.mubr.msk.f32.mxu0 %vm107_vm0, %v2502_v60 }
 0x70c   :  { %v2607_v58 = vpop.permute.xlu0 %2606  ;;  %7184 = vmatprep.subr.bf16.mxu0 %v8179_v1 }
 0x70d   :  { %6775 = vmatprep.mubr.msk.f32.mxu1 %vm107_vm0, %v2607_v58 }
 0x70e   :  { %6776 = vmatmul.mubr.msk.f32.vlgmr.msra.gmra.mrb[44].mxu1 %vm107_vm0, %v2609_v47  ;;  %6790 = vmatmul.mubr.msk.f32.vlgmr.msra.gmra.mrb[44].mxu0 %vm107_vm0, %v2504_v4  ;;  %v8460_v47 = vadd.f32 %v8065_v43, %v8109_v23 }
 0x70f   :  { %6792 = vmatprep.mubr.msk.f32.mxu0 %vm107_vm0, %v2506_v9  ;;  %7178 = vmatpush3.bf16.msra.mxu1 %v8168_v62  ;;  %v2613_v15 = vpop.permute.xlu1 %2612 }
 0x710   :  { %v2611_v59 = vpop.permute.xlu0 %2610  ;;  %7180 = vmatprep.subr.bf16.mxu1 %v8181_v2  ;;  %7186 = vmatpush3.bf16.msra.mxu0 %v8179_v1 }
 0x711   :  { %6778 = vmatprep.mubr.msk.f32.mxu1 %vm107_vm0, %v2611_v59  ;;  %7188 = vmatprep.subr.bf16.mxu0 %v8191_v8 }
 0x712   :  { %6779 = vmatmul.mubr.msk.f32.gmra.mrb[46].mxu1 %vm107_vm0, %v2613_v15  ;;  %6793 = vmatmul.mubr.msk.f32.gmra.mrb[46].mxu0 %vm107_vm0, %v2508_v49  ;;  %v8466_v15 = vadd.f32 %v8111_v24, %v8065_v43 }
 0x713   :  { %7182 = vmatpush3.bf16.msra.mxu1 %v8181_v2 }
 0x714   :  { %7192 = vmatprep.subr.bf16.mxu1 %v7925_v44  ;;  %7190 = vmatpush3.bf16.msra.mxu0 %v8191_v8 }
 0x715   :  { %7200 = vmatprep.subr.bf16.mxu0 %v8168_v62 }
 0x7d9   :  { %v6763_v16 = vpop.f32.mrb[40].mxu0 }
 0x7da   :  { %v2583_v18 = vpop.f32.mrb[41].mxu0  ;;  %v8475_v23 = vadd.f32 %v6763_v16, %v8285_v5 }
 0x7dd   :  { %v6766_v50 = vpop.f32.mrb[42].mxu0 }
 0x7de   :  { %v2593_v54 = vpop.f32.mrb[43].mxu0 }
 0x7e1   :  { %v6777_v53 = vpop.f32.mrb[44].mxu1  ;;  %v6791_v63 = vpop.f32.mrb[44].mxu0 }
 0x7e2   :  { %v2883_v55 = vadd.f32 %v6791_v63, %v8049_v30  ;;  %v2688_v19 = vpop.f32.mrb[45].mxu1  ;;  %v2877_v14 = vpop.f32.mrb[45].mxu0  ;;  %v2694_v4 = vadd.f32 %v6777_v53, %v8260_v45  ;;  %v8470_v53 = vadd.f32 %v8065_v43, %v8113_v25  ;;  %v8483_v25 = vadd.f32 %v6766_v50, %v8285_v5 }
 0x7e3   :  { %v2878_v46 = vadd.f32 %v8049_v30, %v2877_v14  ;;  %v2689_v60 = vadd.f32 %v8260_v45, %v2688_v19 }
 0x7e4   :  { %2930 = vrot.lane.b32.xlu1 %v2883_v55, %s7733_s17 }
 0x7e5   :  { %v6794_v10 = vpop.f32.mrb[46].mxu0  ;;  %2928 = vrot.lane.b32.xlu0 %v2878_v46, %s7733_s17  ;;  %v6780_v52 = vpop.f32.mrb[46].mxu1  ;;  %v2896_v59 = vadd.f32 %v2878_v46, %v8460_v47  ;;  %v2708_v46 = vadd.f32 %v2694_v4, %v8475_v23 }
 0x7e6   :  { %v2893_v57 = vadd.f32 %v6794_v10, %v8049_v30  ;;  %v2698_v3 = vpop.f32.mrb[47].mxu1  ;;  %v2887_v48 = vpop.f32.mrb[47].mxu0  ;;  %v2704_v49 = vadd.f32 %v6780_v52, %v8260_v45  ;;  %v8486_v52 = vadd.f32 %v8285_v5, %v2593_v54 }
 0x7e7   :  { %v2888_v6 = vadd.f32 %v8049_v30, %v2887_v48  ;;  %v2699_v9 = vadd.f32 %v8260_v45, %v2698_v3  ;;  %v8456_v30 = vadd.f32 %v8107_v22, %v8065_v43  ;;  %v6074_v19 = vmul.f32 -1.442695, %v2896_v59 }
 0x7e8   :  { %2934 = vrot.lane.b32.xlu1 %v2893_v57, %s7733_s17  ;;  %v2899_v22 = vadd.f32 %v2893_v57, %v8466_v15  ;;  %v6067_v57 = vmul.f32 -1.442695, %v2708_v46  ;;  %v2710_v16 = vadd.f32 %v2704_v49, %v8483_v25 }
 0x7e9   :  { %2932 = vrot.lane.b32.xlu0 %v2888_v6, %s7733_s17  ;;  %v2897_v58 = vadd.f32 %v2883_v55, %v8456_v30  ;;  %v2898_v14 = vadd.f32 %v2888_v6, %v8470_v53  ;;  %v8478_v55 = vadd.f32 %v8285_v5, %v2583_v18  ;;  %v2709_v3 = vadd.f32 %v2699_v9, %v8486_v52 }
 0x7ea   :  { %v6077_v24 = vmul.f32 -1.442695, %v2899_v22  ;;  %v6069_v48 = vmul.f32 -1.442695, %v2710_v16 }
 0x7eb   :  { %v6075_v63 = vmul.f32 -1.442695, %v2897_v58  ;;  %v2707_v10 = vadd.f32 %v2689_v60, %v8478_v55  ;;  %v6076_v43 = vmul.f32 -1.442695, %v2898_v14  ;;  %v6068_v6 = vmul.f32 -1.442695, %v2709_v3 }
 0x7ec   :  { %2741 = vrot.lane.b32.xlu1 %v2694_v4, %s7733_s17 }
 0x7ed   :  { %2739 = vrot.lane.b32.xlu0 %v2689_v60, %s7733_s17  ;;  %7405 = vpow2.f32 %v6075_v63  ;;  %v6066_v18 = vmul.f32 -1.442695, %v2707_v10 }
 0x7ee   :  { %7407 = vpow2.f32 %v6074_v19 }
 0x7ef   :  { %7409 = vpow2.f32 %v6077_v24 }
 0x7f0   :  { %2745 = vrot.lane.b32.xlu1 %v2704_v49, %s7733_s17  ;;  %7411 = vpow2.f32 %v6076_v43 }
 0x7f1   :  { %2743 = vrot.lane.b32.xlu0 %v2699_v9, %s7733_s17  ;;  %7413 = vpow2.f32 %v6067_v57 }
 0x7f2   :  { %7415 = vpow2.f32 %v6066_v18 }
 0x7f3   :  { %7417 = vpow2.f32 %v6069_v48 }
 0x7f4   :  { %7419 = vpow2.f32 %v6068_v6 }
 0x7f7   :  { %v7406_v4 = vpop.eup %7405 }
 0x7f8   :  { %v7408_v60 = vpop.eup %7407  ;;  %v2913_v50 = vadd.f32 1.0, %v7406_v4 }
 0x7f9   :  { %v7410_v58 = vpop.eup %7409  ;;  %v2912_v54 = vadd.f32 1.0, %v7408_v60 }
 0x7fa   :  { %v7412_v59 = vpop.eup %7411  ;;  %7421 = vrcp.f32 %v2913_v50  ;;  %v2915_v63 = vadd.f32 1.0, %v7410_v58 }
 0x7fb   :  { %v7414_v22 = vpop.eup %7413  ;;  %7423 = vrcp.f32 %v2912_v54  ;;  %v2914_v49 = vadd.f32 1.0, %v7412_v59 }
 0x7fc   :  { %v7416_v19 = vpop.eup %7415  ;;  %v2724_v9 = vadd.f32 1.0, %v7414_v22  ;;  %7425 = vrcp.f32 %v2915_v63 }
 0x7fd   :  { %v7418_v14 = vpop.eup %7417  ;;  %v2723_v46 = vadd.f32 1.0, %v7416_v19  ;;  %7427 = vrcp.f32 %v2914_v49 }
 0x7fe   :  { %v7420_v24 = vpop.eup %7419  ;;  %7429 = vrcp.f32 %v2724_v9  ;;  %v2726_v10 = vadd.f32 1.0, %v7418_v14 }
 0x7ff   :  { %7431 = vrcp.f32 %v2723_v46  ;;  %v2725_v43 = vadd.f32 1.0, %v7420_v24 }
 0x800   :  { %7433 = vrcp.f32 %v2726_v10 }
 0x801   :  { %7435 = vrcp.f32 %v2725_v43 }
 0x804   :  { %v8490_v57 = vpop.eup %7421 }
 0x805   :  { %v8492_v18 = vpop.eup %7423 }
 0x806   :  { %v8497_v4 = vpop.eup %7425 }
 0x807   :  { %v8500_v50 = vpop.eup %7427 }
 0x808   :  { %v8505_v63 = vpop.eup %7429 }
 0x809   :  { %v8508_v49 = vpop.eup %7431 }
 0x80a   :  { %v8513_v46 = vpop.eup %7433 }
 0x80b   :  { %v8516_v10 = vpop.eup %7435 }
 0x856   :  { %v2931_v16 = vpop.permute.xlu1 %2930 }
 0x857   :  { %v2941_v3 = vmul.f32 %v8490_v57, %v2931_v16  ;;  %v2929_v48 = vpop.permute.xlu0 %2928 }
 0x858   :  { %v2940_v6 = vmul.f32 %v8492_v18, %v2929_v48 }
 0x859   :  { %2950 = vrot.lane.b32.xlu1 %v2941_v3, %s7733_s17 }
 0x85a   :  { %v2935_v60 = vpop.permute.xlu1 %2934  ;;  %2948 = vrot.lane.b32.xlu0 %v2940_v6, %s7733_s17 }
 0x85b   :  { %v2943_v58 = vmul.f32 %v8497_v4, %v2935_v60  ;;  %v2933_v54 = vpop.permute.xlu0 %2932 }
 0x85c   :  { %v2942_v59 = vmul.f32 %v8500_v50, %v2933_v54 }
 0x85d   :  { %2954 = vrot.lane.b32.xlu1 %v2943_v58, %s7733_s17 }
 0x85e   :  { %v2742_v22 = vpop.permute.xlu1 %2741  ;;  %2952 = vrot.lane.b32.xlu0 %v2942_v59, %s7733_s17 }
 0x85f   :  { %v2752_v19 = vmul.f32 %v8505_v63, %v2742_v22  ;;  %v2740_v9 = vpop.permute.xlu0 %2739 }
 0x860   :  { %v2751_v14 = vmul.f32 %v8508_v49, %v2740_v9 }
 0x861   :  { %2761 = vrot.lane.b32.xlu1 %v2752_v19, %s7733_s17 }
 0x862   :  { %v2746_v24 = vpop.permute.xlu1 %2745  ;;  %2759 = vrot.lane.b32.xlu0 %v2751_v14, %s7733_s17 }
 0x863   :  { %v2754_v43 = vmul.f32 %v8513_v46, %v2746_v24  ;;  %v2744_v16 = vpop.permute.xlu0 %2743 }
 0x864   :  { %v2753_v3 = vmul.f32 %v8516_v10, %v2744_v16 }
 0x865   :  { %2765 = vrot.lane.b32.xlu1 %v2754_v43, %s7733_s17 }
 0x866   :  { %2763 = vrot.lane.b32.xlu0 %v2753_v3, %s7733_s17 }
 0x8cb   :  { %v2951_v48 = vpop.permute.xlu1 %2950 }
 0x8cc   :  { %v2961_v6 = vadd.f32 %v2951_v48, %v8456_v30  ;;  %v2949_v60 = vpop.permute.xlu0 %2948 }
 0x8cd   :  { %v2960_v58 = vadd.f32 %v2949_v60, %v8460_v47  ;;  %v2969_v60 = vsub.f32 1.0, %v8490_v57 }
 0x8ce   :  { %7437 = vtanh.f32 %v2961_v6 }
 0x8cf   :  { %7439 = vtanh.f32 %v2960_v58  ;;  %v2955_v54 = vpop.permute.xlu1 %2954 }
 0x8d0   :  { %v2963_v59 = vadd.f32 %v2955_v54, %v8466_v15  ;;  %v2953_v22 = vpop.permute.xlu0 %2952  ;;  %v2968_v54 = vsub.f32 1.0, %v8492_v18 }
 0x8d1   :  { %v2962_v19 = vadd.f32 %v2953_v22, %v8470_v53 }
 0x8d2   :  { %7441 = vtanh.f32 %v2963_v59  ;;  %v2993_v59 = vmul.f32 %v8490_v57, %v8368_v0 }
 0x8d3   :  { %7443 = vtanh.f32 %v2962_v19  ;;  %v2762_v9 = vpop.permute.xlu1 %2761 }
 0x8d4   :  { %v2772_v14 = vadd.f32 %v2762_v9, %v8475_v23  ;;  %v2760_v24 = vpop.permute.xlu0 %2759  ;;  %v2992_v9 = vmul.f32 %v8492_v18, %v8371_v21  ;;  %v2994_v21 = vmul.f32 %v8500_v50, %v8385_v42 }
 0x8d5   :  { %v2771_v43 = vadd.f32 %v2760_v24, %v8478_v55 }
 0x8d6   :  { %7445 = vtanh.f32 %v2772_v14 }
 0x8d7   :  { %7447 = vtanh.f32 %v2771_v43  ;;  %v2766_v30 = vpop.permute.xlu1 %2765  ;;  %v2971_v43 = vsub.f32 1.0, %v8497_v4 }
 0x8d8   :  { %v7438_v47 = vpop.eup %7437  ;;  %v2774_v16 = vadd.f32 %v2766_v30, %v8483_v25  ;;  %v2764_v3 = vpop.permute.xlu0 %2763 }
 0x8d9   :  { %v7440_v48 = vpop.eup %7439  ;;  %v2773_v15 = vadd.f32 %v2764_v3, %v8486_v52  ;;  %2978 = vrot.lane.b32.xlu1 %v7438_v47, %s7734_s15  ;;  %v2995_v3 = vmul.f32 %v8497_v4, %v8382_v11  ;;  %v2779_v11 = vsub.f32 1.0, %v8508_v49  ;;  %v2804_v4 = vmul.f32 %v8505_v63, %v8394_v13 }
 0x8da   :  { %7449 = vtanh.f32 %v2774_v16  ;;  %2976 = vrot.lane.b32.xlu0 %v7440_v48, %s7734_s15  ;;  %v2970_v16 = vsub.f32 1.0, %v8500_v50  ;;  %v2803_v50 = vmul.f32 %v8508_v49, %v8397_v7  ;;  %v2781_v13 = vsub.f32 1.0, %v8516_v10 }
 0x8db   :  { %7451 = vtanh.f32 %v2773_v15  ;;  %v2780_v15 = vsub.f32 1.0, %v8505_v63  ;;  %v2806_v63 = vmul.f32 %v8513_v46, %v8406_v12  ;;  %v2805_v49 = vmul.f32 %v8516_v10, %v8408_v61 }
 0x8dc   :  { %v7442_v53 = vpop.eup %7441 }
 0x8dd   :  { %v7444_v23 = vpop.eup %7443  ;;  %2982 = vrot.lane.b32.xlu1 %v7442_v53, %s7734_s15 }
 0x8de   :  { %2980 = vrot.lane.b32.xlu0 %v7444_v23, %s7734_s15 }
 0x8e0   :  { %v7446_v55 = vpop.eup %7445 }
 0x8e1   :  { %v7448_v6 = vpop.eup %7447  ;;  %2789 = vrot.lane.b32.xlu1 %v7446_v55, %s7734_s15 }
 0x8e2   :  { %2787 = vrot.lane.b32.xlu0 %v7448_v6, %s7734_s15 }
 0x8e4   :  { %v7450_v25 = vpop.eup %7449 }
 0x8e5   :  { %v7452_v52 = vpop.eup %7451  ;;  %2793 = vrot.lane.b32.xlu1 %v7450_v25, %s7734_s15 }
 0x8e6   :  { %2791 = vrot.lane.b32.xlu0 %v7452_v52, %s7734_s15  ;;  %v2782_v52 = vsub.f32 1.0, %v8513_v46 }
 0x94b   :  { %v2979_v58 = vpop.permute.xlu1 %2978 }
 0x94c   :  { %v2989_v22 = vmul.f32 %v2979_v58, %v2969_v60  ;;  %v2977_v19 = vpop.permute.xlu0 %2976 }
 0x94d   :  { %v2988_v14 = vmul.f32 %v2977_v19, %v2968_v54 }
 0x94e   :  { %v8544_v24 = vadd.f32 %v2993_v59, %v2989_v22 }
 0x94f   :  { %v8547_v30 = vadd.f32 %v2992_v9, %v2988_v14  ;;  %v2983_v47 = vpop.permute.xlu1 %2982 }
 0x950   :  { %v2991_v48 = vmul.f32 %v2983_v47, %v2971_v43  ;;  %3006 = vrot.lane.b32.xlu1 %v8544_v24, %s7734_s15  ;;  %v2981_v0 = vpop.permute.xlu0 %2980 }
 0x951   :  { %v2990_v57 = vmul.f32 %v2981_v0, %v2970_v16  ;;  %3004 = vrot.lane.b32.xlu0 %v8547_v30, %s7734_s15 }
 0x952   :  { %v8558_v18 = vadd.f32 %v2995_v3, %v2991_v48 }
 0x953   :  { %v8561_v53 = vadd.f32 %v2994_v21, %v2990_v57  ;;  %v2790_v23 = vpop.permute.xlu1 %2789 }
 0x954   :  { %v2800_v55 = vmul.f32 %v2790_v23, %v2780_v15  ;;  %3010 = vrot.lane.b32.xlu1 %v8558_v18, %s7734_s15  ;;  %v2788_v42 = vpop.permute.xlu0 %2787 }
 0x955   :  { %v2799_v6 = vmul.f32 %v2788_v42, %v2779_v11  ;;  %3008 = vrot.lane.b32.xlu0 %v8561_v53, %s7734_s15 }
 0x956   :  { %v8572_v25 = vadd.f32 %v2804_v4, %v2800_v55 }
 0x957   :  { %v8575_v60 = vadd.f32 %v2803_v50, %v2799_v6  ;;  %v2794_v58 = vpop.permute.xlu1 %2793  ;;  %v8625_v50 = vld [vmem:[%s9593_s7] ss:$0 sm:$0xff] }
 0x958   :  { %v2802_v54 = vmul.f32 %v2794_v58, %v2782_v52  ;;  %3111 = vrot.lane.b32.xlu1 %v8572_v25, %s7734_s15  ;;  %v2792_v7 = vpop.permute.xlu0 %2791 }
 0x959   :  { %v2801_v59 = vmul.f32 %v2792_v7, %v2781_v13  ;;  %3109 = vrot.lane.b32.xlu0 %v8575_v60, %s7734_s15 }
 0x95a   :  { %v8586_v22 = vadd.f32 %v2806_v63, %v2802_v54 }
 0x95b   :  { %v8588_v19 = vadd.f32 %v2805_v49, %v2801_v59 }
 0x95c   :  { %3115 = vrot.lane.b32.xlu1 %v8586_v22, %s7734_s15 }
 0x95d   :  { %3113 = vrot.lane.b32.xlu0 %v8588_v19, %s7734_s15 }
 0x9c2   :  { %v3007_v12 = vpop.permute.xlu1 %3006 }
 0x9c3   :  { %v3005_v46 = vpop.permute.xlu0 %3004 }
 0x9c4   :  { %6803 = vmatprep.mubr.msk.f32.mxu1 %vm107_vm0, %v3005_v46 }
 0x9c5   :  { %6804 = vmatmul.mubr.msk.f32.vlgmr.msra.gmra.mrb[48].mxu1 %vm107_vm0, %v3007_v12 }
 0x9c6   :  { %v3011_v61 = vpop.permute.xlu1 %3010  ;;  %7194 = vmatpush3.bf16.msra.mxu1 %v7925_v44 }
 0x9c7   :  { %v3009_v10 = vpop.permute.xlu0 %3008  ;;  %7196 = vmatprep.subr.bf16.mxu1 %v7940_v51 }
 0x9c8   :  { %6806 = vmatprep.mubr.msk.f32.mxu1 %vm107_vm0, %v3009_v10 }
 0x9c9   :  { %6807 = vmatmul.mubr.msk.f32.gmra.mrb[50].mxu1 %vm107_vm0, %v3011_v61 }
 0x9ca   :  { %v3112_v9 = vpop.permute.xlu1 %3111  ;;  %7198 = vmatpush3.bf16.msra.mxu1 %v7940_v51  ;;  %6831 = vmatprep.mubr.msk.f32.mxu1 %vm107_vm0, %v3005_v46 }
 0x9cb   :  { %v3110_v14 = vpop.permute.xlu0 %3109  ;;  %7208 = vmatprep.subr.bf16.mxu1 %v8179_v1 }
 0x9cc   :  { %6817 = vmatprep.mubr.msk.f32.mxu0 %vm107_vm0, %v3110_v14 }
 0x9cd   :  { %6818 = vmatmul.mubr.msk.f32.vlgmr.msra.gmra.mrb[48].mxu0 %vm107_vm0, %v3112_v9  ;;  %6832 = vmatmul.mubr.msk.f32.vlgmr.msra.gmra.mrb[52].mxu1 %vm107_vm0, %v3007_v12 }
 0x9ce   :  { %6834 = vmatprep.mubr.msk.f32.mxu1 %vm107_vm0, %v3009_v10  ;;  %7210 = vmatpush3.bf16.msra.mxu1 %v8179_v1  ;;  %v3116_v47 = vpop.permute.xlu1 %3115  ;;  %v8650_v10 = vld [vmem:[%s9594_s6] ss:$0 sm:$0xff] }
 0x9cf   :  { %v3114_v43 = vpop.permute.xlu0 %3113  ;;  %7212 = vmatprep.subr.bf16.mxu1 %v8191_v8  ;;  %7202 = vmatpush3.bf16.msra.mxu0 %v8168_v62  ;;  %v8658_v9 = vadd.f32 %v8650_v10, %v8117_v27 }
 0x9d0   :  { %6820 = vmatprep.mubr.msk.f32.mxu0 %vm107_vm0, %v3114_v43  ;;  %7204 = vmatprep.subr.bf16.mxu0 %v8181_v2 }
 0x9d1   :  { %6821 = vmatmul.mubr.msk.f32.gmra.mrb[50].mxu0 %vm107_vm0, %v3116_v47  ;;  %6835 = vmatmul.mubr.msk.f32.gmra.mrb[54].mxu1 %vm107_vm0, %v3011_v61 }
 0x9d2   :  { %7214 = vmatpush3.bf16.msra.mxu1 %v8191_v8 }
 0x9d3   :  { %7206 = vmatpush3.bf16.msra.mxu0 %v8181_v2  ;;  %7224 = vmatprep.subr.bf16.mxu1 %v8168_v62 }
 0x9d4   :  { %7216 = vmatprep.subr.bf16.mxu0 %v7925_v44 }
 0xa98   :  { %v6805_v16 = vpop.f32.mrb[48].mxu1 }
 0xa99   :  { %v3086_v3 = vpop.f32.mrb[49].mxu1  ;;  %v8640_v59 = vadd.f32 %v6805_v16, %v8285_v5 }
 0xa9a   :  { %v8643_v12 = vadd.f32 %v8285_v5, %v3086_v3  ;;  %v8664_v3 = vadd.f32 %v8650_v10, %v8119_v28 }
 0xa9c   :  { %v6808_v48 = vpop.f32.mrb[50].mxu1 }
 0xa9d   :  { %v3096_v0 = vpop.f32.mrb[51].mxu1 }
 0xaa0   :  { %v6819_v21 = vpop.f32.mrb[48].mxu0  ;;  %v6833_v57 = vpop.f32.mrb[52].mxu1 }
 0xaa1   :  { %v3197_v15 = vadd.f32 %v6819_v21, %v8260_v45  ;;  %v3191_v23 = vpop.f32.mrb[49].mxu0  ;;  %v3380_v11 = vpop.f32.mrb[53].mxu1  ;;  %v3386_v6 = vadd.f32 %v8625_v50, %v6833_v57  ;;  %v8668_v21 = vadd.f32 %v8650_v10, %v8121_v17 }
 0xaa2   :  { %v3192_v4 = vadd.f32 %v8260_v45, %v3191_v23  ;;  %v3381_v13 = vadd.f32 %v8625_v50, %v3380_v11  ;;  %v8673_v23 = vadd.f32 %v6808_v48, %v8285_v5  ;;  %v8676_v11 = vadd.f32 %v8285_v5, %v3096_v0 }
 0xaa3   :  { %3244 = vrot.lane.b32.xlu1 %v3197_v15, %s7733_s17  ;;  %v3211_v46 = vadd.f32 %v3197_v15, %v8640_v59 }
 0xaa4   :  { %v6836_v55 = vpop.f32.mrb[54].mxu1  ;;  %3242 = vrot.lane.b32.xlu0 %v3192_v4, %s7733_s17  ;;  %v6822_v42 = vpop.f32.mrb[50].mxu0  ;;  %v3210_v61 = vadd.f32 %v3192_v4, %v8643_v12  ;;  %v3399_v16 = vadd.f32 %v3381_v13, %v8658_v9 }
 0xaa5   :  { %v3201_v52 = vpop.f32.mrb[51].mxu0  ;;  %v3390_v58 = vpop.f32.mrb[55].mxu1  ;;  %v3396_v63 = vadd.f32 %v8625_v50, %v6836_v55  ;;  %v3207_v7 = vadd.f32 %v6822_v42, %v8260_v45  ;;  %v6087_v14 = vmul.f32 -1.442695, %v3211_v46 }
 0xaa6   :  { %v3391_v54 = vadd.f32 %v8625_v50, %v3390_v58  ;;  %v3202_v49 = vadd.f32 %v8260_v45, %v3201_v52  ;;  %v8654_v45 = vadd.f32 %v8650_v10, %v8115_v26  ;;  %v6086_v47 = vmul.f32 -1.442695, %v3210_v61 }
 0xaa7   :  { %3433 = vrot.lane.b32.xlu1 %v3386_v6, %s7733_s17  ;;  %7453 = vpow2.f32 %v6087_v14  ;;  %v3402_v57 = vadd.f32 %v3396_v63, %v8664_v3  ;;  %v6094_v27 = vmul.f32 -1.442695, %v3399_v16  ;;  %v3213_v4 = vadd.f32 %v3207_v7, %v8673_v23 }
 0xaa8   :  { %3431 = vrot.lane.b32.xlu0 %v3381_v13, %s7733_s17  ;;  %v3400_v43 = vadd.f32 %v3386_v6, %v8654_v45  ;;  %7455 = vpow2.f32 %v6086_v47  ;;  %v3401_v15 = vadd.f32 %v3391_v54, %v8668_v21  ;;  %v3212_v17 = vadd.f32 %v3202_v49, %v8676_v11 }
 0xaa9   :  { %v6097_v28 = vmul.f32 -1.442695, %v3402_v57  ;;  %v6089_v42 = vmul.f32 -1.442695, %v3213_v4 }
 0xaaa   :  { %v6095_v26 = vmul.f32 -1.442695, %v3400_v43  ;;  %v6096_v55 = vmul.f32 -1.442695, %v3401_v15  ;;  %v6088_v6 = vmul.f32 -1.442695, %v3212_v17 }
 0xaab   :  { %3437 = vrot.lane.b32.xlu1 %v3396_v63, %s7733_s17 }
 0xaac   :  { %3435 = vrot.lane.b32.xlu0 %v3391_v54, %s7733_s17  ;;  %7457 = vpow2.f32 %v6095_v26 }
 0xaad   :  { %7459 = vpow2.f32 %v6094_v27 }
 0xaae   :  { %7461 = vpow2.f32 %v6097_v28 }
 0xaaf   :  { %3248 = vrot.lane.b32.xlu1 %v3207_v7, %s7733_s17  ;;  %7463 = vpow2.f32 %v6096_v55 }
 0xab0   :  { %3246 = vrot.lane.b32.xlu0 %v3202_v49, %s7733_s17  ;;  %7465 = vpow2.f32 %v6089_v42 }
 0xab1   :  { %v7454_v52 = vpop.eup %7453  ;;  %7467 = vpow2.f32 %v6088_v6 }
 0xab2   :  { %v7456_v58 = vpop.eup %7455  ;;  %v3227_v48 = vadd.f32 1.0, %v7454_v52 }
 0xab3   :  { %v3226_v5 = vadd.f32 1.0, %v7456_v58 }
 0xab4   :  { %7469 = vrcp.f32 %v3227_v48 }
 0xab5   :  { %7471 = vrcp.f32 %v3226_v5 }
 0xab6   :  { %v7458_v13 = vpop.eup %7457 }
 0xab7   :  { %v7460_v0 = vpop.eup %7459  ;;  %v3416_v63 = vadd.f32 1.0, %v7458_v13 }
 0xab8   :  { %v7462_v54 = vpop.eup %7461  ;;  %v3415_v7 = vadd.f32 1.0, %v7460_v0 }
 0xab9   :  { %v7464_v46 = vpop.eup %7463  ;;  %7473 = vrcp.f32 %v3416_v63  ;;  %v3418_v49 = vadd.f32 1.0, %v7462_v54 }
 0xaba   :  { %v7466_v61 = vpop.eup %7465  ;;  %7475 = vrcp.f32 %v3415_v7  ;;  %v3417_v14 = vadd.f32 1.0, %v7464_v46 }
 0xabb   :  { %v7468_v43 = vpop.eup %7467  ;;  %7477 = vrcp.f32 %v3418_v49  ;;  %v3229_v47 = vadd.f32 1.0, %v7466_v61 }
 0xabc   :  { %v3228_v16 = vadd.f32 1.0, %v7468_v43  ;;  %7479 = vrcp.f32 %v3417_v14 }
 0xabd   :  { %7481 = vrcp.f32 %v3229_v47 }
 0xabe   :  { %v8680_v26 = vpop.eup %7469  ;;  %7483 = vrcp.f32 %v3228_v16 }
 0xabf   :  { %v8682_v27 = vpop.eup %7471 }
 0xac3   :  { %v8687_v17 = vpop.eup %7473 }
 0xac4   :  { %v8690_v42 = vpop.eup %7475 }
 0xac5   :  { %v8695_v48 = vpop.eup %7477 }
 0xac6   :  { %v8698_v5 = vpop.eup %7479 }
 0xac7   :  { %v8703_v7 = vpop.eup %7481 }
 0xac8   :  { %v8706_v49 = vpop.eup %7483 }
 0xb15   :  { %v3245_v57 = vpop.permute.xlu1 %3244 }
 0xb16   :  { %v3255_v15 = vmul.f32 %v8680_v26, %v3245_v57  ;;  %v3243_v28 = vpop.permute.xlu0 %3242 }
 0xb17   :  { %v3254_v4 = vmul.f32 %v8682_v27, %v3243_v28 }
 0xb18   :  { %3264 = vrot.lane.b32.xlu1 %v3255_v15, %s7733_s17 }
 0xb19   :  { %v3434_v55 = vpop.permute.xlu1 %3433  ;;  %3262 = vrot.lane.b32.xlu0 %v3254_v4, %s7733_s17 }
 0xb1a   :  { %v3444_v6 = vmul.f32 %v8687_v17, %v3434_v55  ;;  %v3432_v52 = vpop.permute.xlu0 %3431 }
 0xb1b   :  { %v3443_v58 = vmul.f32 %v8690_v42, %v3432_v52 }
 0xb1c   :  { %3453 = vrot.lane.b32.xlu1 %v3444_v6, %s7733_s17 }
 0xb1d   :  { %v3438_v13 = vpop.permute.xlu1 %3437  ;;  %3451 = vrot.lane.b32.xlu0 %v3443_v58, %s7733_s17 }
 0xb1e   :  { %v3446_v0 = vmul.f32 %v8695_v48, %v3438_v13  ;;  %v3436_v63 = vpop.permute.xlu0 %3435 }
 0xb1f   :  { %v3445_v54 = vmul.f32 %v8698_v5, %v3436_v63 }
 0xb20   :  { %3457 = vrot.lane.b32.xlu1 %v3446_v0, %s7733_s17 }
 0xb21   :  { %v3249_v46 = vpop.permute.xlu1 %3248  ;;  %3455 = vrot.lane.b32.xlu0 %v3445_v54, %s7733_s17 }
 0xb22   :  { %v3257_v61 = vmul.f32 %v8703_v7, %v3249_v46  ;;  %v3247_v14 = vpop.permute.xlu0 %3246 }
 0xb23   :  { %v3256_v43 = vmul.f32 %v8706_v49, %v3247_v14  ;;  %v3283_v14 = vsub.f32 1.0, %v8680_v26 }
 0xb24   :  { %3268 = vrot.lane.b32.xlu1 %v3257_v61, %s7733_s17 }
 0xb25   :  { %3266 = vrot.lane.b32.xlu0 %v3256_v43, %s7733_s17 }
 0xb8a   :  { %v3265_v47 = vpop.permute.xlu1 %3264 }
 0xb8b   :  { %v3275_v16 = vadd.f32 %v3265_v47, %v8640_v59  ;;  %v3263_v57 = vpop.permute.xlu0 %3262  ;;  %v3282_v47 = vsub.f32 1.0, %v8682_v27 }
 0xb8c   :  { %v3274_v15 = vadd.f32 %v3263_v57, %v8643_v12 }
 0xb8d   :  { %7485 = vtanh.f32 %v3275_v16  ;;  %v3307_v16 = vmul.f32 %v8680_v26, %v8572_v25 }
 0xb8e   :  { %7487 = vtanh.f32 %v3274_v15  ;;  %v3454_v28 = vpop.permute.xlu1 %3453 }
 0xb8f   :  { %v3464_v4 = vadd.f32 %v3454_v28, %v8654_v45  ;;  %v3452_v55 = vpop.permute.xlu0 %3451  ;;  %v3306_v28 = vmul.f32 %v8682_v27, %v8575_v60  ;;  %v3495_v60 = vmul.f32 %v8690_v42, %v8547_v30 }
 0xb90   :  { %v3463_v6 = vadd.f32 %v3452_v55, %v8658_v9 }
 0xb91   :  { %7489 = vtanh.f32 %v3464_v4 }
 0xb92   :  { %7491 = vtanh.f32 %v3463_v6  ;;  %v3458_v52 = vpop.permute.xlu1 %3457  ;;  %v3472_v6 = vsub.f32 1.0, %v8687_v17 }
 0xb93   :  { %v3466_v58 = vadd.f32 %v3458_v52, %v8664_v3  ;;  %v3456_v13 = vpop.permute.xlu0 %3455 }
 0xb94   :  { %v3465_v0 = vadd.f32 %v3456_v13, %v8668_v21  ;;  %v3471_v13 = vsub.f32 1.0, %v8690_v42  ;;  %v3497_v42 = vmul.f32 %v8698_v5, %v8561_v53 }
 0xb95   :  { %7493 = vtanh.f32 %v3466_v58 }
 0xb96   :  { %7495 = vtanh.f32 %v3465_v0  ;;  %v3269_v59 = vpop.permute.xlu1 %3268  ;;  %v3496_v0 = vmul.f32 %v8687_v17, %v8544_v24  ;;  %v3473_v24 = vsub.f32 1.0, %v8698_v5  ;;  %v3498_v17 = vmul.f32 %v8695_v48, %v8558_v18 }
 0xb97   :  { %v7486_v12 = vpop.eup %7485  ;;  %v3277_v63 = vadd.f32 %v3269_v59, %v8673_v23  ;;  %v3267_v54 = vpop.permute.xlu0 %3266  ;;  %v3284_v18 = vsub.f32 1.0, %v8706_v49  ;;  %v3308_v5 = vmul.f32 %v8706_v49, %v8588_v19 }
 0xb98   :  { %v7488_v46 = vpop.eup %7487  ;;  %v3276_v45 = vadd.f32 %v3267_v54, %v8676_v11  ;;  %3292 = vrot.lane.b32.xlu1 %v7486_v12, %s7734_s15  ;;  %v3474_v12 = vsub.f32 1.0, %v8695_v48  ;;  %v3309_v48 = vmul.f32 %v8703_v7, %v8586_v22 }
 0xb99   :  { %7497 = vtanh.f32 %v3277_v63  ;;  %3290 = vrot.lane.b32.xlu0 %v7488_v46, %s7734_s15 }
 0xb9a   :  { %7499 = vtanh.f32 %v3276_v45 }
 0xb9b   :  { %v7490_v9 = vpop.eup %7489 }
 0xb9c   :  { %v7492_v3 = vpop.eup %7491  ;;  %3481 = vrot.lane.b32.xlu1 %v7490_v9, %s7734_s15 }
 0xb9d   :  { %3479 = vrot.lane.b32.xlu0 %v7492_v3, %s7734_s15  ;;  %v3285_v3 = vsub.f32 1.0, %v8703_v7 }
 0xb9f   :  { %v7494_v21 = vpop.eup %7493 }
 0xba0   :  { %v7496_v61 = vpop.eup %7495  ;;  %3485 = vrot.lane.b32.xlu1 %v7494_v21, %s7734_s15 }
 0xba1   :  { %3483 = vrot.lane.b32.xlu0 %v7496_v61, %s7734_s15 }
 0xba3   :  { %v7498_v23 = vpop.eup %7497 }
 0xba4   :  { %v7500_v11 = vpop.eup %7499  ;;  %3296 = vrot.lane.b32.xlu1 %v7498_v23, %s7734_s15 }
 0xba5   :  { %3294 = vrot.lane.b32.xlu0 %v7500_v11, %s7734_s15 }
 0xc0a   :  { %v3293_v43 = vpop.permute.xlu1 %3292 }
 0xc0b   :  { %v3303_v57 = vmul.f32 %v3293_v43, %v3283_v14  ;;  %v3291_v15 = vpop.permute.xlu0 %3290 }
 0xc0c   :  { %v3302_v4 = vmul.f32 %v3291_v15, %v3282_v47 }
 0xc0d   :  { %v8734_v55 = vadd.f32 %v3307_v16, %v3303_v57 }
 0xc0e   :  { %v8737_v52 = vadd.f32 %v3306_v28, %v3302_v4  ;;  %v3482_v58 = vpop.permute.xlu1 %3481  ;;  %v8811_v4 = vld [vmem:[%s9597_s11] ss:$0 sm:$0xff] }
 0xc0f   :  { %v3492_v59 = vmul.f32 %v3482_v58, %v3472_v6  ;;  %3614 = vrot.lane.b32.xlu1 %v8734_v55, %s7734_s15  ;;  %v3480_v25 = vpop.permute.xlu0 %3479 }
 0xc10   :  { %v3491_v26 = vmul.f32 %v3480_v25, %v3471_v13  ;;  %3612 = vrot.lane.b32.xlu0 %v8737_v52, %s7734_s15 }
 0xc11   :  { %v8748_v27 = vadd.f32 %v3496_v0, %v3492_v59 }
 0xc12   :  { %v8751_v63 = vadd.f32 %v3495_v60, %v3491_v26  ;;  %v3486_v54 = vpop.permute.xlu1 %3485 }
 0xc13   :  { %v3494_v46 = vmul.f32 %v3486_v54, %v3474_v12  ;;  %3509 = vrot.lane.b32.xlu1 %v8748_v27, %s7734_s15  ;;  %v3484_v30 = vpop.permute.xlu0 %3483 }
 0xc14   :  { %v3493_v45 = vmul.f32 %v3484_v30, %v3473_v24  ;;  %3507 = vrot.lane.b32.xlu0 %v8751_v63, %s7734_s15 }
 0xc15   :  { %v8762_v9 = vadd.f32 %v3498_v17, %v3494_v46 }
 0xc16   :  { %v8765_v21 = vadd.f32 %v3497_v42, %v3493_v45  ;;  %v3297_v61 = vpop.permute.xlu1 %3296 }
 0xc17   :  { %v3305_v23 = vmul.f32 %v3297_v61, %v3285_v3  ;;  %3513 = vrot.lane.b32.xlu1 %v8762_v9, %s7734_s15  ;;  %v3295_v53 = vpop.permute.xlu0 %3294 }
 0xc18   :  { %v3304_v11 = vmul.f32 %v3295_v53, %v3284_v18  ;;  %3511 = vrot.lane.b32.xlu0 %v8765_v21, %s7734_s15 }
 0xc19   :  { %v8776_v14 = vadd.f32 %v3309_v48, %v3305_v23  ;;  %v8832_v48 = vld [vmem:[%s9598_s10] ss:$0 sm:$0xff] }
 0xc1a   :  { %v8778_v43 = vadd.f32 %v3308_v5, %v3304_v11 }
 0xc1b   :  { %3618 = vrot.lane.b32.xlu1 %v8776_v14, %s7734_s15 }
 0xc1c   :  { %3616 = vrot.lane.b32.xlu0 %v8778_v43, %s7734_s15 }
 0xc81   :  { %v3615_v22 = vpop.permute.xlu1 %3614 }
 0xc82   :  { %v3613_v7 = vpop.permute.xlu0 %3612 }
 0xc83   :  { %6859 = vmatprep.mubr.msk.f32.mxu1 %vm107_vm0, %v3613_v7 }
 0xc84   :  { %6860 = vmatmul.mubr.msk.f32.vlgmr.msra.gmra.mrb[56].mxu1 %vm107_vm0, %v3615_v22 }
 0xc85   :  { %v3510_v19 = vpop.permute.xlu1 %3509  ;;  %7226 = vmatpush3.bf16.msra.mxu1 %v8168_v62 }
 0xc86   :  { %v3508_v49 = vpop.permute.xlu0 %3507  ;;  %7228 = vmatprep.subr.bf16.mxu1 %v8181_v2 }
 0xc87   :  { %6845 = vmatprep.mubr.msk.f32.mxu0 %vm107_vm0, %v3508_v49 }
 0xc88   :  { %6846 = vmatmul.mubr.msk.f32.vlgmr.msra.gmra.mrb[52].mxu0 %vm107_vm0, %v3510_v19 }
 0xc89   :  { %v3514_v47 = vpop.permute.xlu1 %3513  ;;  %7218 = vmatpush3.bf16.msra.mxu0 %v7925_v44  ;;  %7230 = vmatpush3.bf16.msra.mxu1 %v8181_v2 }
 0xc8a   :  { %v3512_v16 = vpop.permute.xlu0 %3511  ;;  %7220 = vmatprep.subr.bf16.mxu0 %v7940_v51  ;;  %7240 = vmatprep.subr.bf16.mxu1 %v7925_v44 }
 0xc8b   :  { %6848 = vmatprep.mubr.msk.f32.mxu0 %vm107_vm0, %v3512_v16 }
 0xc8c   :  { %6849 = vmatmul.mubr.msk.f32.gmra.mrb[54].mxu0 %vm107_vm0, %v3514_v47 }
 0xc8d   :  { %7222 = vmatpush3.bf16.msra.mxu0 %v7940_v51  ;;  %6873 = vmatprep.mubr.msk.f32.mxu0 %vm107_vm0, %v3508_v49  ;;  %v3619_v15 = vpop.permute.xlu1 %3618 }
 0xc8e   :  { %v3617_v57 = vpop.permute.xlu0 %3616  ;;  %7232 = vmatprep.subr.bf16.mxu0 %v8179_v1 }
 0xc8f   :  { %6862 = vmatprep.mubr.msk.f32.mxu1 %vm107_vm0, %v3617_v57 }
 0xc90   :  { %6863 = vmatmul.mubr.msk.f32.gmra.mrb[58].mxu1 %vm107_vm0, %v3619_v15  ;;  %6874 = vmatmul.mubr.msk.f32.vlgmr.msra.gmra.mrb[56].mxu0 %vm107_vm0, %v3510_v19  ;;  %v8856_v15 = vadd.f32 %v8650_v10, %v8125_v31 }
 0xc91   :  { %6876 = vmatprep.mubr.msk.f32.mxu0 %vm107_vm0, %v3512_v16  ;;  %7234 = vmatpush3.bf16.msra.mxu0 %v8179_v1  ;;  %v8851_v16 = vadd.f32 %v8650_v10, %v8123_v29  ;;  %v8866_v29 = vadd.f32 %v8650_v10, %v8129_v33 }
 0xc92   :  { %7236 = vmatprep.subr.bf16.mxu0 %v8191_v8 }
 0xc94   :  { %6877 = vmatmul.mubr.msk.f32.gmra.mrb[58].mxu0 %vm107_vm0, %v3514_v47 }
 0xc95   :  { %7238 = vmatpush3.bf16.msra.mxu0 %v8191_v8 }
 0xc96   :  { %7248 = vmatprep.subr.bf16.mxu0 %v8168_v62 }
 0xd57   :  { %v6861_v28 = vpop.f32.mrb[56].mxu1 }
 0xd58   :  { %v3700_v6 = vadd.f32 %v8811_v4, %v6861_v28  ;;  %v3694_v58 = vpop.f32.mrb[57].mxu1 }
 0xd59   :  { %v3695_v13 = vadd.f32 %v8811_v4, %v3694_v58 }
 0xd5a   :  { %3747 = vrot.lane.b32.xlu1 %v3700_v6, %s7733_s17 }
 0xd5b   :  { %3745 = vrot.lane.b32.xlu0 %v3695_v13, %s7733_s17  ;;  %v6847_v0 = vpop.f32.mrb[52].mxu0 }
 0xd5c   :  { %v3589_v59 = vpop.f32.mrb[53].mxu0  ;;  %v8835_v23 = vadd.f32 %v8832_v48, %v6847_v0 }
 0xd5d   :  { %v8838_v53 = vadd.f32 %v8832_v48, %v3589_v59  ;;  %v8862_v59 = vadd.f32 %v8650_v10, %v8127_v32 }
 0xd5e   :  { %v3714_v5 = vadd.f32 %v3700_v6, %v8835_v23 }
 0xd5f   :  { %v6850_v25 = vpop.f32.mrb[54].mxu0  ;;  %v3713_v11 = vadd.f32 %v3695_v13, %v8838_v53 }
 0xd60   :  { %v3599_v60 = vpop.f32.mrb[55].mxu0  ;;  %v6107_v22 = vmul.f32 -1.442695, %v3714_v5  ;;  %v8843_v19 = vadd.f32 %v8832_v48, %v6850_v25 }
 0xd61   :  { %v6106_v7 = vmul.f32 -1.442695, %v3713_v11  ;;  %v8846_v49 = vadd.f32 %v8832_v48, %v3599_v60 }
 0xd62   :  { %7501 = vpow2.f32 %v6107_v22 }
 0xd63   :  { %v6864_v26 = vpop.f32.mrb[58].mxu1  ;;  %v6875_v12 = vpop.f32.mrb[56].mxu0  ;;  %7503 = vpow2.f32 %v6106_v7 }
 0xd64   :  { %v3710_v54 = vadd.f32 %v8811_v4, %v6864_v26  ;;  %v3704_v24 = vpop.f32.mrb[59].mxu1  ;;  %v3883_v17 = vpop.f32.mrb[57].mxu0  ;;  %v3889_v42 = vadd.f32 %v8625_v50, %v6875_v12 }
 0xd65   :  { %v3705_v46 = vadd.f32 %v8811_v4, %v3704_v24  ;;  %v3884_v3 = vadd.f32 %v8625_v50, %v3883_v17 }
 0xd66   :  { %3751 = vrot.lane.b32.xlu1 %v3710_v54, %s7733_s17  ;;  %v3716_v47 = vadd.f32 %v3710_v54, %v8843_v19  ;;  %v3903_v28 = vadd.f32 %v3889_v42, %v8851_v16 }
 0xd67   :  { %v6878_v30 = vpop.f32.mrb[58].mxu0  ;;  %3749 = vrot.lane.b32.xlu0 %v3705_v46, %s7733_s17  ;;  %v3715_v57 = vadd.f32 %v3705_v46, %v8846_v49  ;;  %v3902_v58 = vadd.f32 %v3884_v3, %v8856_v15 }
 0xd68   :  { %v3893_v45 = vpop.f32.mrb[59].mxu0  ;;  %v3899_v61 = vadd.f32 %v8625_v50, %v6878_v30  ;;  %v6109_v6 = vmul.f32 -1.442695, %v3716_v47  ;;  %v6115_v60 = vmul.f32 -1.442695, %v3903_v28 }
 0xd69   :  { %v3894_v18 = vadd.f32 %v8625_v50, %v3893_v45  ;;  %v6108_v13 = vmul.f32 -1.442695, %v3715_v57  ;;  %v6114_v31 = vmul.f32 -1.442695, %v3902_v58 }
 0xd6a   :  { %3936 = vrot.lane.b32.xlu1 %v3889_v42, %s7733_s17  ;;  %7505 = vpow2.f32 %v6109_v6  ;;  %v3905_v26 = vadd.f32 %v3899_v61, %v8862_v59 }
 0xd6b   :  { %3934 = vrot.lane.b32.xlu0 %v3884_v3, %s7733_s17  ;;  %7507 = vpow2.f32 %v6108_v13  ;;  %v3904_v54 = vadd.f32 %v3894_v18, %v8866_v29 }
 0xd6c   :  { %v7502_v0 = vpop.eup %7501  ;;  %7509 = vpow2.f32 %v6115_v60  ;;  %v6117_v17 = vmul.f32 -1.442695, %v3905_v26 }
 0xd6d   :  { %v7504_v25 = vpop.eup %7503  ;;  %v3730_v12 = vadd.f32 1.0, %v7502_v0  ;;  %7511 = vpow2.f32 %v6114_v31  ;;  %v6116_v32 = vmul.f32 -1.442695, %v3904_v54 }
 0xd6e   :  { %3940 = vrot.lane.b32.xlu1 %v3899_v61, %s7733_s17  ;;  %v3729_v24 = vadd.f32 1.0, %v7504_v25 }
 0xd6f   :  { %3938 = vrot.lane.b32.xlu0 %v3894_v18, %s7733_s17  ;;  %7513 = vrcp.f32 %v3730_v12 }
 0xd70   :  { %7515 = vrcp.f32 %v3729_v24 }
 0xd71   :  { %7517 = vpow2.f32 %v6117_v17 }
 0xd72   :  { %7519 = vpow2.f32 %v6116_v32 }
 0xd74   :  { %v7506_v33 = vpop.eup %7505 }
 0xd75   :  { %v7508_v46 = vpop.eup %7507  ;;  %v3732_v42 = vadd.f32 1.0, %v7506_v33 }
 0xd76   :  { %v7510_v30 = vpop.eup %7509  ;;  %v3731_v3 = vadd.f32 1.0, %v7508_v46 }
 0xd77   :  { %v7512_v45 = vpop.eup %7511  ;;  %7521 = vrcp.f32 %v3732_v42  ;;  %v3919_v7 = vadd.f32 1.0, %v7510_v30 }
 0xd78   :  { %7523 = vrcp.f32 %v3731_v3  ;;  %v3918_v28 = vadd.f32 1.0, %v7512_v45 }
 0xd79   :  { %v8870_v61 = vpop.eup %7513  ;;  %7525 = vrcp.f32 %v3919_v7 }
 0xd7a   :  { %v8872_v11 = vpop.eup %7515  ;;  %7527 = vrcp.f32 %v3918_v28 }
 0xd7b   :  { %v7518_v57 = vpop.eup %7517 }
 0xd7c   :  { %v7520_v6 = vpop.eup %7519  ;;  %v3921_v58 = vadd.f32 1.0, %v7518_v57 }
 0xd7d   :  { %v3920_v13 = vadd.f32 1.0, %v7520_v6 }
 0xd7e   :  { %7529 = vrcp.f32 %v3921_v58 }
 0xd7f   :  { %7531 = vrcp.f32 %v3920_v13 }
 0xd81   :  { %v8878_v0 = vpop.eup %7521 }
 0xd82   :  { %v8880_v60 = vpop.eup %7523 }
 0xd83   :  { %v8885_v54 = vpop.eup %7525 }
 0xd84   :  { %v8888_v17 = vpop.eup %7527 }
 0xd88   :  { %v8893_v30 = vpop.eup %7529 }
 0xd89   :  { %v8896_v45 = vpop.eup %7531 }
 0xdcc   :  { %v3748_v5 = vpop.permute.xlu1 %3747 }
 0xdcd   :  { %v3758_v18 = vmul.f32 %v8870_v61, %v3748_v5  ;;  %v3746_v22 = vpop.permute.xlu0 %3745 }
 0xdce   :  { %v3757_v47 = vmul.f32 %v8872_v11, %v3746_v22 }
 0xdcf   :  { %3767 = vrot.lane.b32.xlu1 %v3758_v18, %s7733_s17 }
 0xdd0   :  { %3765 = vrot.lane.b32.xlu0 %v3757_v47, %s7733_s17 }
 0xdd8   :  { %v3752_v25 = vpop.permute.xlu1 %3751 }
 0xdd9   :  { %v3760_v31 = vmul.f32 %v8878_v0, %v3752_v25  ;;  %v3750_v26 = vpop.permute.xlu0 %3749 }
 0xdda   :  { %v3759_v12 = vmul.f32 %v8880_v60, %v3750_v26 }
 0xddb   :  { %3771 = vrot.lane.b32.xlu1 %v3760_v31, %s7733_s17 }
 0xddc   :  { %v3937_v24 = vpop.permute.xlu1 %3936  ;;  %3769 = vrot.lane.b32.xlu0 %v3759_v12, %s7733_s17 }
 0xddd   :  { %v3947_v32 = vmul.f32 %v8885_v54, %v3937_v24  ;;  %v3935_v33 = vpop.permute.xlu0 %3934 }
 0xdde   :  { %v3946_v46 = vmul.f32 %v8888_v17, %v3935_v33 }
 0xddf   :  { %3956 = vrot.lane.b32.xlu1 %v3947_v32, %s7733_s17 }
 0xde0   :  { %v3941_v42 = vpop.permute.xlu1 %3940  ;;  %3954 = vrot.lane.b32.xlu0 %v3946_v46, %s7733_s17 }
 0xde1   :  { %v3949_v3 = vmul.f32 %v8893_v30, %v3941_v42  ;;  %v3939_v5 = vpop.permute.xlu0 %3938 }
 0xde2   :  { %v3948_v18 = vmul.f32 %v8896_v45, %v3939_v5  ;;  %v3785_v5 = vsub.f32 1.0, %v8872_v11 }
 0xde3   :  { %3960 = vrot.lane.b32.xlu1 %v3949_v3, %s7733_s17 }
 0xde4   :  { %3958 = vrot.lane.b32.xlu0 %v3948_v18, %s7733_s17  ;;  %v3810_v18 = vmul.f32 %v8870_v61, %v8734_v55  ;;  %v3787_v55 = vsub.f32 1.0, %v8880_v60 }
 0xe41   :  { %v3768_v22 = vpop.permute.xlu1 %3767 }
 0xe42   :  { %v3778_v7 = vadd.f32 %v3768_v22, %v8835_v23  ;;  %v3766_v47 = vpop.permute.xlu0 %3765 }
 0xe43   :  { %v3777_v57 = vadd.f32 %v3766_v47, %v8838_v53  ;;  %v3809_v47 = vmul.f32 %v8872_v11, %v8737_v52 }
 0xe44   :  { %7533 = vtanh.f32 %v3778_v7 }
 0xe45   :  { %7535 = vtanh.f32 %v3777_v57 }
 0xe4d   :  { %v3772_v28 = vpop.permute.xlu1 %3771 }
 0xe4e   :  { %v7534_v6 = vpop.eup %7533  ;;  %v3780_v58 = vadd.f32 %v3772_v28, %v8843_v19  ;;  %v3770_v13 = vpop.permute.xlu0 %3769 }
 0xe4f   :  { %v7536_v25 = vpop.eup %7535  ;;  %v3779_v31 = vadd.f32 %v3770_v13, %v8846_v49  ;;  %3795 = vrot.lane.b32.xlu1 %v7534_v6, %s7734_s15 }
 0xe50   :  { %7537 = vtanh.f32 %v3780_v58  ;;  %3793 = vrot.lane.b32.xlu0 %v7536_v25, %s7734_s15  ;;  %v3788_v58 = vsub.f32 1.0, %v8878_v0  ;;  %v3811_v25 = vmul.f32 %v8880_v60, %v8778_v43  ;;  %v3998_v43 = vmul.f32 %v8888_v17, %v8751_v63 }
 0xe51   :  { %7539 = vtanh.f32 %v3779_v31  ;;  %v3957_v23 = vpop.permute.xlu1 %3956 }
 0xe52   :  { %v3967_v26 = vadd.f32 %v3957_v23, %v8851_v16  ;;  %v3955_v53 = vpop.permute.xlu0 %3954 }
 0xe53   :  { %v3966_v12 = vadd.f32 %v3955_v53, %v8856_v15 }
 0xe54   :  { %7541 = vtanh.f32 %v3967_v26  ;;  %v3975_v26 = vsub.f32 1.0, %v8885_v54 }
 0xe55   :  { %7543 = vtanh.f32 %v3966_v12  ;;  %v3961_v24 = vpop.permute.xlu1 %3960 }
 0xe56   :  { %v3969_v19 = vadd.f32 %v3961_v24, %v8862_v59  ;;  %v3959_v32 = vpop.permute.xlu0 %3958  ;;  %v3786_v59 = vsub.f32 1.0, %v8870_v61  ;;  %v3812_v61 = vmul.f32 %v8878_v0, %v8776_v14  ;;  %v3974_v24 = vsub.f32 1.0, %v8888_v17 }
 0xe57   :  { %v3968_v49 = vadd.f32 %v3959_v32, %v8866_v29  ;;  %v4000_v17 = vmul.f32 %v8896_v45, %v8765_v21 }
 0xe58   :  { %7545 = vtanh.f32 %v3969_v19  ;;  %v3999_v19 = vmul.f32 %v8885_v54, %v8748_v27  ;;  %v3976_v27 = vsub.f32 1.0, %v8896_v45  ;;  %v4001_v54 = vmul.f32 %v8893_v30, %v8762_v9 }
 0xe59   :  { %7547 = vtanh.f32 %v3968_v49  ;;  %v3977_v49 = vsub.f32 1.0, %v8893_v30 }
 0xe5a   :  { %v7538_v33 = vpop.eup %7537 }
 0xe5b   :  { %v7540_v46 = vpop.eup %7539  ;;  %3799 = vrot.lane.b32.xlu1 %v7538_v33, %s7734_s15 }
 0xe5c   :  { %3797 = vrot.lane.b32.xlu0 %v7540_v46, %s7734_s15 }
 0xe5e   :  { %v7542_v16 = vpop.eup %7541 }
 0xe5f   :  { %v7544_v42 = vpop.eup %7543  ;;  %3984 = vrot.lane.b32.xlu1 %v7542_v16, %s7734_s15 }
 0xe60   :  { %3982 = vrot.lane.b32.xlu0 %v7544_v42, %s7734_s15 }
 0xe62   :  { %v7546_v15 = vpop.eup %7545 }
 0xe63   :  { %v7548_v3 = vpop.eup %7547  ;;  %3988 = vrot.lane.b32.xlu1 %v7546_v15, %s7734_s15 }
 0xe64   :  { %3986 = vrot.lane.b32.xlu0 %v7548_v3, %s7734_s15 }
 0xec1   :  { %v3796_v29 = vpop.permute.xlu1 %3795 }
 0xec2   :  { %v3806_v22 = vmul.f32 %v3796_v29, %v3786_v59  ;;  %v3794_v7 = vpop.permute.xlu0 %3793 }
 0xec3   :  { %v3805_v57 = vmul.f32 %v3794_v7, %v3785_v5 }
 0xec4   :  { %v8924_v28 = vadd.f32 %v3810_v18, %v3806_v22 }
 0xec5   :  { %v8926_v6 = vadd.f32 %v3809_v47, %v3805_v57 }
 0xec6   :  { %4117 = vrot.lane.b32.xlu1 %v8924_v28, %s7734_s15 }
 0xec7   :  { %4115 = vrot.lane.b32.xlu0 %v8926_v6, %s7734_s15 }
 0xecd   :  { %v3800_v13 = vpop.permute.xlu1 %3799 }
 0xece   :  { %v3808_v52 = vmul.f32 %v3800_v13, %v3788_v58  ;;  %v3798_v11 = vpop.permute.xlu0 %3797 }
 0xecf   :  { %v3807_v31 = vmul.f32 %v3798_v11, %v3787_v55 }
 0xed0   :  { %v8938_v23 = vadd.f32 %v3812_v61, %v3808_v52 }
 0xed1   :  { %v8941_v53 = vadd.f32 %v3811_v25, %v3807_v31  ;;  %v3985_v12 = vpop.permute.xlu1 %3984 }
 0xed2   :  { %v3995_v32 = vmul.f32 %v3985_v12, %v3975_v26  ;;  %4121 = vrot.lane.b32.xlu1 %v8938_v23, %s7734_s15  ;;  %v3983_v14 = vpop.permute.xlu0 %3982 }
 0xed3   :  { %v3994_v0 = vmul.f32 %v3983_v14, %v3974_v24  ;;  %4119 = vrot.lane.b32.xlu0 %v8941_v53, %s7734_s15 }
 0xed4   :  { %v8952_v60 = vadd.f32 %v3999_v19, %v3995_v32 }
 0xed5   :  { %v8955_v33 = vadd.f32 %v3998_v43, %v3994_v0  ;;  %v3989_v46 = vpop.permute.xlu1 %3988 }
 0xed6   :  { %v3997_v16 = vmul.f32 %v3989_v46, %v3977_v49  ;;  %4012 = vrot.lane.b32.xlu1 %v8952_v60, %s7734_s15  ;;  %v3987_v63 = vpop.permute.xlu0 %3986 }
 0xed7   :  { %v3996_v42 = vmul.f32 %v3987_v63, %v3976_v27  ;;  %4010 = vrot.lane.b32.xlu0 %v8955_v33, %s7734_s15 }
 0xed8   :  { %v8966_v15 = vadd.f32 %v4001_v54, %v3997_v16 }
 0xed9   :  { %v8968_v3 = vadd.f32 %v4000_v17, %v3996_v42 }
 0xeda   :  { %4016 = vrot.lane.b32.xlu1 %v8966_v15, %s7734_s15 }
 0xedb   :  { %4014 = vrot.lane.b32.xlu0 %v8968_v3, %s7734_s15 }
 0xf38   :  { %v4118_v30 = vpop.permute.xlu1 %4117 }
 0xf39   :  { %v4116_v9 = vpop.permute.xlu0 %4115 }
 0xf3a   :  { %6901 = vmatprep.mubr.msk.f32.mxu0 %vm107_vm0, %v4116_v9 }
 0xf3b   :  { %6902 = vmatmul.mubr.msk.f32.vlgmr.msra.gmra.mrb[60].mxu0 %vm107_vm0, %v4118_v30 }
 0xf3c   :  { %7250 = vmatpush3.bf16.msra.mxu0 %v8168_v62 }
 0xf3d   :  { %7252 = vmatprep.subr.bf16.mxu0 %v8181_v2 }
 0xf40   :  { %7254 = vmatpush3.bf16.msra.mxu0 %v8181_v2 }
 0xf41   :  { %7264 = vmatprep.subr.bf16.mxu0 %v7925_v44 }
 0xf44   :  { %v4122_v21 = vpop.permute.xlu1 %4121 }
 0xf45   :  { %v4120_v45 = vpop.permute.xlu0 %4119 }
 0xf46   :  { %6904 = vmatprep.mubr.msk.f32.mxu0 %vm107_vm0, %v4120_v45 }
 0xf47   :  { %6905 = vmatmul.mubr.msk.f32.gmra.mrb[62].mxu0 %vm107_vm0, %v4122_v21 }
 0xf48   :  { %v4013_v59 = vpop.permute.xlu1 %4012 }
 0xf49   :  { %v4011_v29 = vpop.permute.xlu0 %4010 }
 0xf4a   :  { %6887 = vmatprep.mubr.msk.f32.mxu1 %vm107_vm0, %v4011_v29 }
 0xf4b   :  { %6888 = vmatmul.mubr.msk.f32.vlgmr.msra.gmra.mrb[60].mxu1 %vm107_vm0, %v4013_v59 }
 0xf4c   :  { %7242 = vmatpush3.bf16.msra.mxu1 %v7925_v44  ;;  %v4017_v18 = vpop.permute.xlu1 %4016 }
 0xf4d   :  { %v4015_v5 = vpop.permute.xlu0 %4014  ;;  %7244 = vmatprep.subr.bf16.mxu1 %v7940_v51 }
 0xf4e   :  { %6890 = vmatprep.mubr.msk.f32.mxu1 %vm107_vm0, %v4015_v5 }
 0xf4f   :  { %6891 = vmatmul.mubr.msk.f32.gmra.mrb[62].mxu1 %vm107_vm0, %v4017_v18 }
 0xf50   :  { %7246 = vmatpush3.bf16.msra.mxu1 %v7940_v51  ;;  %6915 = vmatprep.mubr.msk.f32.mxu1 %vm107_vm0, %v4011_v29 }
 0xf51   :  { %7256 = vmatprep.subr.bf16.mxu1 %v8179_v1 }
 0xf53   :  { %6916 = vmatmul.mubr.msk.f32.vlgmr.msra.gmra.mrb[64].mxu1 %vm107_vm0, %v4013_v59 }
 0xf54   :  { %6918 = vmatprep.mubr.msk.f32.mxu1 %vm107_vm0, %v4015_v5  ;;  %7258 = vmatpush3.bf16.msra.mxu1 %v8179_v1  ;;  %v9032_v5 = vadd.f32 %v8650_v10, %v8131_v20 }
 0xf55   :  { %7260 = vmatprep.subr.bf16.mxu1 %v8191_v8 }
 0xf57   :  { %6919 = vmatmul.mubr.msk.f32.gmra.mrb[66].mxu1 %vm107_vm0, %v4017_v18 }
 0xf58   :  { %7262 = vmatpush3.bf16.msra.mxu1 %v8191_v8 }
 0xf59   :  { %7272 = vmatprep.subr.bf16.mxu1 %v8168_v62 }
0x100e   :  { %v6903_v22 = vpop.f32.mrb[60].mxu0 }
0x100f   :  { %v4203_v7 = vadd.f32 %v8811_v4, %v6903_v22  ;;  %v4197_v47 = vpop.f32.mrb[61].mxu0  ;;  %v9036_v22 = vadd.f32 %v8650_v10, %v8133_v34 }
0x1010   :  { %v4198_v57 = vadd.f32 %v8811_v4, %v4197_v47  ;;  %v9041_v47 = vadd.f32 %v8650_v10, %v8135_v35 }
0x1011   :  { %4250 = vrot.lane.b32.xlu1 %v4203_v7, %s7733_s17 }
0x1012   :  { %4248 = vrot.lane.b32.xlu0 %v4198_v57, %s7733_s17 }
0x101a   :  { %v6906_v58 = vpop.f32.mrb[62].mxu0 }
0x101b   :  { %v4213_v13 = vadd.f32 %v8811_v4, %v6906_v58  ;;  %v4207_v55 = vpop.f32.mrb[63].mxu0  ;;  %v9046_v58 = vadd.f32 %v8650_v10, %v8137_v56 }
0x101c   :  { %v4208_v61 = vadd.f32 %v8811_v4, %v4207_v55 }
0x101d   :  { %4254 = vrot.lane.b32.xlu1 %v4213_v13, %s7733_s17 }
0x101e   :  { %4252 = vrot.lane.b32.xlu0 %v4208_v61, %s7733_s17  ;;  %v6889_v52 = vpop.f32.mrb[60].mxu1 }
0x101f   :  { %v4092_v11 = vpop.f32.mrb[61].mxu1  ;;  %v9015_v49 = vadd.f32 %v8832_v48, %v6889_v52 }
0x1020   :  { %v9018_v46 = vadd.f32 %v8832_v48, %v4092_v11 }
0x1021   :  { %v4217_v27 = vadd.f32 %v4203_v7, %v9015_v49 }
0x1022   :  { %v6892_v25 = vpop.f32.mrb[62].mxu1  ;;  %v4216_v54 = vadd.f32 %v4198_v57, %v9018_v46 }
0x1023   :  { %v4102_v31 = vpop.f32.mrb[63].mxu1  ;;  %v6127_v16 = vmul.f32 -1.442695, %v4217_v27  ;;  %v9023_v17 = vadd.f32 %v8832_v48, %v6892_v25 }
0x1024   :  { %v6126_v63 = vmul.f32 -1.442695, %v4216_v54 }
0x1025   :  { %7549 = vpow2.f32 %v6127_v16  ;;  %v4219_v42 = vadd.f32 %v4213_v13, %v9023_v17 }
0x1026   :  { %v6917_v26 = vpop.f32.mrb[64].mxu1  ;;  %7551 = vpow2.f32 %v6126_v63 }
0x1027   :  { %v4392_v12 = vadd.f32 %v8625_v50, %v6917_v26  ;;  %v4386_v24 = vpop.f32.mrb[65].mxu1  ;;  %v6129_v30 = vmul.f32 -1.442695, %v4219_v42 }
0x1028   :  { %v4387_v19 = vadd.f32 %v8625_v50, %v4386_v24 }
0x1029   :  { %4439 = vrot.lane.b32.xlu1 %v4392_v12, %s7733_s17  ;;  %7553 = vpow2.f32 %v6129_v30  ;;  %v4406_v7 = vadd.f32 %v4392_v12, %v9032_v5 }
0x102a   :  { %v6920_v32 = vpop.f32.mrb[66].mxu1  ;;  %4437 = vrot.lane.b32.xlu0 %v4387_v19, %s7733_s17  ;;  %v4405_v57 = vadd.f32 %v4387_v19, %v9036_v22 }
0x102b   :  { %v4402_v14 = vadd.f32 %v8625_v50, %v6920_v32  ;;  %v4396_v43 = vpop.f32.mrb[67].mxu1  ;;  %v6135_v13 = vmul.f32 -1.442695, %v4406_v7 }
0x102c   :  { %v4397_v0 = vadd.f32 %v8625_v50, %v4396_v43  ;;  %v9026_v50 = vadd.f32 %v8832_v48, %v4102_v31  ;;  %v6134_v55 = vmul.f32 -1.442695, %v4405_v57 }
0x102d   :  { %4443 = vrot.lane.b32.xlu1 %v4402_v14, %s7733_s17  ;;  %v4408_v20 = vadd.f32 %v4402_v14, %v9041_v47 }
0x102e   :  { %4441 = vrot.lane.b32.xlu0 %v4397_v0, %s7733_s17  ;;  %v4218_v9 = vadd.f32 %v4208_v61, %v9026_v50  ;;  %v4407_v34 = vadd.f32 %v4397_v0, %v9046_v58 }
0x102f   :  { %v7550_v45 = vpop.eup %7549  ;;  %v6137_v11 = vmul.f32 -1.442695, %v4408_v20 }
0x1030   :  { %v6128_v21 = vmul.f32 -1.442695, %v4218_v9  ;;  %v7552_v59 = vpop.eup %7551  ;;  %v4233_v29 = vadd.f32 1.0, %v7550_v45  ;;  %v6136_v35 = vmul.f32 -1.442695, %v4407_v34 }
0x1031   :  { %v4232_v18 = vadd.f32 1.0, %v7552_v59 }
0x1032   :  { %7555 = vpow2.f32 %v6128_v21 }
0x1033   :  { %7557 = vrcp.f32 %v4233_v29  ;;  %v7554_v61 = vpop.eup %7553 }
0x1034   :  { %7559 = vrcp.f32 %v4232_v18  ;;  %v4235_v25 = vadd.f32 1.0, %v7554_v61 }
0x1035   :  { %7561 = vpow2.f32 %v6135_v13 }
0x1036   :  { %7563 = vpow2.f32 %v6134_v55 }
0x1037   :  { %7565 = vpow2.f32 %v6137_v11 }
0x1038   :  { %7567 = vpow2.f32 %v6136_v35 }
0x1039   :  { %7569 = vrcp.f32 %v4235_v25 }
0x103c   :  { %v7556_v52 = vpop.eup %7555 }
0x103d   :  { %v4234_v31 = vadd.f32 1.0, %v7556_v52  ;;  %v9050_v26 = vpop.eup %7557 }
0x103e   :  { %v9052_v10 = vpop.eup %7559 }
0x103f   :  { %7571 = vrcp.f32 %v4234_v31  ;;  %v7562_v32 = vpop.eup %7561 }
0x1040   :  { %v7564_v14 = vpop.eup %7563  ;;  %v4422_v0 = vadd.f32 1.0, %v7562_v32 }
0x1041   :  { %v7566_v43 = vpop.eup %7565  ;;  %v4421_v54 = vadd.f32 1.0, %v7564_v14 }
0x1042   :  { %v7568_v27 = vpop.eup %7567  ;;  %7573 = vrcp.f32 %v4422_v0  ;;  %v4424_v21 = vadd.f32 1.0, %v7566_v43 }
0x1043   :  { %v9058_v16 = vpop.eup %7569  ;;  %7575 = vrcp.f32 %v4421_v54  ;;  %v4423_v59 = vadd.f32 1.0, %v7568_v27 }
0x1044   :  { %7577 = vrcp.f32 %v4424_v21 }
0x1045   :  { %7579 = vrcp.f32 %v4423_v59 }
0x1049   :  { %v9060_v42 = vpop.eup %7571 }
0x104c   :  { %v9066_v29 = vpop.eup %7573 }
0x104d   :  { %v9068_v7 = vpop.eup %7575 }
0x104e   :  { %v9073_v34 = vpop.eup %7577 }
0x104f   :  { %v9076_v61 = vpop.eup %7579 }
0x1083   :  { %v4251_v56 = vpop.permute.xlu1 %4250 }
0x1084   :  { %v4261_v12 = vmul.f32 %v9050_v26, %v4251_v56  ;;  %v4249_v24 = vpop.permute.xlu0 %4248 }
0x1085   :  { %v4260_v19 = vmul.f32 %v9052_v10, %v4249_v24 }
0x1086   :  { %4270 = vrot.lane.b32.xlu1 %v4261_v12, %s7733_s17 }
0x1087   :  { %4268 = vrot.lane.b32.xlu0 %v4260_v19, %s7733_s17 }
0x108f   :  { %v4255_v63 = vpop.permute.xlu1 %4254 }
0x1090   :  { %v4263_v9 = vmul.f32 %v9058_v16, %v4255_v63  ;;  %v4253_v30 = vpop.permute.xlu0 %4252 }
0x1091   :  { %v4262_v45 = vmul.f32 %v9060_v42, %v4253_v30 }
0x1092   :  { %4274 = vrot.lane.b32.xlu1 %v4263_v9, %s7733_s17 }
0x1093   :  { %4272 = vrot.lane.b32.xlu0 %v4262_v45, %s7733_s17 }
0x109b   :  { %v4440_v18 = vpop.permute.xlu1 %4439 }
0x109c   :  { %v4450_v57 = vmul.f32 %v9066_v29, %v4440_v18  ;;  %v4438_v20 = vpop.permute.xlu0 %4437  ;;  %v4289_v18 = vsub.f32 1.0, %v9050_v26 }
0x109d   :  { %v4449_v13 = vmul.f32 %v9068_v7, %v4438_v20 }
0x109e   :  { %4459 = vrot.lane.b32.xlu1 %v4450_v57, %s7733_s17  ;;  %v4288_v57 = vsub.f32 1.0, %v9052_v10 }
0x109f   :  { %v4444_v55 = vpop.permute.xlu1 %4443  ;;  %4457 = vrot.lane.b32.xlu0 %v4449_v13, %s7733_s17 }
0x10a0   :  { %v4452_v52 = vmul.f32 %v9073_v34, %v4444_v55  ;;  %v4442_v11 = vpop.permute.xlu0 %4441  ;;  %v4312_v55 = vmul.f32 %v9052_v10, %v8926_v6 }
0x10a1   :  { %v4451_v35 = vmul.f32 %v9076_v61, %v4442_v11 }
0x10a2   :  { %4463 = vrot.lane.b32.xlu1 %v4452_v52, %s7733_s17 }
0x10a3   :  { %4461 = vrot.lane.b32.xlu0 %v4451_v35, %s7733_s17 }
0x10f8   :  { %v4271_v25 = vpop.permute.xlu1 %4270 }
0x10f9   :  { %v4281_v31 = vadd.f32 %v4271_v25, %v9015_v49  ;;  %v4269_v56 = vpop.permute.xlu0 %4268  ;;  %v4291_v25 = vsub.f32 1.0, %v9058_v16 }
0x10fa   :  { %v4280_v12 = vadd.f32 %v4269_v56, %v9018_v46  ;;  %v4314_v56 = vmul.f32 %v9060_v42, %v8941_v53 }
0x10fb   :  { %7581 = vtanh.f32 %v4281_v31 }
0x10fc   :  { %7583 = vtanh.f32 %v4280_v12 }
0x1104   :  { %v4275_v24 = vpop.permute.xlu1 %4274 }
0x1105   :  { %v7582_v19 = vpop.eup %7581  ;;  %v4283_v32 = vadd.f32 %v4275_v24, %v9023_v17  ;;  %v4273_v14 = vpop.permute.xlu0 %4272 }
0x1106   :  { %v7584_v43 = vpop.eup %7583  ;;  %v4282_v0 = vadd.f32 %v4273_v14, %v9026_v50  ;;  %4298 = vrot.lane.b32.xlu1 %v7582_v19, %s7734_s15 }
0x1107   :  { %7585 = vtanh.f32 %v4283_v32  ;;  %4296 = vrot.lane.b32.xlu0 %v7584_v43, %s7734_s15  ;;  %v4478_v32 = vsub.f32 1.0, %v9066_v29  ;;  %v4501_v43 = vmul.f32 %v9068_v7, %v8955_v33  ;;  %v4503_v33 = vmul.f32 %v9076_v61, %v8968_v3 }
0x1108   :  { %7587 = vtanh.f32 %v4282_v0 }
0x1110   :  { %v4460_v49 = vpop.permute.xlu1 %4459 }
0x1111   :  { %v7586_v27 = vpop.eup %7585  ;;  %v4470_v46 = vadd.f32 %v4460_v49, %v9032_v5  ;;  %v4458_v54 = vpop.permute.xlu0 %4457 }
0x1112   :  { %v7588_v63 = vpop.eup %7587  ;;  %v4469_v9 = vadd.f32 %v4458_v54, %v9036_v22  ;;  %4302 = vrot.lane.b32.xlu1 %v7586_v27, %s7734_s15  ;;  %v4480_v27 = vsub.f32 1.0, %v9073_v34 }
0x1113   :  { %7589 = vtanh.f32 %v4470_v46  ;;  %4300 = vrot.lane.b32.xlu0 %v7588_v63, %s7734_s15  ;;  %v4479_v63 = vsub.f32 1.0, %v9076_v61 }
0x1114   :  { %7591 = vtanh.f32 %v4469_v9  ;;  %v4464_v17 = vpop.permute.xlu1 %4463  ;;  %v4504_v9 = vmul.f32 %v9073_v34, %v8966_v15 }
0x1115   :  { %v4472_v50 = vadd.f32 %v4464_v17, %v9041_v47  ;;  %v4462_v30 = vpop.permute.xlu0 %4461 }
0x1116   :  { %v4471_v21 = vadd.f32 %v4462_v30, %v9046_v58  ;;  %v4313_v58 = vmul.f32 %v9050_v26, %v8924_v28  ;;  %v4290_v28 = vsub.f32 1.0, %v9060_v42  ;;  %v4315_v26 = vmul.f32 %v9058_v16, %v8938_v23 }
0x1117   :  { %7593 = vtanh.f32 %v4472_v50  ;;  %v4477_v23 = vsub.f32 1.0, %v9068_v7  ;;  %v4502_v16 = vmul.f32 %v9066_v29, %v8952_v60 }
0x1118   :  { %7595 = vtanh.f32 %v4471_v21 }
0x111d   :  { %v7590_v45 = vpop.eup %7589 }
0x111e   :  { %v7592_v5 = vpop.eup %7591  ;;  %4487 = vrot.lane.b32.xlu1 %v7590_v45, %s7734_s15 }
0x111f   :  { %4485 = vrot.lane.b32.xlu0 %v7592_v5, %s7734_s15 }
0x1121   :  { %v7594_v22 = vpop.eup %7593 }
0x1122   :  { %v7596_v59 = vpop.eup %7595  ;;  %4491 = vrot.lane.b32.xlu1 %v7594_v22, %s7734_s15 }
0x1123   :  { %4489 = vrot.lane.b32.xlu0 %v7596_v59, %s7734_s15 }
0x1178   :  { %v4299_v47 = vpop.permute.xlu1 %4298 }
0x1179   :  { %v4309_v20 = vmul.f32 %v4299_v47, %v4289_v18  ;;  %v4297_v13 = vpop.permute.xlu0 %4296 }
0x117a   :  { %v4308_v52 = vmul.f32 %v4297_v13, %v4288_v57 }
0x117b   :  { %v9104_v11 = vadd.f32 %v4313_v58, %v4309_v20 }
0x117c   :  { %v9106_v35 = vadd.f32 %v4312_v55, %v4308_v52 }
0x117d   :  { %4620 = vrot.lane.b32.xlu1 %v9104_v11, %s7734_s15 }
0x117e   :  { %4618 = vrot.lane.b32.xlu0 %v9106_v35, %s7734_s15 }
0x1184   :  { %v4303_v31 = vpop.permute.xlu1 %4302 }
0x1185   :  { %v4311_v6 = vmul.f32 %v4303_v31, %v4291_v25  ;;  %v4301_v10 = vpop.permute.xlu0 %4300 }
0x1186   :  { %v4310_v12 = vmul.f32 %v4301_v10, %v4290_v28 }
0x1187   :  { %v9118_v24 = vadd.f32 %v4315_v26, %v4311_v6  ;;  %v9189_v26 = vld [vmem:[%s9593_s7] ss:$0 sm:$0xff] }
0x1188   :  { %v9120_v19 = vadd.f32 %v4314_v56, %v4310_v12 }
0x1189   :  { %4624 = vrot.lane.b32.xlu1 %v9118_v24, %s7734_s15 }
0x118a   :  { %4622 = vrot.lane.b32.xlu0 %v9120_v19, %s7734_s15 }
0x1190   :  { %v4488_v14 = vpop.permute.xlu1 %4487 }
0x1191   :  { %v4498_v53 = vmul.f32 %v4488_v14, %v4478_v32  ;;  %v4486_v42 = vpop.permute.xlu0 %4485 }
0x1192   :  { %v4497_v0 = vmul.f32 %v4486_v42, %v4477_v23 }
0x1193   :  { %v9132_v49 = vadd.f32 %v4502_v16, %v4498_v53 }
0x1194   :  { %v9135_v46 = vadd.f32 %v4501_v43, %v4497_v0  ;;  %v4492_v54 = vpop.permute.xlu1 %4491 }
0x1195   :  { %v4500_v17 = vmul.f32 %v4492_v54, %v4480_v27  ;;  %4515 = vrot.lane.b32.xlu1 %v9132_v49, %s7734_s15  ;;  %v4490_v60 = vpop.permute.xlu0 %4489 }
0x1196   :  { %v4499_v29 = vmul.f32 %v4490_v60, %v4479_v63  ;;  %4513 = vrot.lane.b32.xlu0 %v9135_v46, %s7734_s15 }
0x1197   :  { %v9146_v7 = vadd.f32 %v4504_v9, %v4500_v17 }
0x1198   :  { %v9148_v50 = vadd.f32 %v4503_v33, %v4499_v29 }
0x1199   :  { %4519 = vrot.lane.b32.xlu1 %v9146_v7, %s7734_s15 }
0x119a   :  { %4517 = vrot.lane.b32.xlu0 %v9148_v50, %s7734_s15 }
0x11ef   :  { %v4621_v34 = vpop.permute.xlu1 %4620 }
0x11f0   :  { %v4619_v15 = vpop.permute.xlu0 %4618 }
0x11f1   :  { %6943 = vmatprep.mubr.msk.f32.mxu1 %vm107_vm0, %v4619_v15 }
0x11f2   :  { %6944 = vmatmul.mubr.msk.f32.vlgmr.msra.gmra.mrb[68].mxu1 %vm107_vm0, %v4621_v34 }
0x11f3   :  { %7274 = vmatpush3.bf16.msra.mxu1 %v8168_v62 }
0x11f4   :  { %7276 = vmatprep.subr.bf16.mxu1 %v8181_v2 }
0x11f7   :  { %7278 = vmatpush3.bf16.msra.mxu1 %v8181_v2 }
0x11f8   :  { %7288 = vmatprep.subr.bf16.mxu1 %v7925_v44 }
0x11fb   :  { %v4625_v61 = vpop.permute.xlu1 %4624 }
0x11fc   :  { %v4623_v3 = vpop.permute.xlu0 %4622 }
0x11fd   :  { %6946 = vmatprep.mubr.msk.f32.mxu1 %vm107_vm0, %v4623_v3 }
0x11fe   :  { %6947 = vmatmul.mubr.msk.f32.gmra.mrb[70].mxu1 %vm107_vm0, %v4625_v61 }
0x1207   :  { %v4516_v30 = vpop.permute.xlu1 %4515 }
0x1208   :  { %v4514_v21 = vpop.permute.xlu0 %4513 }
0x1209   :  { %6929 = vmatprep.mubr.msk.f32.mxu0 %vm107_vm0, %v4514_v21 }
0x120a   :  { %6930 = vmatmul.mubr.msk.f32.vlgmr.msra.gmra.mrb[64].mxu0 %vm107_vm0, %v4516_v30 }
0x120b   :  { %7266 = vmatpush3.bf16.msra.mxu0 %v7925_v44  ;;  %v4520_v5 = vpop.permute.xlu1 %4519 }
0x120c   :  { %v4518_v45 = vpop.permute.xlu0 %4517  ;;  %7268 = vmatprep.subr.bf16.mxu0 %v7940_v51 }
0x120d   :  { %6932 = vmatprep.mubr.msk.f32.mxu0 %vm107_vm0, %v4518_v45 }
0x120e   :  { %6933 = vmatmul.mubr.msk.f32.gmra.mrb[66].mxu0 %vm107_vm0, %v4520_v5 }
0x120f   :  { %7270 = vmatpush3.bf16.msra.mxu0 %v7940_v51  ;;  %6957 = vmatprep.mubr.msk.f32.mxu0 %vm107_vm0, %v4514_v21 }
0x1210   :  { %7280 = vmatprep.subr.bf16.mxu0 %v8179_v1 }
0x1212   :  { %6958 = vmatmul.mubr.msk.f32.vlgmr.msra.gmra.mrb[68].mxu0 %vm107_vm0, %v4516_v30 }
0x1213   :  { %6960 = vmatprep.mubr.msk.f32.mxu0 %vm107_vm0, %v4518_v45  ;;  %7282 = vmatpush3.bf16.msra.mxu0 %v8179_v1 }
0x1214   :  { %7284 = vmatprep.subr.bf16.mxu0 %v8191_v8 }
0x1216   :  { %6961 = vmatmul.mubr.msk.f32.gmra.mrb[70].mxu0 %vm107_vm0, %v4520_v5 }
0x1217   :  { %7286 = vmatpush3.bf16.msra.mxu0 %v8191_v8 }
0x1218   :  { %7296 = vmatprep.subr.bf16.mxu0 %v8168_v62 }
0x12c5   :  { %v6945_v22 = vpop.f32.mrb[68].mxu1 }
0x12c6   :  { %v4706_v59 = vadd.f32 %v8811_v4, %v6945_v22  ;;  %v4700_v18 = vpop.f32.mrb[69].mxu1 }
0x12c7   :  { %v4701_v47 = vadd.f32 %v8811_v4, %v4700_v18 }
0x12c8   :  { %4753 = vrot.lane.b32.xlu1 %v4706_v59, %s7733_s17 }
0x12c9   :  { %4751 = vrot.lane.b32.xlu0 %v4701_v47, %s7733_s17 }
0x12d1   :  { %v6948_v57 = vpop.f32.mrb[70].mxu1 }
0x12d2   :  { %v4716_v58 = vadd.f32 %v8811_v4, %v6948_v57  ;;  %v4710_v20 = vpop.f32.mrb[71].mxu1 }
0x12d3   :  { %v4711_v13 = vadd.f32 %v8811_v4, %v4710_v20 }
0x12d4   :  { %4757 = vrot.lane.b32.xlu1 %v4716_v58, %s7733_s17 }
0x12d5   :  { %4755 = vrot.lane.b32.xlu0 %v4711_v13, %s7733_s17 }
0x12dd   :  { %v6931_v55 = vpop.f32.mrb[64].mxu0 }
0x12de   :  { %v4595_v52 = vpop.f32.mrb[65].mxu0  ;;  %v9200_v23 = vadd.f32 %v8832_v48, %v6931_v55 }
0x12df   :  { %v9203_v16 = vadd.f32 %v8832_v48, %v4595_v52 }
0x12e0   :  { %v4720_v53 = vadd.f32 %v4706_v59, %v9200_v23 }
0x12e1   :  { %v6934_v25 = vpop.f32.mrb[66].mxu0  ;;  %v4719_v42 = vadd.f32 %v4701_v47, %v9203_v16 }
0x12e2   :  { %v4605_v31 = vpop.f32.mrb[67].mxu0  ;;  %v6147_v43 = vmul.f32 -1.442695, %v4720_v53  ;;  %v9208_v27 = vadd.f32 %v8832_v48, %v6934_v25 }
0x12e3   :  { %v6146_v0 = vmul.f32 -1.442695, %v4719_v42  ;;  %v9211_v54 = vadd.f32 %v8832_v48, %v4605_v31  ;;  %v9218_v48 = vld [vmem:[%s9594_s6] ss:$0 sm:$0xff] }
0x12e4   :  { %7597 = vpow2.f32 %v6147_v43  ;;  %v4722_v63 = vadd.f32 %v4716_v58, %v9208_v27  ;;  %v9222_v61 = vadd.f32 %v9218_v48, %v8139_v36  ;;  %v9226_v21 = vadd.f32 %v9218_v48, %v8141_v37 }
0x12e5   :  { %v6959_v28 = vpop.f32.mrb[68].mxu0  ;;  %7599 = vpow2.f32 %v6146_v0  ;;  %v4721_v9 = vadd.f32 %v4711_v13, %v9211_v54  ;;  %v9232_v59 = vadd.f32 %v9218_v48, %v8143_v38  ;;  %v9238_v36 = vadd.f32 %v9218_v48, %v8145_v39 }
0x12e6   :  { %v4895_v6 = vadd.f32 %v9189_v26, %v6959_v28  ;;  %v4889_v10 = vpop.f32.mrb[69].mxu0  ;;  %v6149_v17 = vmul.f32 -1.442695, %v4722_v63 }
0x12e7   :  { %v4890_v56 = vadd.f32 %v9189_v26, %v4889_v10  ;;  %v6148_v60 = vmul.f32 -1.442695, %v4721_v9 }
0x12e8   :  { %4942 = vrot.lane.b32.xlu1 %v4895_v6, %s7733_s17  ;;  %7601 = vpow2.f32 %v6149_v17  ;;  %v4909_v45 = vadd.f32 %v4895_v6, %v9222_v61 }
0x12e9   :  { %v6962_v4 = vpop.f32.mrb[70].mxu0  ;;  %4940 = vrot.lane.b32.xlu0 %v4890_v56, %s7733_s17  ;;  %7603 = vpow2.f32 %v6148_v60  ;;  %v4908_v22 = vadd.f32 %v4890_v56, %v9226_v21 }
0x12ea   :  { %v4905_v12 = vadd.f32 %v9189_v26, %v6962_v4  ;;  %v4899_v32 = vpop.f32.mrb[71].mxu0  ;;  %v6155_v37 = vmul.f32 -1.442695, %v4909_v45 }
0x12eb   :  { %v4900_v14 = vadd.f32 %v9189_v26, %v4899_v32  ;;  %v6154_v52 = vmul.f32 -1.442695, %v4908_v22 }
0x12ec   :  { %4946 = vrot.lane.b32.xlu1 %v4905_v12, %s7733_s17  ;;  %v4911_v20 = vadd.f32 %v4905_v12, %v9232_v59 }
0x12ed   :  { %4944 = vrot.lane.b32.xlu0 %v4900_v14, %s7733_s17  ;;  %v4910_v38 = vadd.f32 %v4900_v14, %v9238_v36 }
0x12ee   :  { %v7598_v33 = vpop.eup %7597  ;;  %v6157_v39 = vmul.f32 -1.442695, %v4911_v20 }
0x12ef   :  { %v7600_v29 = vpop.eup %7599  ;;  %v4736_v15 = vadd.f32 1.0, %v7598_v33  ;;  %v6156_v31 = vmul.f32 -1.442695, %v4910_v38 }
0x12f0   :  { %v4735_v34 = vadd.f32 1.0, %v7600_v29 }
0x12f1   :  { %7605 = vrcp.f32 %v4736_v15 }
0x12f2   :  { %7607 = vrcp.f32 %v4735_v34  ;;  %v7602_v3 = vpop.eup %7601 }
0x12f3   :  { %v7604_v30 = vpop.eup %7603  ;;  %v4738_v5 = vadd.f32 1.0, %v7602_v3 }
0x12f4   :  { %v4737_v18 = vadd.f32 1.0, %v7604_v30 }
0x12f5   :  { %7609 = vrcp.f32 %v4738_v5 }
0x12f6   :  { %7611 = vrcp.f32 %v4737_v18 }
0x12f7   :  { %7613 = vpow2.f32 %v6155_v37 }
0x12f8   :  { %7615 = vpow2.f32 %v6154_v52 }
0x12f9   :  { %7617 = vpow2.f32 %v6157_v39 }
0x12fa   :  { %7619 = vpow2.f32 %v6156_v31 }
0x12fb   :  { %v9234_v47 = vpop.eup %7605 }
0x12fc   :  { %v9240_v58 = vpop.eup %7607 }
0x12ff   :  { %v9248_v28 = vpop.eup %7609 }
0x1300   :  { %v9250_v10 = vpop.eup %7611 }
0x1301   :  { %v7614_v32 = vpop.eup %7613 }
0x1302   :  { %v7616_v14 = vpop.eup %7615  ;;  %v4925_v53 = vadd.f32 1.0, %v7614_v32 }
0x1303   :  { %v7618_v42 = vpop.eup %7617  ;;  %v4924_v43 = vadd.f32 1.0, %v7616_v14 }
0x1304   :  { %v7620_v0 = vpop.eup %7619  ;;  %7621 = vrcp.f32 %v4925_v53  ;;  %v4927_v63 = vadd.f32 1.0, %v7618_v42 }
0x1305   :  { %7623 = vrcp.f32 %v4924_v43  ;;  %v4926_v9 = vadd.f32 1.0, %v7620_v0  ;;  %v4791_v0 = vsub.f32 1.0, %v9240_v58 }
0x1306   :  { %7625 = vrcp.f32 %v4927_v63 }
0x1307   :  { %7627 = vrcp.f32 %v4926_v9 }
0x130e   :  { %v9256_v17 = vpop.eup %7621 }
0x130f   :  { %v9258_v33 = vpop.eup %7623 }
0x1310   :  { %v9263_v3 = vpop.eup %7625 }
0x1311   :  { %v9266_v45 = vpop.eup %7627 }
0x133a   :  { %v4754_v57 = vpop.permute.xlu1 %4753 }
0x133b   :  { %v4764_v13 = vmul.f32 %v9234_v47, %v4754_v57  ;;  %v4752_v55 = vpop.permute.xlu0 %4751 }
0x133c   :  { %v4763_v25 = vmul.f32 %v9240_v58, %v4752_v55 }
0x133d   :  { %4773 = vrot.lane.b32.xlu1 %v4764_v13, %s7733_s17 }
0x133e   :  { %4771 = vrot.lane.b32.xlu0 %v4763_v25, %s7733_s17 }
0x1346   :  { %v4758_v6 = vpop.permute.xlu1 %4757 }
0x1347   :  { %v4766_v56 = vmul.f32 %v9248_v28, %v4758_v6  ;;  %v4756_v4 = vpop.permute.xlu0 %4755 }
0x1348   :  { %v4765_v12 = vmul.f32 %v9250_v10, %v4756_v4 }
0x1349   :  { %4777 = vrot.lane.b32.xlu1 %v4766_v56, %s7733_s17 }
0x134a   :  { %4775 = vrot.lane.b32.xlu0 %v4765_v12, %s7733_s17 }
0x135a   :  { %v4943_v60 = vpop.permute.xlu1 %4942 }
0x135b   :  { %v4953_v29 = vmul.f32 %v9256_v17, %v4943_v60  ;;  %v4941_v15 = vpop.permute.xlu0 %4940  ;;  %v4815_v60 = vmul.f32 %v9240_v58, %v9106_v35 }
0x135c   :  { %v4952_v34 = vmul.f32 %v9258_v33, %v4941_v15 }
0x135d   :  { %4962 = vrot.lane.b32.xlu1 %v4953_v29, %s7733_s17 }
0x135e   :  { %v4947_v30 = vpop.permute.xlu1 %4946  ;;  %4960 = vrot.lane.b32.xlu0 %v4952_v34, %s7733_s17 }
0x135f   :  { %v4955_v5 = vmul.f32 %v9263_v3, %v4947_v30  ;;  %v4945_v22 = vpop.permute.xlu0 %4944  ;;  %v4794_v30 = vsub.f32 1.0, %v9248_v28 }
0x1360   :  { %v4954_v18 = vmul.f32 %v9266_v45, %v4945_v22  ;;  %v4817_v22 = vmul.f32 %v9250_v10, %v9120_v19 }
0x1361   :  { %4966 = vrot.lane.b32.xlu1 %v4955_v5, %s7733_s17 }
0x1362   :  { %4964 = vrot.lane.b32.xlu0 %v4954_v18, %s7733_s17 }
0x13af   :  { %v4774_v57 = vpop.permute.xlu1 %4773 }
0x13b0   :  { %v4784_v37 = vadd.f32 %v4774_v57, %v9200_v23  ;;  %v4772_v20 = vpop.permute.xlu0 %4771 }
0x13b1   :  { %v4783_v13 = vadd.f32 %v4772_v20, %v9203_v16  ;;  %v4981_v20 = vsub.f32 1.0, %v9256_v17 }
0x13b2   :  { %7629 = vtanh.f32 %v4784_v37 }
0x13b3   :  { %7631 = vtanh.f32 %v4783_v13 }
0x13bb   :  { %v4778_v55 = vpop.permute.xlu1 %4777 }
0x13bc   :  { %v7630_v52 = vpop.eup %7629  ;;  %v4786_v38 = vadd.f32 %v4778_v55, %v9208_v27  ;;  %v4776_v25 = vpop.permute.xlu0 %4775  ;;  %v5004_v55 = vmul.f32 %v9258_v33, %v9135_v46  ;;  %v5006_v46 = vmul.f32 %v9266_v45, %v9148_v50 }
0x13bd   :  { %v7632_v39 = vpop.eup %7631  ;;  %v4785_v31 = vadd.f32 %v4776_v25, %v9211_v54  ;;  %4801 = vrot.lane.b32.xlu1 %v7630_v52, %s7734_s15  ;;  %v4983_v25 = vsub.f32 1.0, %v9263_v3 }
0x13be   :  { %7633 = vtanh.f32 %v4786_v38  ;;  %4799 = vrot.lane.b32.xlu0 %v7632_v39, %s7734_s15 }
0x13bf   :  { %7635 = vtanh.f32 %v4785_v31 }
0x13c8   :  { %v7634_v23 = vpop.eup %7633 }
0x13c9   :  { %v7636_v6 = vpop.eup %7635  ;;  %4805 = vrot.lane.b32.xlu1 %v7634_v23, %s7734_s15  ;;  %v4982_v23 = vsub.f32 1.0, %v9266_v45 }
0x13ca   :  { %4803 = vrot.lane.b32.xlu0 %v7636_v6, %s7734_s15  ;;  %v5007_v6 = vmul.f32 %v9263_v3, %v9146_v7 }
0x13cf   :  { %v4963_v16 = vpop.permute.xlu1 %4962 }
0x13d0   :  { %v4973_v56 = vadd.f32 %v4963_v16, %v9222_v61  ;;  %v4961_v27 = vpop.permute.xlu0 %4960 }
0x13d1   :  { %v4972_v4 = vadd.f32 %v4961_v27, %v9226_v21  ;;  %v4792_v21 = vsub.f32 1.0, %v9234_v47 }
0x13d2   :  { %7637 = vtanh.f32 %v4973_v56 }
0x13d3   :  { %7639 = vtanh.f32 %v4972_v4  ;;  %v4967_v54 = vpop.permute.xlu1 %4966 }
0x13d4   :  { %v4975_v12 = vadd.f32 %v4967_v54, %v9232_v59  ;;  %v4965_v32 = vpop.permute.xlu0 %4964 }
0x13d5   :  { %v4974_v14 = vadd.f32 %v4965_v32, %v9238_v36  ;;  %v4816_v36 = vmul.f32 %v9234_v47, %v9104_v11  ;;  %v4793_v11 = vsub.f32 1.0, %v9250_v10  ;;  %v4818_v47 = vmul.f32 %v9248_v28, %v9118_v24 }
0x13d6   :  { %7641 = vtanh.f32 %v4975_v12  ;;  %v4980_v24 = vsub.f32 1.0, %v9258_v33  ;;  %v5005_v28 = vmul.f32 %v9256_v17, %v9132_v49 }
0x13d7   :  { %7643 = vtanh.f32 %v4974_v14 }
0x13dc   :  { %v7638_v53 = vpop.eup %7637 }
0x13dd   :  { %v7640_v42 = vpop.eup %7639  ;;  %4990 = vrot.lane.b32.xlu1 %v7638_v53, %s7734_s15 }
0x13de   :  { %4988 = vrot.lane.b32.xlu0 %v7640_v42, %s7734_s15 }
0x13e0   :  { %v7642_v61 = vpop.eup %7641 }
0x13e1   :  { %v7644_v43 = vpop.eup %7643  ;;  %4994 = vrot.lane.b32.xlu1 %v7642_v61, %s7734_s15 }
0x13e2   :  { %4992 = vrot.lane.b32.xlu0 %v7644_v43, %s7734_s15 }
0x142f   :  { %v4802_v59 = vpop.permute.xlu1 %4801 }
0x1430   :  { %v4812_v63 = vmul.f32 %v4802_v59, %v4792_v21  ;;  %v4800_v9 = vpop.permute.xlu0 %4799 }
0x1431   :  { %v4811_v29 = vmul.f32 %v4800_v9, %v4791_v0 }
0x1432   :  { %v9294_v15 = vadd.f32 %v4816_v36, %v4812_v63 }
0x1433   :  { %v9296_v34 = vadd.f32 %v4815_v60, %v4811_v29 }
0x1434   :  { %5123 = vrot.lane.b32.xlu1 %v9294_v15, %s7734_s15 }
0x1435   :  { %5121 = vrot.lane.b32.xlu0 %v9296_v34, %s7734_s15 }
0x143b   :  { %v4806_v5 = vpop.permute.xlu1 %4805 }
0x143c   :  { %v4814_v35 = vmul.f32 %v4806_v5, %v4794_v30  ;;  %v4804_v58 = vpop.permute.xlu0 %4803  ;;  %v9390_v5 = vld [vmem:[%s9598_s10] ss:$0 sm:$0xff] }
0x143d   :  { %v4813_v18 = vmul.f32 %v4804_v58, %v4793_v11 }
0x143e   :  { %v9308_v57 = vadd.f32 %v4818_v47, %v4814_v35 }
0x143f   :  { %v9310_v37 = vadd.f32 %v4817_v22, %v4813_v18 }
0x1440   :  { %5127 = vrot.lane.b32.xlu1 %v9308_v57, %s7734_s15 }
0x1441   :  { %5125 = vrot.lane.b32.xlu0 %v9310_v37, %s7734_s15 }
0x144f   :  { %v4991_v13 = vpop.permute.xlu1 %4990 }
0x1450   :  { %v5001_v19 = vmul.f32 %v4991_v13, %v4981_v20  ;;  %v4989_v10 = vpop.permute.xlu0 %4988 }
0x1451   :  { %v5000_v52 = vmul.f32 %v4989_v10, %v4980_v24 }
0x1452   :  { %v9322_v38 = vadd.f32 %v5005_v28, %v5001_v19 }
0x1453   :  { %v9325_v39 = vadd.f32 %v5004_v55, %v5000_v52  ;;  %v4995_v31 = vpop.permute.xlu1 %4994 }
0x1454   :  { %v5003_v16 = vmul.f32 %v4995_v31, %v4983_v25  ;;  %5018 = vrot.lane.b32.xlu1 %v9322_v38, %s7734_s15  ;;  %v4993_v49 = vpop.permute.xlu0 %4992 }
0x1455   :  { %v5002_v17 = vmul.f32 %v4993_v49, %v4982_v23  ;;  %5016 = vrot.lane.b32.xlu0 %v9325_v39, %s7734_s15 }
0x1456   :  { %v9336_v33 = vadd.f32 %v5007_v6, %v5003_v16 }
0x1457   :  { %v9338_v56 = vadd.f32 %v5006_v46, %v5002_v17 }
0x1458   :  { %5022 = vrot.lane.b32.xlu1 %v9336_v33, %s7734_s15 }
0x1459   :  { %5020 = vrot.lane.b32.xlu0 %v9338_v56, %s7734_s15 }
0x14a6   :  { %v5124_v3 = vpop.permute.xlu1 %5123 }
0x14a7   :  { %v5122_v7 = vpop.permute.xlu0 %5121 }
0x14a8   :  { %6985 = vmatprep.mubr.msk.f32.mxu0 %vm107_vm0, %v5122_v7 }
0x14a9   :  { %6986 = vmatmul.mubr.msk.f32.vlgmr.msra.gmra.mrb[72].mxu0 %vm107_vm0, %v5124_v3 }
0x14aa   :  { %7298 = vmatpush3.bf16.msra.mxu0 %v8168_v62 }
0x14ab   :  { %7300 = vmatprep.subr.bf16.mxu0 %v8181_v2 }
0x14ae   :  { %7302 = vmatpush3.bf16.msra.mxu0 %v8181_v2 }
0x14b2   :  { %v5128_v45 = vpop.permute.xlu1 %5127 }
0x14b3   :  { %v5126_v50 = vpop.permute.xlu0 %5125 }
0x14b4   :  { %6988 = vmatprep.mubr.msk.f32.mxu0 %vm107_vm0, %v5126_v50 }
0x14b5   :  { %6989 = vmatmul.mubr.msk.f32.gmra.mrb[74].mxu0 %vm107_vm0, %v5128_v45  ;;  %v9416_v45 = vadd.f32 %v9218_v48, %v8147_v40 }
0x14c6   :  { %v5019_v27 = vpop.permute.xlu1 %5018 }
0x14c7   :  { %v5017_v4 = vpop.permute.xlu0 %5016 }
0x14c8   :  { %6971 = vmatprep.mubr.msk.f32.mxu1 %vm107_vm0, %v5017_v4 }
0x14c9   :  { %6972 = vmatmul.mubr.msk.f32.vlgmr.msra.gmra.mrb[72].mxu1 %vm107_vm0, %v5019_v27 }
0x14ca   :  { %7290 = vmatpush3.bf16.msra.mxu1 %v7925_v44  ;;  %v5023_v62 = vpop.permute.xlu1 %5022 }
0x14cb   :  { %v5021_v54 = vpop.permute.xlu0 %5020  ;;  %7292 = vmatprep.subr.bf16.mxu1 %v7940_v51 }
0x14cc   :  { %6974 = vmatprep.mubr.msk.f32.mxu1 %vm107_vm0, %v5021_v54 }
0x14cd   :  { %6975 = vmatmul.mubr.msk.f32.gmra.mrb[74].mxu1 %vm107_vm0, %v5023_v62 }
0x14ce   :  { %7294 = vmatpush3.bf16.msra.mxu1 %v7940_v51  ;;  %6999 = vmatprep.mubr.msk.f32.mxu1 %vm107_vm0, %v5017_v4  ;;  %v9369_v51 = vld [vmem:[%s9597_s11] ss:$0 sm:$0xff] }
0x14cf   :  { %7304 = vmatprep.subr.bf16.mxu1 %v8179_v1 }
0x14d1   :  { %7000 = vmatmul.mubr.msk.f32.vlgmr.msra.gmra.mrb[76].mxu1 %vm107_vm0, %v5019_v27  ;;  %v9421_v27 = vadd.f32 %v9218_v48, %v8149_v41 }
0x14d2   :  { %7002 = vmatprep.mubr.msk.f32.mxu1 %vm107_vm0, %v5021_v54  ;;  %7306 = vmatpush3.bf16.msra.mxu1 %v8179_v1 }
0x14d3   :  { %7308 = vmatprep.subr.bf16.mxu1 %v8191_v8 }
0x14d5   :  { %7003 = vmatmul.mubr.msk.f32.gmra.mrb[78].mxu1 %vm107_vm0, %v5023_v62  ;;  %v9604_v62 = vld [vmem:[#allocation2_spill] sm:$0xff] }
0x14d6   :  { %7310 = vmatpush3.bf16.msra.mxu1 %v8191_v8 }
0x157c   :  { %v6987_v44 = vpop.f32.mrb[72].mxu0 }
0x157d   :  { %v5209_v2 = vadd.f32 %v9369_v51, %v6987_v44  ;;  %v5203_v12 = vpop.f32.mrb[73].mxu0  ;;  %v9428_v44 = vadd.f32 %v9218_v48, %v9604_v62 }
0x157e   :  { %v5204_v32 = vadd.f32 %v9369_v51, %v5203_v12 }
0x157f   :  { %5256 = vrot.lane.b32.xlu1 %v5209_v2, %s7733_s17 }
0x1580   :  { %5254 = vrot.lane.b32.xlu0 %v5204_v32, %s7733_s17 }
0x1588   :  { %v6990_v1 = vpop.f32.mrb[74].mxu0 }
0x1589   :  { %v5219_v14 = vadd.f32 %v9369_v51, %v6990_v1  ;;  %v5213_v53 = vpop.f32.mrb[75].mxu0 }
0x158a   :  { %v5214_v8 = vadd.f32 %v9369_v51, %v5213_v53 }
0x158b   :  { %5260 = vrot.lane.b32.xlu1 %v5219_v14, %s7733_s17 }
0x158c   :  { %5258 = vrot.lane.b32.xlu0 %v5214_v8, %s7733_s17 }
0x159c   :  { %v6973_v42 = vpop.f32.mrb[72].mxu1 }
0x159d   :  { %v5098_v61 = vpop.f32.mrb[73].mxu1  ;;  %v9393_v11 = vadd.f32 %v9390_v5, %v6973_v42 }
0x159e   :  { %v9396_v47 = vadd.f32 %v9390_v5, %v5098_v61 }
0x159f   :  { %v5223_v35 = vadd.f32 %v5209_v2, %v9393_v11  ;;  %v9605_v2 = vld [vmem:[#allocation3_spill] sm:$0xff] }
0x15a0   :  { %v6976_v43 = vpop.f32.mrb[74].mxu1  ;;  %v5222_v58 = vadd.f32 %v5204_v32, %v9396_v47  ;;  %v9432_v40 = vadd.f32 %v9218_v48, %v9605_v2 }
0x15a1   :  { %v5108_v21 = vpop.f32.mrb[75].mxu1  ;;  %v9401_v18 = vadd.f32 %v9390_v5, %v6976_v43 }
0x15a2   :  { %v6166_v22 = vmul.f32 -1.442695, %v5222_v58  ;;  %v9404_v20 = vadd.f32 %v9390_v5, %v5108_v21 }
0x15a3   :  { %v5225_v13 = vadd.f32 %v5219_v14, %v9401_v18 }
0x15a4   :  { %v7001_v59 = vpop.f32.mrb[76].mxu1  ;;  %v5224_v24 = vadd.f32 %v5214_v8, %v9404_v20 }
0x15a5   :  { %v5398_v0 = vadd.f32 %v9189_v26, %v7001_v59  ;;  %v5392_v36 = vpop.f32.mrb[77].mxu1  ;;  %v6169_v28 = vmul.f32 -1.442695, %v5225_v13 }
0x15a6   :  { %v5393_v63 = vadd.f32 %v9189_v26, %v5392_v36  ;;  %v6168_v19 = vmul.f32 -1.442695, %v5224_v24 }
0x15a7   :  { %5445 = vrot.lane.b32.xlu1 %v5398_v0, %s7733_s17  ;;  %v5412_v4 = vadd.f32 %v5398_v0, %v9416_v45 }
0x15a8   :  { %v7004_v9 = vpop.f32.mrb[78].mxu1  ;;  %5443 = vrot.lane.b32.xlu0 %v5393_v63, %s7733_s17  ;;  %v5411_v54 = vadd.f32 %v5393_v63, %v9421_v27 }
0x15a9   :  { %v5408_v60 = vadd.f32 %v9189_v26, %v7004_v9  ;;  %v5402_v29 = vpop.f32.mrb[79].mxu1  ;;  %v6175_v12 = vmul.f32 -1.442695, %v5412_v4 }
0x15aa   :  { %v5403_v30 = vadd.f32 %v9189_v26, %v5402_v29  ;;  %v6167_v26 = vmul.f32 -1.442695, %v5223_v35  ;;  %v6174_v1 = vmul.f32 -1.442695, %v5411_v54 }
0x15ab   :  { %5449 = vrot.lane.b32.xlu1 %v5408_v60, %s7733_s17  ;;  %v5414_v32 = vadd.f32 %v5408_v60, %v9428_v44 }
0x15ac   :  { %5447 = vrot.lane.b32.xlu0 %v5403_v30, %s7733_s17  ;;  %7645 = vpow2.f32 %v6167_v26  ;;  %v5413_v41 = vadd.f32 %v5403_v30, %v9432_v40 }
0x15ad   :  { %7647 = vpow2.f32 %v6166_v22  ;;  %v6177_v42 = vmul.f32 -1.442695, %v5414_v32 }
0x15ae   :  { %7649 = vpow2.f32 %v6169_v28  ;;  %v6176_v21 = vmul.f32 -1.442695, %v5413_v41 }
0x15af   :  { %7651 = vpow2.f32 %v6168_v19 }
0x15b6   :  { %v7646_v10 = vpop.eup %7645 }
0x15b7   :  { %v7648_v55 = vpop.eup %7647  ;;  %v5239_v52 = vadd.f32 1.0, %v7646_v10 }
0x15b8   :  { %v5238_v25 = vadd.f32 1.0, %v7648_v55  ;;  %v7650_v31 = vpop.eup %7649 }
0x15b9   :  { %7653 = vrcp.f32 %v5239_v52  ;;  %v7652_v23 = vpop.eup %7651  ;;  %v5241_v6 = vadd.f32 1.0, %v7650_v31 }
0x15ba   :  { %7655 = vrcp.f32 %v5238_v25  ;;  %v5240_v16 = vadd.f32 1.0, %v7652_v23 }
0x15bb   :  { %7657 = vrcp.f32 %v5241_v6 }
0x15bc   :  { %7659 = vrcp.f32 %v5240_v16 }
0x15bd   :  { %7661 = vpow2.f32 %v6175_v12 }
0x15be   :  { %7663 = vpow2.f32 %v6174_v1 }
0x15bf   :  { %7665 = vpow2.f32 %v6177_v42 }
0x15c0   :  { %7667 = vpow2.f32 %v6176_v21 }
0x15c3   :  { %v9408_v49 = vpop.eup %7653 }
0x15c4   :  { %v9410_v17 = vpop.eup %7655 }
0x15c5   :  { %v9436_v14 = vpop.eup %7657 }
0x15c6   :  { %v9438_v8 = vpop.eup %7659 }
0x15c7   :  { %v7662_v59 = vpop.eup %7661 }
0x15c8   :  { %v7664_v0 = vpop.eup %7663  ;;  %v5428_v36 = vadd.f32 1.0, %v7662_v59  ;;  %v5318_v59 = vmul.f32 %v9410_v17, %v9296_v34 }
0x15c9   :  { %v7666_v63 = vpop.eup %7665  ;;  %v5427_v9 = vadd.f32 1.0, %v7664_v0 }
0x15ca   :  { %v7668_v60 = vpop.eup %7667  ;;  %7669 = vrcp.f32 %v5428_v36  ;;  %v5430_v29 = vadd.f32 1.0, %v7666_v63 }
0x15cb   :  { %7671 = vrcp.f32 %v5427_v9  ;;  %v5429_v30 = vadd.f32 1.0, %v7668_v60  ;;  %v5297_v9 = vsub.f32 1.0, %v9436_v14 }
0x15cc   :  { %7673 = vrcp.f32 %v5430_v29  ;;  %v5320_v29 = vmul.f32 %v9438_v8, %v9310_v37 }
0x15cd   :  { %7675 = vrcp.f32 %v5429_v30 }
0x15d4   :  { %v9444_v35 = vpop.eup %7669 }
0x15d5   :  { %v9446_v26 = vpop.eup %7671 }
0x15d6   :  { %v9451_v28 = vpop.eup %7673 }
0x15d7   :  { %v9454_v10 = vpop.eup %7675 }
0x15f1   :  { %v5257_v46 = vpop.permute.xlu1 %5256 }
0x15f2   :  { %v5267_v7 = vmul.f32 %v9408_v49, %v5257_v46  ;;  %v5255_v3 = vpop.permute.xlu0 %5254 }
0x15f3   :  { %v5266_v50 = vmul.f32 %v9410_v17, %v5255_v3 }
0x15f4   :  { %5276 = vrot.lane.b32.xlu1 %v5267_v7, %s7733_s17 }
0x15f5   :  { %5274 = vrot.lane.b32.xlu0 %v5266_v50, %s7733_s17 }
0x15fd   :  { %v5261_v53 = vpop.permute.xlu1 %5260 }
0x15fe   :  { %v5269_v61 = vmul.f32 %v9436_v14, %v5261_v53  ;;  %v5259_v43 = vpop.permute.xlu0 %5258 }
0x15ff   :  { %v5268_v48 = vmul.f32 %v9438_v8, %v5259_v43  ;;  %v5294_v43 = vsub.f32 1.0, %v9410_v17 }
0x1600   :  { %5280 = vrot.lane.b32.xlu1 %v5269_v61, %s7733_s17 }
0x1601   :  { %5278 = vrot.lane.b32.xlu0 %v5268_v48, %s7733_s17 }
0x1619   :  { %v5446_v58 = vpop.permute.xlu1 %5445 }
0x161a   :  { %v5456_v22 = vmul.f32 %v9444_v35, %v5446_v58  ;;  %v5444_v13 = vpop.permute.xlu0 %5443 }
0x161b   :  { %v5455_v24 = vmul.f32 %v9446_v26, %v5444_v13  ;;  %v5484_v13 = vsub.f32 1.0, %v9444_v35 }
0x161c   :  { %5465 = vrot.lane.b32.xlu1 %v5456_v22, %s7733_s17 }
0x161d   :  { %v5450_v19 = vpop.permute.xlu1 %5449  ;;  %5463 = vrot.lane.b32.xlu0 %v5455_v24, %s7733_s17 }
0x161e   :  { %v5458_v55 = vmul.f32 %v9451_v28, %v5450_v19  ;;  %v5448_v52 = vpop.permute.xlu0 %5447  ;;  %v5507_v19 = vmul.f32 %v9446_v26, %v9325_v39 }
0x161f   :  { %v5457_v25 = vmul.f32 %v9454_v10, %v5448_v52 }
0x1620   :  { %5469 = vrot.lane.b32.xlu1 %v5458_v55, %s7733_s17 }
0x1621   :  { %5467 = vrot.lane.b32.xlu0 %v5457_v25, %s7733_s17  ;;  %v5486_v25 = vsub.f32 1.0, %v9451_v28 }
0x1666   :  { %v5277_v31 = vpop.permute.xlu1 %5276 }
0x1667   :  { %v5287_v23 = vadd.f32 %v5277_v31, %v9393_v11  ;;  %v5275_v6 = vpop.permute.xlu0 %5274 }
0x1668   :  { %v5286_v16 = vadd.f32 %v5275_v6, %v9396_v47  ;;  %v5485_v6 = vsub.f32 1.0, %v9454_v10 }
0x1669   :  { %7677 = vtanh.f32 %v5287_v23 }
0x166a   :  { %7679 = vtanh.f32 %v5286_v16  ;;  %v5510_v16 = vmul.f32 %v9451_v28, %v9336_v33 }
0x1672   :  { %v5281_v46 = vpop.permute.xlu1 %5280 }
0x1673   :  { %v7678_v7 = vpop.eup %7677  ;;  %v5289_v3 = vadd.f32 %v5281_v46, %v9401_v18  ;;  %v5279_v50 = vpop.permute.xlu0 %5278 }
0x1674   :  { %v7680_v4 = vpop.eup %7679  ;;  %v5288_v54 = vadd.f32 %v5279_v50, %v9404_v20  ;;  %5304 = vrot.lane.b32.xlu1 %v7678_v7, %s7734_s15 }
0x1675   :  { %7681 = vtanh.f32 %v5289_v3  ;;  %5302 = vrot.lane.b32.xlu0 %v7680_v4, %s7734_s15 }
0x1676   :  { %7683 = vtanh.f32 %v5288_v54 }
0x167f   :  { %v7682_v11 = vpop.eup %7681 }
0x1680   :  { %v7684_v62 = vpop.eup %7683  ;;  %5308 = vrot.lane.b32.xlu1 %v7682_v11, %s7734_s15 }
0x1681   :  { %5306 = vrot.lane.b32.xlu0 %v7684_v62, %s7734_s15 }
0x168e   :  { %v5466_v47 = vpop.permute.xlu1 %5465 }
0x168f   :  { %v5476_v2 = vadd.f32 %v5466_v47, %v9416_v45  ;;  %v5464_v18 = vpop.permute.xlu0 %5463 }
0x1690   :  { %v5475_v12 = vadd.f32 %v5464_v18, %v9421_v27  ;;  %v5295_v27 = vsub.f32 1.0, %v9408_v49 }
0x1691   :  { %7685 = vtanh.f32 %v5476_v2 }
0x1692   :  { %7687 = vtanh.f32 %v5475_v12  ;;  %v5470_v20 = vpop.permute.xlu1 %5469 }
0x1693   :  { %v5478_v32 = vadd.f32 %v5470_v20, %v9428_v44  ;;  %v5468_v1 = vpop.permute.xlu0 %5467 }
0x1694   :  { %v5477_v41 = vadd.f32 %v5468_v1, %v9432_v40  ;;  %v5319_v40 = vmul.f32 %v9408_v49, %v9294_v15  ;;  %v5296_v15 = vsub.f32 1.0, %v9438_v8  ;;  %v5321_v49 = vmul.f32 %v9436_v14, %v9308_v57 }
0x1695   :  { %7689 = vtanh.f32 %v5478_v32  ;;  %v5483_v57 = vsub.f32 1.0, %v9446_v26  ;;  %v5508_v14 = vmul.f32 %v9444_v35, %v9322_v38  ;;  %v5509_v35 = vmul.f32 %v9454_v10, %v9338_v56 }
0x1696   :  { %7691 = vtanh.f32 %v5477_v41 }
0x169b   :  { %v7686_v53 = vpop.eup %7685 }
0x169c   :  { %v7688_v42 = vpop.eup %7687  ;;  %5493 = vrot.lane.b32.xlu1 %v7686_v53, %s7734_s15 }
0x169d   :  { %5491 = vrot.lane.b32.xlu0 %v7688_v42, %s7734_s15 }
0x169f   :  { %v7690_v45 = vpop.eup %7689 }
0x16a0   :  { %v7692_v61 = vpop.eup %7691  ;;  %5497 = vrot.lane.b32.xlu1 %v7690_v45, %s7734_s15 }
0x16a1   :  { %5495 = vrot.lane.b32.xlu0 %v7692_v61, %s7734_s15 }
0x16e6   :  { %v5305_v44 = vpop.permute.xlu1 %5304 }
0x16e7   :  { %v5315_v21 = vmul.f32 %v5305_v44, %v5295_v27  ;;  %v5303_v48 = vpop.permute.xlu0 %5302 }
0x16e8   :  { %v5314_v0 = vmul.f32 %v5303_v48, %v5294_v43 }
0x16e9   :  { %v9482_v36 = vadd.f32 %v5319_v40, %v5315_v21 }
0x16ea   :  { %v9484_v63 = vadd.f32 %v5318_v59, %v5314_v0 }
0x16eb   :  { %5626 = vrot.lane.b32.xlu1 %v9482_v36, %s7734_s15 }
0x16ec   :  { %5624 = vrot.lane.b32.xlu0 %v9484_v63, %s7734_s15 }
0x16f2   :  { %v5309_v60 = vpop.permute.xlu1 %5308 }
0x16f3   :  { %v5317_v34 = vmul.f32 %v5309_v60, %v5297_v9  ;;  %v5307_v17 = vpop.permute.xlu0 %5306 }
0x16f4   :  { %v5316_v30 = vmul.f32 %v5307_v17, %v5296_v15 }
0x16f5   :  { %v9496_v58 = vadd.f32 %v5321_v49, %v5317_v34 }
0x16f6   :  { %v9498_v22 = vadd.f32 %v5320_v29, %v5316_v30 }
0x16f7   :  { %5630 = vrot.lane.b32.xlu1 %v9496_v58, %s7734_s15 }
0x16f8   :  { %5628 = vrot.lane.b32.xlu0 %v9498_v22, %s7734_s15 }
0x170e   :  { %v5494_v24 = vpop.permute.xlu1 %5493 }
0x170f   :  { %v5504_v37 = vmul.f32 %v5494_v24, %v5484_v13  ;;  %v5492_v8 = vpop.permute.xlu0 %5491 }
0x1710   :  { %v5503_v55 = vmul.f32 %v5492_v8, %v5483_v57 }
0x1711   :  { %v5512_v52 = vadd.f32 %v5508_v14, %v5504_v37 }
0x1712   :  { %v5511_v31 = vadd.f32 %v5507_v19, %v5503_v55  ;;  %v5498_v23 = vpop.permute.xlu1 %5497 }
0x1713   :  { %v5506_v46 = vmul.f32 %v5498_v23, %v5486_v25  ;;  %5521 = vrot.lane.b32.xlu1 %v5512_v52, %s7734_s15  ;;  %v5496_v38 = vpop.permute.xlu0 %5495 }
0x1714   :  { %v5505_v7 = vmul.f32 %v5496_v38, %v5485_v6  ;;  %5519 = vrot.lane.b32.xlu0 %v5511_v31, %s7734_s15 }
0x1715   :  { %v5514_v39 = vadd.f32 %v5510_v16, %v5506_v46 }
0x1716   :  { %v5513_v26 = vadd.f32 %v5509_v35, %v5505_v7 }
0x1717   :  { %5525 = vrot.lane.b32.xlu1 %v5514_v39, %s7734_s15 }
0x1718   :  { %5523 = vrot.lane.b32.xlu0 %v5513_v26, %s7734_s15 }
0x175d   :  { %v5627_v50 = vpop.permute.xlu1 %5626 }
0x175e   :  { %v5625_v3 = vpop.permute.xlu0 %5624 }
0x175f   :  { %7027 = vmatprep.mubr.msk.f32.mxu1 %vm107_vm0, %v5625_v3 }
0x1760   :  { %7028 = vmatmul.mubr.msk.f32.vlgmr.msra.gmra.mrb[80].mxu1 %vm107_vm0, %v5627_v50 }
0x1769   :  { %v5631_v28 = vpop.permute.xlu1 %5630 }
0x176a   :  { %v5629_v33 = vpop.permute.xlu0 %5628 }
0x176b   :  { %7030 = vmatprep.mubr.msk.f32.mxu1 %vm107_vm0, %v5629_v33  ;;  %v5829_v33 = vld [vmem:[%s9599_s12] sm:$0xff] }
0x176c   :  { %7031 = vmatmul.mubr.msk.f32.gmra.mrb[82].mxu1 %vm107_vm0, %v5631_v28  ;;  %v5830_v28 = vld [vmem:[%s9599_s12 + $0x8] sm:$0xff] }
0x1785   :  { %v5522_v56 = vpop.permute.xlu1 %5521 }
0x1786   :  { %v5520_v10 = vpop.permute.xlu0 %5519 }
0x1787   :  { %7013 = vmatprep.mubr.msk.f32.mxu0 %vm107_vm0, %v5520_v10 }
0x1788   :  { %7014 = vmatmul.mubr.msk.f32.vlgmr.msra.gmra.mrb[76].mxu0 %vm107_vm0, %v5522_v56  ;;  %v7311_v56 = vpack.c.bf16 %v5830_v28, %v5829_v33 }
0x1789   :  { %v5526_v54 = vpop.permute.xlu1 %5525 }
0x178a   :  { %v5524_v4 = vpop.permute.xlu0 %5523  ;;  %7312 = vmatprep.subr.bf16.mxu0 %v7311_v56  ;;  %7319 = vmatprep.subr.bf16.mxu1 %v7311_v56 }
0x178b   :  { %7016 = vmatprep.mubr.msk.f32.mxu0 %vm107_vm0, %v5524_v4  ;;  %7314 = vmatpush3.bf16.msra.mxu0 %v7311_v56 }
0x178c   :  { %7017 = vmatmul.mubr.msk.f32.gmra.mrb[78].mxu0 %vm107_vm0, %v5526_v54  ;;  %7321 = vmatpush3.bf16.msra.mxu1 %v7311_v56  ;;  %v5831_v54 = vld [vmem:[%s9599_s12 + $0x10] sm:$0xff] }
0x1833   :  { %v7029_v11 = vpop.f32.mrb[80].mxu1 }
0x1834   :  { %v5706_v62 = vpop.f32.mrb[81].mxu1  ;;  %v5712_v2 = vadd.f32 %v9369_v51, %v7029_v11  ;;  %v5832_v11 = vld [vmem:[%s9599_s12 + $0x18] sm:$0xff] }
0x1835   :  { %v5707_v47 = vadd.f32 %v9369_v51, %v5706_v62  ;;  %v7315_v62 = vpack.c.bf16 %v5832_v11, %v5831_v54 }
0x1837   :  { %5757 = vrot.lane.b32.xlu0 %v5707_v47, %s7733_s17  ;;  %7316 = vmatprep.subr.bf16.mxu0 %v7315_v62 }
0x1838   :  { %7320 = vmatprep.subr.bf16.mxu1 %v7315_v62  ;;  %7318 = vmatpush3.bf16.msra.mxu0 %v7315_v62 }
0x1839   :  { %7322 = vmatpush3.bf16.msra.mxu1 %v7315_v62 }
0x183b   :  { %5759 = vrot.lane.b32.xlu0 %v5712_v2, %s7733_s17 }
0x183f   :  { %v7032_v18 = vpop.f32.mrb[82].mxu1 }
0x1840   :  { %v5716_v12 = vpop.f32.mrb[83].mxu1  ;;  %v5722_v32 = vadd.f32 %v9369_v51, %v7032_v18 }
0x1841   :  { %v5717_v20 = vadd.f32 %v9369_v51, %v5716_v12 }
0x1843   :  { %5761 = vrot.lane.b32.xlu1 %v5717_v20, %s7733_s17 }
0x1847   :  { %5763 = vrot.lane.b32.xlu1 %v5722_v32, %s7733_s17 }
0x185b   :  { %v7015_v1 = vpop.f32.mrb[76].mxu0 }
0x185c   :  { %v5601_v41 = vpop.f32.mrb[77].mxu0  ;;  %v5607_v61 = vadd.f32 %v9390_v5, %v7015_v1 }
0x185d   :  { %v5602_v45 = vadd.f32 %v9390_v5, %v5601_v41 }
0x185e   :  { %v5726_v44 = vadd.f32 %v5712_v2, %v5607_v61 }
0x185f   :  { %v7018_v53 = vpop.f32.mrb[78].mxu0  ;;  %v5725_v27 = vadd.f32 %v5707_v47, %v5602_v45 }
0x1860   :  { %v5611_v42 = vpop.f32.mrb[79].mxu0  ;;  %v6187_v40 = vmul.f32 -1.442695, %v5726_v44  ;;  %v5617_v51 = vadd.f32 %v9390_v5, %v7018_v53 }
0x1861   :  { %v6186_v43 = vmul.f32 -1.442695, %v5725_v27  ;;  %v5612_v21 = vadd.f32 %v9390_v5, %v5611_v42 }
0x1862   :  { %v5728_v59 = vadd.f32 %v5722_v32, %v5617_v51 }
0x1863   :  { %7693 = vpow2.f32 %v6186_v43  ;;  %v5727_v48 = vadd.f32 %v5717_v20, %v5612_v21 }
0x1864   :  { %7695 = vpow2.f32 %v6187_v40  ;;  %v6189_v60 = vmul.f32 -1.442695, %v5728_v59 }
0x1865   :  { %v6188_v0 = vmul.f32 -1.442695, %v5727_v48 }
0x1867   :  { %7697 = vpow2.f32 %v6188_v0 }
0x1868   :  { %7699 = vpow2.f32 %v6189_v60 }
0x186d   :  { %v7694_v9 = vpop.eup %7693 }
0x186e   :  { %v5741_v15 = vadd.f32 1.0, %v7694_v9  ;;  %v7696_v49 = vpop.eup %7695 }
0x186f   :  { %v5742_v34 = vadd.f32 1.0, %v7696_v49 }
0x1870   :  { %7701 = vrcp.f32 %v5741_v15 }
0x1871   :  { %7703 = vrcp.f32 %v5742_v34  ;;  %v7698_v17 = vpop.eup %7697 }
0x1872   :  { %v5743_v29 = vadd.f32 1.0, %v7698_v17  ;;  %v7700_v30 = vpop.eup %7699 }
0x1873   :  { %v5744_v14 = vadd.f32 1.0, %v7700_v30 }
0x1874   :  { %7705 = vrcp.f32 %v5743_v29 }
0x1875   :  { %7707 = vrcp.f32 %v5744_v14 }
0x187a   :  { %v7702_v13 = vpop.eup %7701 }
0x187b   :  { %v7704_v5 = vpop.eup %7703  ;;  %v5797_v47 = vsub.f32 1.0, %v7702_v13  ;;  %v5821_v18 = vmul.f32 %v7702_v13, %v9484_v63 }
0x187c   :  { %v5798_v32 = vsub.f32 1.0, %v7704_v5  ;;  %v5822_v41 = vmul.f32 %v7704_v5, %v9482_v36 }
0x187e   :  { %v7706_v19 = vpop.eup %7705 }
0x187f   :  { %v7708_v25 = vpop.eup %7707  ;;  %v5823_v27 = vmul.f32 %v7706_v19, %v9498_v22 }
0x1880   :  { %v5800_v40 = vsub.f32 1.0, %v7708_v25 }
0x18a9   :  { %v5758_v24 = vpop.permute.xlu0 %5757 }
0x18aa   :  { %v5769_v57 = vmul.f32 %v7702_v13, %v5758_v24 }
0x18ac   :  { %5777 = vrot.lane.b32.xlu0 %v5769_v57, %s7733_s17 }
0x18ad   :  { %v5760_v37 = vpop.permute.xlu0 %5759 }
0x18ae   :  { %v5770_v8 = vmul.f32 %v7704_v5, %v5760_v37 }
0x18b0   :  { %5779 = vrot.lane.b32.xlu0 %v5770_v8, %s7733_s17 }
0x18b5   :  { %v5762_v55 = vpop.permute.xlu1 %5761 }
0x18b6   :  { %v5771_v52 = vmul.f32 %v7706_v19, %v5762_v55 }
0x18b8   :  { %5781 = vrot.lane.b32.xlu1 %v5771_v52, %s7733_s17 }
0x18b9   :  { %v5764_v31 = vpop.permute.xlu1 %5763 }
0x18ba   :  { %v5772_v23 = vmul.f32 %v7708_v25, %v5764_v31 }
0x18bc   :  { %5783 = vrot.lane.b32.xlu1 %v5772_v23, %s7733_s17 }
0x191e   :  { %v5778_v6 = vpop.permute.xlu0 %5777 }
0x191f   :  { %v5789_v16 = vadd.f32 %v5778_v6, %v5602_v45  ;;  %v5799_v45 = vsub.f32 1.0, %v7706_v19 }
0x1921   :  { %7709 = vtanh.f32 %v5789_v16 }
0x1922   :  { %v5780_v46 = vpop.permute.xlu0 %5779 }
0x1923   :  { %v5790_v38 = vadd.f32 %v5780_v46, %v5607_v61 }
0x1925   :  { %7711 = vtanh.f32 %v5790_v38 }
0x192a   :  { %v5782_v35 = vpop.permute.xlu1 %5781 }
0x192b   :  { %v7710_v7 = vpop.eup %7709  ;;  %v5791_v39 = vadd.f32 %v5782_v35, %v5612_v21  ;;  %v5824_v21 = vmul.f32 %v7708_v25, %v9496_v58  ;;  %v6190_v58 = vld [vmem:[%s9600_s13] ss:$0 sm:$0xff] }
0x192c   :  { %5805 = vrot.lane.b32.xlu0 %v7710_v7, %s7734_s15 }
0x192d   :  { %7713 = vtanh.f32 %v5791_v39 }
0x192e   :  { %v5784_v26 = vpop.permute.xlu1 %5783 }
0x192f   :  { %v7712_v3 = vpop.eup %7711  ;;  %v5792_v50 = vadd.f32 %v5784_v26, %v5617_v51 }
0x1930   :  { %5807 = vrot.lane.b32.xlu0 %v7712_v3, %s7734_s15 }
0x1931   :  { %7715 = vtanh.f32 %v5792_v50 }
0x1937   :  { %v7714_v10 = vpop.eup %7713 }
0x1938   :  { %5809 = vrot.lane.b32.xlu1 %v7714_v10, %s7734_s15 }
0x193b   :  { %v7716_v4 = vpop.eup %7715 }
0x193c   :  { %5811 = vrot.lane.b32.xlu1 %v7716_v4, %s7734_s15 }
0x199e   :  { %v5806_v2 = vpop.permute.xlu0 %5805 }
0x199f   :  { %v5817_v12 = vmul.f32 %v5806_v2, %v5797_v47 }
0x19a1   :  { %v5825_v20 = vadd.f32 %v5821_v18, %v5817_v12 }
0x19a2   :  { %v5808_v1 = vpop.permute.xlu0 %5807 }
0x19a3   :  { %v5818_v53 = vmul.f32 %v5808_v1, %v5798_v32  ;;  %5844 = vrot.lane.b32.xlu0 %v5825_v20, %s7734_s15 }
0x19a5   :  { %v5826_v42 = vadd.f32 %v5822_v41, %v5818_v53 }
0x19a7   :  { %5846 = vrot.lane.b32.xlu0 %v5826_v42, %s7734_s15 }
0x19aa   :  { %v5810_v61 = vpop.permute.xlu1 %5809 }
0x19ab   :  { %v5819_v44 = vmul.f32 %v5810_v61, %v5799_v45 }
0x19ad   :  { %v5827_v43 = vadd.f32 %v5823_v27, %v5819_v44 }
0x19ae   :  { %v5812_v63 = vpop.permute.xlu1 %5811 }
0x19af   :  { %v5820_v51 = vmul.f32 %v5812_v63, %v5800_v40  ;;  %5848 = vrot.lane.b32.xlu1 %v5827_v43, %s7734_s15 }
0x19b1   :  { %v5828_v36 = vadd.f32 %v5824_v21, %v5820_v51 }
0x19b3   :  { %5850 = vrot.lane.b32.xlu1 %v5828_v36, %s7734_s15 }
0x1a15   :  { %v5845_v48 = vpop.permute.xlu0 %5844 }
0x1a16   :  { %7041 = vmatprep.mubr.msk.f32.mxu0 %vm107_vm0, %v5845_v48 }
0x1a19   :  { %v5847_v59 = vpop.permute.xlu0 %5846 }
0x1a1a   :  { %7042 = vmatmul.mubr.msk.f32.vlgmr.msra.gmra.mrb[80].mxu0 %vm107_vm0, %v5847_v59 }
0x1a21   :  { %v5849_v0 = vpop.permute.xlu1 %5848 }
0x1a22   :  { %7044 = vmatprep.mubr.msk.f32.mxu1 %vm107_vm0, %v5849_v0 }
0x1a25   :  { %v5851_v22 = vpop.permute.xlu1 %5850 }
0x1a26   :  { %7045 = vmatmul.mubr.msk.f32.vlgmr.msra.gmra.mrb[84].mxu1 %vm107_vm0, %v5851_v22 }
0x1aed   :  { %v7043_v9 = vpop.f32.mrb[80].mxu0 }
0x1aee   :  { %v5932_v60 = vadd.f32 %v7043_v9, %v6190_v58  ;;  %v5926_v15 = vpop.f32.mrb[81].mxu0 }
0x1aef   :  { %v5927_v49 = vadd.f32 %v6190_v58, %v5926_v15 }
0x1af0   :  { %v5946_v34 = vmax.f32 %v5932_v60, 0.0 }
0x1af1   :  { %v5945_v17 = vmax.f32 %v5927_v49, 0.0 }
0x1af2   :  { %5950 = vst [vmem:[%s9601_s14 + $0x8] sm:$0xff] %v5946_v34 }
0x1af3   :  { %5949 = vst [vmem:[%s9601_s14] sm:$0xff] %v5945_v17 }
0x1af9   :  { %v7046_v29 = vpop.f32.mrb[84].mxu1 }
0x1afa   :  { %v5942_v30 = vadd.f32 %v7046_v29, %v6190_v58  ;;  %v5936_v13 = vpop.f32.mrb[85].mxu1 }
0x1afb   :  { %v5937_v24 = vadd.f32 %v6190_v58, %v5936_v13 }
0x1afc   :  { %v5948_v57 = vmax.f32 %v5942_v30, 0.0 }
0x1afd   :  { %v5947_v14 = vmax.f32 %v5937_v24, 0.0 }
0x1afe   :  { %5952 = vst [vmem:[%s9601_s14 + $0x18] sm:$0xff] %v5948_v57 }
0x1aff   :  { %5951 = vst [vmem:[%s9601_s14 + $0x10] sm:$0xff] %v5947_v14 }

</bundles_post_ra>
